<compile_context>
chip_gen: v5e
topology: v5e:2x2
jax: 0.10.0
libtpu: 0.0.40
codegen_flags: <defaults>
</compile_context>

<pallas_src>
import math
import numpy as np
import jax
import jax.numpy as jnp
from jax import lax
from jax.experimental import pallas as pl
from jax.experimental.pallas import tpu as pltpu


def _round_up(x, m):
    return ((x + m - 1) // m) * m


def _conv_to_toeplitz(w, levels):
    """Expand an OIHW conv weight into a dense block-Toeplitz matrix.

    Rows index the input in torch .view order ((ci*2 + hi)*L + wi) and columns
    index the output in torch .view order ((co*2 + ho)*L + wo), for 'same'
    padding with an odd kernel on a (2, L) spatial grid.
    """
    cout, cin, kh, kw = (int(d) for d in w.shape)
    ph, pw = kh // 2, kw // 2
    L = levels
    ci = np.arange(cin)[:, None, None, None, None, None]
    hi = np.arange(2)[None, :, None, None, None, None]
    wi = np.arange(L)[None, None, :, None, None, None]
    co = np.arange(cout)[None, None, None, :, None, None]
    ho = np.arange(2)[None, None, None, None, :, None]
    wo = np.arange(L)[None, None, None, None, None, :]
    dh = hi - ho + ph
    dw = wi - wo + pw
    valid = (dh >= 0) & (dh < kh) & (dw >= 0) & (dw < kw)
    widx = ((co * cin + ci) * kh + np.clip(dh, 0, kh - 1)) * kw + np.clip(dw, 0, kw - 1)
    shape6 = (cin, 2, L, cout, 2, L)
    widx = np.broadcast_to(widx, shape6).reshape(cin * 2 * L, cout * 2 * L)
    valid = np.broadcast_to(valid, shape6).reshape(cin * 2 * L, cout * 2 * L)
    t = jnp.reshape(w, (-1,))[jnp.asarray(widx)]
    return t * jnp.asarray(valid, w.dtype)


def _make_kernel(two_l, n_conv, n_fc):
    """Kernel body: one bf16 MXU matmul per layer on a lane-dense activation."""

    def kernel(*refs):
        x_ref = refs[0]
        idx = 1
        conv_refs = refs[idx:idx + 2 * n_conv]
        idx += 2 * n_conv
        fc0_wa, fc0_wb, fc0_b = refs[idx:idx + 3]
        idx += 3
        fc_rest = refs[idx:idx + 2 * (n_fc - 1)]
        idx += 2 * (n_fc - 1)
        o_ref = refs[idx]

        x = x_ref[...]                          # (TB, 2L+2), read once
        scal = x[:, two_l:two_l + 2]            # (TB, 2) scalar features, kept f32

        # conv layer 1: the 2 scalar input columns were folded into T1 as zero
        # rows, so the first matmul consumes the input tile directly.
        z = jnp.dot(x.astype(jnp.bfloat16), conv_refs[0][...],
                    preferred_element_type=jnp.float32)
        z = jnp.maximum(z + conv_refs[1][...], 0.0)

        # remaining conv layers: block-Toeplitz MXU matmul + bias + ReLU.
        for li in range(1, n_conv):
            t_ref, b_ref = conv_refs[2 * li], conv_refs[2 * li + 1]
            z = jnp.dot(z.astype(jnp.bfloat16), t_ref[...],
                        preferred_element_type=jnp.float32)
            z = jnp.maximum(z + b_ref[...], 0.0)

        # FC0: lane-dense part via MXU; the 2 scalar-feature rows of W0 are
        # applied as f32 rank-1 broadcast updates (cheap VPU filler).
        z = jnp.dot(z.astype(jnp.bfloat16), fc0_wa[...],
                    preferred_element_type=jnp.float32)
        z = z + scal[:, 0:1] * fc0_wb[0:1, :] + scal[:, 1:2] * fc0_wb[1:2, :]
        z = z + fc0_b[...]
        if n_fc > 1:
            z = jnp.maximum(z, 0.0)

        for li in range(n_fc - 1):
            w_ref, b_ref = fc_rest[2 * li], fc_rest[2 * li + 1]
            z = jnp.dot(z.astype(jnp.bfloat16), w_ref[...],
                        preferred_element_type=jnp.float32) + b_ref[...]
            if li < n_fc - 2:
                z = jnp.maximum(z, 0.0)

        o_ref[...] = z.astype(o_ref.dtype)

    return kernel


def _choose_block_b(B):
    """One step for small batches (grid-step overhead dominates); for large
    batches 2k-8k row tiles with an even grid of >= 4 steps (keeps both v7x
    TensorCores pipelined and load-balanced)."""
    b8 = _round_up(B, 8)
    if b8 <= 2048:
        return b8, 1
    n_steps = max(4, 2 * math.ceil(math.ceil(b8 / 8192) / 2))   # even, >= 4
    bb = _round_up(math.ceil(b8 / n_steps), 8)
    return bb, n_steps


def conv_column_net_2d(x, conv_params, fc_params, *, levels, block_b=None):
    """Pallas forward pass of ConvColumnNet2D (eval mode / dropout p=0)."""
    B, din = x.shape
    L = levels
    assert din == 2 * L + 2
    n_conv = len(conv_params)
    n_fc = len(fc_params)
    assert n_conv >= 1 and n_fc >= 1
    for (w, _) in conv_params:
        kh, kw = int(w.shape[2]), int(w.shape[3])
        # TODO(synk): even kernel sizes change the conv output spatial size;
        # only the odd-kernel ("same"-padding) case is implemented here.
        assert kh % 2 == 1 and kw % 2 == 1

    if block_b is None:
        block_b, grid_n = _choose_block_b(B)
    else:
        block_b = _round_up(int(block_b), 8)
        grid_n = max(1, -(-B // block_b))
    Bp = block_b * grid_n
    xp = x if Bp == B else jnp.pad(x, ((0, Bp - B), (0, 0)))

    c_last = int(conv_params[-1][0].shape[0])
    fc_in = c_last * 2 * L + 2
    out_dim = int(fc_params[-1][0].shape[1])

    def full_spec(arr):
        nd = arr.ndim
        return pl.BlockSpec(arr.shape, (lambda i, _nd=nd: (0,) * _nd))

    inputs = [xp]
    in_specs = [pl.BlockSpec((block_b, din), lambda i: (i, 0))]

    # Conv stack weights: block-Toeplitz matrices in bf16 (single-pass MXU,
    # half the weight DMA/VMEM); biases kept f32 for the VPU path.
    for li, (w, b) in enumerate(conv_params):
        t = _conv_to_toeplitz(w.astype(jnp.float32), L)
        if li == 0:
            # fold the 2 scalar input columns in as zero rows so the first
            # matmul reads the input tile directly (no in-kernel slice copy).
            t = jnp.concatenate([t, jnp.zeros((2, t.shape[1]), t.dtype)], axis=0)
        t = t.astype(jnp.bfloat16)
        br = jnp.repeat(b.astype(jnp.float32), 2 * L).reshape(1, -1)
        inputs += [t, br]
        in_specs += [full_spec(t), full_spec(br)]

    w0, b0 = fc_params[0]
    assert int(w0.shape[0]) == fc_in
    w0a = w0[:fc_in - 2, :].astype(jnp.bfloat16)    # lane-dense K = c_last*2*L (MXU)
    w0b = w0[fc_in - 2:, :].astype(jnp.float32)     # 2 scalar rows (f32 rank-1 VPU)
    b0r = b0.reshape(1, -1).astype(jnp.float32)
    inputs += [w0a, w0b, b0r]
    in_specs += [full_spec(w0a), full_spec(w0b), full_spec(b0r)]
    for (w, b) in fc_params[1:]:
        wf = w.astype(jnp.bfloat16)
        br = b.reshape(1, -1).astype(jnp.float32)
        inputs += [wf, br]
        in_specs += [full_spec(wf), full_spec(br)]

    # advisory cost estimate for XLA scheduling around the custom call
    flops = 2 * Bp * din * (int(conv_params[0][0].shape[0]) * 2 * L)
    for (w, _) in conv_params[1:]:
        cout, cin = int(w.shape[0]), int(w.shape[1])
        flops += 2 * Bp * (cin * 2 * L) * (cout * 2 * L)
    flops += 2 * Bp * (fc_in - 2) * int(w0.shape[1]) + 4 * Bp * int(w0.shape[1])
    for (w, _) in fc_params[1:]:
        flops += 2 * Bp * int(w.shape[0]) * int(w.shape[1])
    weight_bytes = sum(int(a.size) * a.dtype.itemsize for a in inputs[1:])
    bytes_accessed = int(xp.size) * 4 + Bp * out_dim * 4 + weight_bytes

    # Per-step VMEM estimate: double-buffered x/out tiles + weights (x2 bufs)
    # + a few live f32 activation tiles.  Only raise the scoped limit when the
    # default would be exceeded; cap well under v7x's 64 MiB physical VMEM.
    act_w = max([int(w.shape[0]) * 2 * L for (w, _) in conv_params]
                + [int(w.shape[1]) for (w, _) in fc_params])
    vmem_est = (2 * block_b * din * 4 + 2 * block_b * out_dim * 4
                + 2 * weight_bytes + 4 * block_b * act_w * 4)
    vmem_limit = None if vmem_est < (28 << 20) else int(min(vmem_est + (4 << 20), 56 << 20))

    kernel = _make_kernel(2 * L, n_conv, n_fc)
    out = pl.pallas_call(
        kernel,
        out_shape=jax.ShapeDtypeStruct((Bp, out_dim), jnp.float32),
        grid=(grid_n,),
        in_specs=in_specs,
        out_specs=pl.BlockSpec((block_b, out_dim), lambda i: (i, 0)),
        compiler_params=pltpu.CompilerParams(
            dimension_semantics=("parallel",),
            vmem_limit_bytes=vmem_limit),
        cost_estimate=pl.CostEstimate(
            flops=int(flops), transcendentals=0, bytes_accessed=int(bytes_accessed)),
    )(*inputs)
    return out[:B]


def init_params(key, levels, conv_cfgs, fc_layer_sizes):
    conv_params = []
    cin = 1
    for cfg in conv_cfgs:
        cout = cfg['filters']
        kh, kw = cfg['kernel']
        key, k1, k2 = jax.random.split(key, 3)
        w = jax.random.normal(k1, (cout, cin, kh, kw), jnp.float32) * 0.2
        b = jax.random.normal(k2, (cout,), jnp.float32) * 0.1
        conv_params.append((w, b))
        cin = cout
    fc_in = cin * 2 * levels + 2
    sizes = [fc_in] + list(fc_layer_sizes)
    fc_params = []
    for i in range(len(sizes) - 1):
        key, k1, k2 = jax.random.split(key, 3)
        w = jax.random.normal(k1, (sizes[i], sizes[i + 1]), jnp.float32) * (sizes[i] ** -0.5)
        b = jax.random.normal(k2, (sizes[i + 1],), jnp.float32) * 0.1
        fc_params.append((w, b))
    return conv_params, fc_params


def reference_forward(x, conv_params, fc_params, levels):
    """Pure-JAX reference reproducing ConvColumnNet2D.forward (eval / p=0)."""
    B = x.shape[0]
    h = x[:, :2 * levels].reshape(B, 1, 2, levels)
    scal = x[:, 2 * levels:]
    for (w, b) in conv_params:
        kh, kw = w.shape[2], w.shape[3]
        h = lax.conv_general_dilated(
            h, w, window_strides=(1, 1),
            padding=((kh // 2, kh // 2), (kw // 2, kw // 2)),
            dimension_numbers=("NCHW", "OIHW", "NCHW"),
            precision=lax.Precision.HIGHEST)
        h = jnp.maximum(h + b[None, :, None, None], 0.0)
    z = jnp.concatenate([h.reshape(B, -1), scal], axis=1)
    for i, (w, b) in enumerate(fc_params):
        z = jnp.dot(z, w, precision=lax.Precision.HIGHEST) + b
        if i < len(fc_params) - 1:
            z = jnp.maximum(z, 0.0)
    return z


if __name__ == "__main__":
    levels = 16
    conv_layer_configs = [{'filters': 4, 'kernel': (3, 3)},
                          {'filters': 8, 'kernel': (3, 3)}]
    fc_layer_sizes = [32, levels]
    B = 512                       # small demo: auto-tiling uses one 512-row step

    key = jax.random.PRNGKey(0)
    key, kx = jax.random.split(key)
    x = jax.random.normal(kx, (B, 2 * levels + 2), jnp.float32)
    conv_params, fc_params = init_params(key, levels, conv_layer_configs, fc_layer_sizes)

    out = conv_column_net_2d(x, conv_params, fc_params, levels=levels)
    out = jax.block_until_ready(out)

    ref = reference_forward(x, conv_params, fc_params, levels)
    assert out.shape == (B, fc_layer_sizes[-1])
    err = float(jnp.max(jnp.abs(out - ref)))
    scale = float(jnp.max(jnp.abs(ref)))
    # bf16 MXU inputs with f32 accumulation vs HIGHEST-precision f32 reference.
    assert err <= 5e-2 * max(1.0, scale), f"max abs err {err} (ref scale {scale})"
    print("KERNEL_OK")
</pallas_src>

<mosaic_0001>
module attributes {stable_mosaic.version = 11 : i64} {
  func.func @kernel(%arg0: i32, %arg1: memref<512x34xf32, #tpu.memory_space<vmem>>, %arg2: memref<34x128xbf16, #tpu.memory_space<vmem>>, %arg3: memref<1x128xf32, #tpu.memory_space<vmem>>, %arg4: memref<128x256xbf16, #tpu.memory_space<vmem>>, %arg5: memref<1x256xf32, #tpu.memory_space<vmem>>, %arg6: memref<256x32xbf16, #tpu.memory_space<vmem>>, %arg7: memref<2x32xf32, #tpu.memory_space<vmem>>, %arg8: memref<1x32xf32, #tpu.memory_space<vmem>>, %arg9: memref<32x16xbf16, #tpu.memory_space<vmem>>, %arg10: memref<1x16xf32, #tpu.memory_space<vmem>>, %arg11: memref<512x16xf32, #tpu.memory_space<vmem>>) attributes {dimension_semantics = [#tpu.dimension_semantics<parallel>], iteration_bounds = array<i64: 1>, scalar_prefetch = 0 : i64, scratch_operands = 0 : i64, tpu.core_type = #tpu.core_type<tc>, window_params = [{transform_indices = @transform_0, window_bounds = array<i64: 512, 34>}, {pipeline_mode = #tpu.pipeline_mode<synchronous>, transform_indices = @transform_1, window_bounds = array<i64: 34, 128>}, {pipeline_mode = #tpu.pipeline_mode<synchronous>, transform_indices = @transform_2, window_bounds = array<i64: 1, 128>}, {pipeline_mode = #tpu.pipeline_mode<synchronous>, transform_indices = @transform_3, window_bounds = array<i64: 128, 256>}, {pipeline_mode = #tpu.pipeline_mode<synchronous>, transform_indices = @transform_4, window_bounds = array<i64: 1, 256>}, {pipeline_mode = #tpu.pipeline_mode<synchronous>, transform_indices = @transform_5, window_bounds = array<i64: 256, 32>}, {pipeline_mode = #tpu.pipeline_mode<synchronous>, transform_indices = @transform_6, window_bounds = array<i64: 2, 32>}, {pipeline_mode = #tpu.pipeline_mode<synchronous>, transform_indices = @transform_7, window_bounds = array<i64: 1, 32>}, {pipeline_mode = #tpu.pipeline_mode<synchronous>, transform_indices = @transform_8, window_bounds = array<i64: 32, 16>}, {pipeline_mode = #tpu.pipeline_mode<synchronous>, transform_indices = @transform_9, window_bounds = array<i64: 1, 16>}, {transform_indices = @transform_10, window_bounds = array<i64: 512, 16>}]} {
    %c0 = arith.constant 0 : index
    %c0_0 = arith.constant 0 : index
    %0 = vector.load %arg1[%c0, %c0_0] : memref<512x34xf32, #tpu.memory_space<vmem>>, vector<512x34xf32>
    %1 = vector.extract_strided_slice %0 {offsets = [0, 32], sizes = [512, 2], strides = [1, 1]} : vector<512x34xf32> to vector<512x2xf32>
    %2 = arith.truncf %0 : vector<512x34xf32> to vector<512x34xbf16>
    %c0_1 = arith.constant 0 : index
    %c0_2 = arith.constant 0 : index
    %3 = vector.load %arg2[%c0_1, %c0_2] : memref<34x128xbf16, #tpu.memory_space<vmem>>, vector<34x128xbf16>
    %cst = arith.constant dense<0.000000e+00> : vector<512x128xf32>
    %4 = tpu.matmul %2, %3, %cst {dimension_numbers = #tpu.dot_dimension_numbers<[1], [0], [0], [1], [0, 0, 1, 1], [], []>} : vector<512x34xbf16>, vector<34x128xbf16>, vector<512x128xf32> -> vector<512x128xf32>
    %c0_3 = arith.constant 0 : index
    %c0_4 = arith.constant 0 : index
    %5 = vector.load %arg3[%c0_3, %c0_4] : memref<1x128xf32, #tpu.memory_space<vmem>>, vector<1x128xf32>
    %6 = vector.broadcast %5 : vector<1x128xf32> to vector<512x128xf32>
    %7 = arith.addf %4, %6 : vector<512x128xf32>
    %cst_5 = arith.constant 0.000000e+00 : f32
    %8 = vector.broadcast %cst_5 : f32 to vector<512x128xf32>
    %9 = arith.maximumf %7, %8 : vector<512x128xf32>
    %10 = arith.truncf %9 : vector<512x128xf32> to vector<512x128xbf16>
    %c0_6 = arith.constant 0 : index
    %c0_7 = arith.constant 0 : index
    %11 = vector.load %arg4[%c0_6, %c0_7] : memref<128x256xbf16, #tpu.memory_space<vmem>>, vector<128x256xbf16>
    %cst_8 = arith.constant dense<0.000000e+00> : vector<512x256xf32>
    %12 = tpu.matmul %10, %11, %cst_8 {dimension_numbers = #tpu.dot_dimension_numbers<[1], [0], [0], [1], [0, 0, 1, 1], [], []>} : vector<512x128xbf16>, vector<128x256xbf16>, vector<512x256xf32> -> vector<512x256xf32>
    %c0_9 = arith.constant 0 : index
    %c0_10 = arith.constant 0 : index
    %13 = vector.load %arg5[%c0_9, %c0_10] : memref<1x256xf32, #tpu.memory_space<vmem>>, vector<1x256xf32>
    %14 = vector.broadcast %13 : vector<1x256xf32> to vector<512x256xf32>
    %15 = arith.addf %12, %14 : vector<512x256xf32>
    %cst_11 = arith.constant 0.000000e+00 : f32
    %16 = vector.broadcast %cst_11 : f32 to vector<512x256xf32>
    %17 = arith.maximumf %15, %16 : vector<512x256xf32>
    %18 = arith.truncf %17 : vector<512x256xf32> to vector<512x256xbf16>
    %c0_12 = arith.constant 0 : index
    %c0_13 = arith.constant 0 : index
    %19 = vector.load %arg6[%c0_12, %c0_13] : memref<256x32xbf16, #tpu.memory_space<vmem>>, vector<256x32xbf16>
    %cst_14 = arith.constant dense<0.000000e+00> : vector<512x32xf32>
    %20 = tpu.matmul %18, %19, %cst_14 {dimension_numbers = #tpu.dot_dimension_numbers<[1], [0], [0], [1], [0, 0, 1, 1], [], []>} : vector<512x256xbf16>, vector<256x32xbf16>, vector<512x32xf32> -> vector<512x32xf32>
    %21 = vector.extract_strided_slice %1 {offsets = [0, 0], sizes = [512, 1], strides = [1, 1]} : vector<512x2xf32> to vector<512x1xf32>
    %c0_15 = arith.constant 0 : index
    %c0_16 = arith.constant 0 : index
    %22 = vector.load %arg7[%c0_15, %c0_16] : memref<2x32xf32, #tpu.memory_space<vmem>>, vector<1x32xf32>
    %23 = vector.broadcast %21 : vector<512x1xf32> to vector<512x32xf32>
    %24 = vector.broadcast %22 : vector<1x32xf32> to vector<512x32xf32>
    %25 = arith.mulf %23, %24 : vector<512x32xf32>
    %26 = arith.addf %20, %25 : vector<512x32xf32>
    %27 = vector.extract_strided_slice %1 {offsets = [0, 1], sizes = [512, 1], strides = [1, 1]} : vector<512x2xf32> to vector<512x1xf32>
    %c1 = arith.constant 1 : index
    %c0_17 = arith.constant 0 : index
    %28 = vector.load %arg7[%c1, %c0_17] : memref<2x32xf32, #tpu.memory_space<vmem>>, vector<1x32xf32>
    %29 = vector.broadcast %27 : vector<512x1xf32> to vector<512x32xf32>
    %30 = vector.broadcast %28 : vector<1x32xf32> to vector<512x32xf32>
    %31 = arith.mulf %29, %30 : vector<512x32xf32>
    %32 = arith.addf %26, %31 : vector<512x32xf32>
    %c0_18 = arith.constant 0 : index
    %c0_19 = arith.constant 0 : index
    %33 = vector.load %arg8[%c0_18, %c0_19] : memref<1x32xf32, #tpu.memory_space<vmem>>, vector<1x32xf32>
    %34 = vector.broadcast %33 : vector<1x32xf32> to vector<512x32xf32>
    %35 = arith.addf %32, %34 : vector<512x32xf32>
    %cst_20 = arith.constant 0.000000e+00 : f32
    %36 = vector.broadcast %cst_20 : f32 to vector<512x32xf32>
    %37 = arith.maximumf %35, %36 : vector<512x32xf32>
    %38 = arith.truncf %37 : vector<512x32xf32> to vector<512x32xbf16>
    %c0_21 = arith.constant 0 : index
    %c0_22 = arith.constant 0 : index
    %39 = vector.load %arg9[%c0_21, %c0_22] : memref<32x16xbf16, #tpu.memory_space<vmem>>, vector<32x16xbf16>
    %cst_23 = arith.constant dense<0.000000e+00> : vector<512x16xf32>
    %40 = tpu.matmul %38, %39, %cst_23 {dimension_numbers = #tpu.dot_dimension_numbers<[1], [0], [0], [1], [0, 0, 1, 1], [], []>} : vector<512x32xbf16>, vector<32x16xbf16>, vector<512x16xf32> -> vector<512x16xf32>
    %c0_24 = arith.constant 0 : index
    %c0_25 = arith.constant 0 : index
    %41 = vector.load %arg10[%c0_24, %c0_25] : memref<1x16xf32, #tpu.memory_space<vmem>>, vector<1x16xf32>
    %42 = vector.broadcast %41 : vector<1x16xf32> to vector<512x16xf32>
    %43 = arith.addf %40, %42 : vector<512x16xf32>
    %c0_26 = arith.constant 0 : index
    %c0_27 = arith.constant 0 : index
    %44 = vector.load %arg11[%c0_26, %c0_27] : memref<512x16xf32, #tpu.memory_space<vmem>>, vector<512x16xf32>
    tpu.vector_store %arg11[%c0_26, %c0_27], %43 {strides = array<i32>} : memref<512x16xf32, #tpu.memory_space<vmem>>, vector<512x16xf32>,
    return
  }
  func.func @transform_0(%arg0: i32) -> (i32, i32) {
    %c0_i32 = arith.constant 0 : i32
    %c0_i32_0 = arith.constant 0 : i32
    return %arg0, %c0_i32 : i32, i32
  }
  func.func @transform_1(%arg0: i32) -> (i32, i32) {
    %c0_i32 = arith.constant 0 : i32
    %c0_i32_0 = arith.constant 0 : i32
    %c0_i32_1 = arith.constant 0 : i32
    return %c0_i32, %c0_i32_0 : i32, i32
  }
  func.func @transform_2(%arg0: i32) -> (i32, i32) {
    %c0_i32 = arith.constant 0 : i32
    %c0_i32_0 = arith.constant 0 : i32
    %c0_i32_1 = arith.constant 0 : i32
    return %c0_i32, %c0_i32_0 : i32, i32
  }
  func.func @transform_3(%arg0: i32) -> (i32, i32) {
    %c0_i32 = arith.constant 0 : i32
    %c0_i32_0 = arith.constant 0 : i32
    %c0_i32_1 = arith.constant 0 : i32
    return %c0_i32, %c0_i32_0 : i32, i32
  }
  func.func @transform_4(%arg0: i32) -> (i32, i32) {
    %c0_i32 = arith.constant 0 : i32
    %c0_i32_0 = arith.constant 0 : i32
    %c0_i32_1 = arith.constant 0 : i32
    return %c0_i32, %c0_i32_0 : i32, i32
  }
  func.func @transform_5(%arg0: i32) -> (i32, i32) {
    %c0_i32 = arith.constant 0 : i32
    %c0_i32_0 = arith.constant 0 : i32
    %c0_i32_1 = arith.constant 0 : i32
    return %c0_i32, %c0_i32_0 : i32, i32
  }
  func.func @transform_6(%arg0: i32) -> (i32, i32) {
    %c0_i32 = arith.constant 0 : i32
    %c0_i32_0 = arith.constant 0 : i32
    %c0_i32_1 = arith.constant 0 : i32
    return %c0_i32, %c0_i32_0 : i32, i32
  }
  func.func @transform_7(%arg0: i32) -> (i32, i32) {
    %c0_i32 = arith.constant 0 : i32
    %c0_i32_0 = arith.constant 0 : i32
    %c0_i32_1 = arith.constant 0 : i32
    return %c0_i32, %c0_i32_0 : i32, i32
  }
  func.func @transform_8(%arg0: i32) -> (i32, i32) {
    %c0_i32 = arith.constant 0 : i32
    %c0_i32_0 = arith.constant 0 : i32
    %c0_i32_1 = arith.constant 0 : i32
    return %c0_i32, %c0_i32_0 : i32, i32
  }
  func.func @transform_9(%arg0: i32) -> (i32, i32) {
    %c0_i32 = arith.constant 0 : i32
    %c0_i32_0 = arith.constant 0 : i32
    %c0_i32_1 = arith.constant 0 : i32
    return %c0_i32, %c0_i32_0 : i32, i32
  }
  func.func @transform_10(%arg0: i32) -> (i32, i32) {
    %c0_i32 = arith.constant 0 : i32
    %c0_i32_0 = arith.constant 0 : i32
    return %arg0, %c0_i32 : i32, i32
  }
}

</mosaic_0001>

<bundles_post_ra>
// kernel: tpu_custom_call.1
= control target key start
LH: loop header
LB: loop body
LE: loop exit
PB: predicated region body
PF: predicated region fallthrough
CT: control target
= control target key end

     0   :  { %vm253_vm0 = vcmask 1040384   ;;  %vm156_vm1 = vcmask 277504   ;;  %vm2576_vm2 = vcmask 261120   ;;  %vm2842_vm3 = vcmask 130048   ;;  %s5295_s1 = inlined_call_operand.vmem [shape: bf16[34,128], index: 1, kind: input, shape index: {}]   ;;  %s5296_s2 = inlined_call_operand.vmem [shape: f32[1,128], index: 2, kind: input, shape index: {}]   ;;  %s5297_s0 = inlined_call_operand.vmem [shape: f32[512,34], index: 0, kind: input, shape index: {}]   ;;  %s5298_s3 = inlined_call_operand.vmem [shape: bf16[128,256], index: 3, kind: input, shape index: {}]   ;;  %s5299_s5 = inlined_call_operand.vmem [shape: bf16[256,32], index: 5, kind: input, shape index: {}]   ;;  %s5300_s4 = inlined_call_operand.vmem [shape: f32[1,256], index: 4, kind: input, shape index: {}]   ;;  %s5301_s6 = inlined_call_operand.vmem [shape: f32[2,32], index: 6, kind: input, shape index: {}]   ;;  %s5302_s8 = inlined_call_operand.vmem [shape: bf16[32,16], index: 8, kind: input, shape index: {}]   ;;  %s5303_s7 = inlined_call_operand.vmem [shape: f32[1,32], index: 7, kind: input, shape index: {}]   ;;  %s5304_s9 = inlined_call_operand.vmem [shape: f32[1,16], index: 9, kind: input, shape index: {}]   ;;  %s5305_s10 = inlined_call_operand.vmem [shape: f32[512,16], index: 10, kind: output, shape index: {}]  }
   0x1   :  { %v136_v0 = vld [vmem:[%s5295_s1 + $0x10] sm:$0x1]  ;;  %v3120_v4 = vld [vmem:[%s5295_s1 + $0x8] sm:$0xff]  ;;  %v3119_v5 = vld [vmem:[%s5295_s1] sm:$0xff] }
   0x2   :  { %v150_v1 = vunpack.c.l.b16 %v136_v0  ;;  %v3345_v6 = vld [vmem:[%s5297_s0] sm:$0xff]  ;;  %v3350_v7 = vld [vmem:[%s5297_s0 + $0x8] sm:$0xff]  ;;  %v70_v9 = vld [vmem:[%s5297_s0 + $0x110] sm:$0xff] }
   0x3   :  { %v100_v8 = vpack.c.bf16 %v3350_v7, %v3345_v6  ;;  %v71_v10 = vld [vmem:[%s5297_s0 + $0x118] sm:$0xff]  ;;  %v3365_v12 = vld [vmem:[%s5297_s0 + $0x10] sm:$0xff]  ;;  %v72_v15 = vld [vmem:[%s5297_s0 + $0x120] sm:$0xff] }
   0x4   :  { %v153_v2 = vpack.c.b16 %v150_v1, %v150_v1  ;;  %v117_v11 = vpack.c.bf16 %v71_v10, %v70_v9  ;;  %v3370_v13 = vld [vmem:[%s5297_s0 + $0x18] sm:$0xff]  ;;  %v73_v16 = vld [vmem:[%s5297_s0 + $0x128] sm:$0xff]  ;;  %v3385_v18 = vld [vmem:[%s5297_s0 + $0x20] sm:$0xff] }
   0x5   :  { %v101_v14 = vpack.c.bf16 %v3370_v13, %v3365_v12  ;;  %v118_v17 = vpack.c.bf16 %v73_v16, %v72_v15  ;;  %v3390_v19 = vld [vmem:[%s5297_s0 + $0x28] sm:$0xff]  ;;  %v74_v21 = vld [vmem:[%s5297_s0 + $0x130] sm:$0xff]  ;;  %v75_v22 = vld [vmem:[%s5297_s0 + $0x138] sm:$0xff] }
   0x6   :  { %v255_v3 = vsel %vm253_vm0, %v153_v2, 0  ;;  %v102_v20 = vpack.c.bf16 %v3390_v19, %v3385_v18  ;;  %v119_v23 = vpack.c.bf16 %v75_v22, %v74_v21  ;;  %v3405_v24 = vld [vmem:[%s5297_s0 + $0x30] sm:$0xff]  ;;  %v3410_v25 = vld [vmem:[%s5297_s0 + $0x38] sm:$0xff]  ;;  %v76_v27 = vld [vmem:[%s5297_s0 + $0x140] sm:$0xff] }
   0x7   :  { %262 = vmatpush.bf16.msra.mxu0 %v255_v3  ;;  %3155 = vmatpush.bf16.msra.mxu3 %v255_v3  ;;  %v103_v26 = vpack.c.bf16 %v3410_v25, %v3405_v24  ;;  %v77_v28 = vld [vmem:[%s5297_s0 + $0x148] sm:$0xff]  ;;  %v3425_v30 = vld [vmem:[%s5297_s0 + $0x40] sm:$0xff]  ;;  %v78_v33 = vld [vmem:[%s5297_s0 + $0x150] sm:$0xff] }
   0x8   :  { %v120_v29 = vpack.c.bf16 %v77_v28, %v76_v27  ;;  %v3430_v31 = vld [vmem:[%s5297_s0 + $0x48] sm:$0xff]  ;;  %v79_v34 = vld [vmem:[%s5297_s0 + $0x158] sm:$0xff]  ;;  %v3009_v35 = vld [vmem:[%s5298_s3 + $0x70] sm:$0xf] }
   0x9   :  { %v104_v32 = vpack.c.bf16 %v3430_v31, %v3425_v30  ;;  %v121_v36 = vpack.c.bf16 %v79_v34, %v78_v33  ;;  %v3136_v37 = vld [vmem:[%s5298_s3 + $0x74] sm:$0xf0]  ;;  %v3451_v39 = vld [vmem:[%s5297_s0 + $0x50] sm:$0xff]  ;;  %v3001_v42 = vld [vmem:[%s5298_s3 + $0x60] sm:$0xf] }
   0xa   :  { %v3010_v38 = vor.u32 %v3136_v37, %v3009_v35  ;;  %v3456_v40 = vld [vmem:[%s5297_s0 + $0x58] sm:$0xff]  ;;  %v3134_v43 = vld [vmem:[%s5298_s3 + $0x64] sm:$0xf0]  ;;  %v2993_v45 = vld [vmem:[%s5298_s3 + $0x50] sm:$0xf] }
   0xb   :  { %263 = vmatpush.bf16.msra.mxu0 %v3120_v4  ;;  %3156 = vmatpush.bf16.msra.mxu3 %v3120_v4  ;;  %v105_v41 = vpack.c.bf16 %v3456_v40, %v3451_v39  ;;  %v3002_v44 = vor.u32 %v3134_v43, %v3001_v42  ;;  %v3132_v46 = vld [vmem:[%s5298_s3 + $0x54] sm:$0xf0]  ;;  %v80_v47 = vld [vmem:[%s5297_s0 + $0x160] sm:$0xff]  ;;  %v81_v49 = vld [vmem:[%s5297_s0 + $0x168] sm:$0xff] }
   0xc   :  { %624 = vmatpush.bf16.msra.mxu1 %v3010_v38  ;;  %3158 = vmatpush.bf16.msra.mxu2 %v3010_v38  ;;  %v2994_v48 = vor.u32 %v3132_v46, %v2993_v45  ;;  %v122_v50 = vpack.c.bf16 %v81_v49, %v80_v47  ;;  %v2985_v51 = vld [vmem:[%s5298_s3 + $0x40] sm:$0xf]  ;;  %v3130_v52 = vld [vmem:[%s5298_s3 + $0x44] sm:$0xf0]  ;;  %v2977_v56 = vld [vmem:[%s5298_s3 + $0x30] sm:$0xf] }
   0xd   :  { %v2986_v53 = vor.u32 %v3130_v52, %v2985_v51  ;;  %v3489_v54 = vld [vmem:[%s5297_s0 + $0x60] sm:$0xff]  ;;  %v3494_v55 = vld [vmem:[%s5297_s0 + $0x68] sm:$0xff]  ;;  %v3128_v57 = vld [vmem:[%s5298_s3 + $0x34] sm:$0xf0] }
   0xe   :  { %v2978_v58 = vor.u32 %v3128_v57, %v2977_v56  ;;  %v106_v59 = vpack.c.bf16 %v3494_v55, %v3489_v54  ;;  %v2969_v60 = vld [vmem:[%s5298_s3 + $0x20] sm:$0xf]  ;;  %v3126_v61 = vld [vmem:[%s5298_s3 + $0x24] sm:$0xf0]  ;;  %v2961_v63 = vld [vmem:[%s5298_s3 + $0x10] sm:$0xf] }
   0xf   :  { %264 = vmatpush.bf16.msra.mxu0 %v3119_v5  ;;  %3157 = vmatpush.bf16.msra.mxu3 %v3119_v5  ;;  %v2970_v62 = vor.u32 %v3126_v61, %v2969_v60  ;;  %v3124_v0 = vld [vmem:[%s5298_s3 + $0x14] sm:$0xf0]  ;;  %v82_v2 = vld [vmem:[%s5297_s0 + $0x170] sm:$0xff]  ;;  %v2953_v5 = vld [vmem:[%s5298_s3] sm:$0xf] }
  0x10   :  { %625 = vmatpush.bf16.msra.mxu1 %v3002_v44  ;;  %3159 = vmatpush.bf16.msra.mxu2 %v3002_v44  ;;  %v2962_v1 = vor.u32 %v3124_v0, %v2961_v63  ;;  %v83_v3 = vld [vmem:[%s5297_s0 + $0x178] sm:$0xff]  ;;  %v3533_v10 = vld [vmem:[%s5297_s0 + $0x70] sm:$0xff]  ;;  %v84_v15 = vld [vmem:[%s5297_s0 + $0x180] sm:$0xff] }
  0x11   :  { %v123_v4 = vpack.c.bf16 %v83_v3, %v82_v2  ;;  %v85_v16 = vld [vmem:[%s5297_s0 + $0x188] sm:$0xff]  ;;  %v3582_v38 = vld [vmem:[%s5297_s0 + $0x90] sm:$0xff]  ;;  %v3611_v57 = vld [vmem:[%s5297_s0 + $0xa0] sm:$0xff] }
  0x12   :  { %2919 = vmatmul.msk.bf16.vlgmr.msra.gmra.mxu0 %vm156_vm1, %v100_v8  ;;  %2936 = vmatmul.msk.bf16.vlgmr.msra.gmra.mxu3 %vm156_vm1, %v117_v11  ;;  %v3122_v8 = vld [vmem:[%s5298_s3 + $0x4] sm:$0xf0]  ;;  %v3538_v11 = vld [vmem:[%s5297_s0 + $0x78] sm:$0xff] }
  0x13   :  { %v2954_v9 = vor.u32 %v3122_v8, %v2953_v5  ;;  %v3558_v21 = vld [vmem:[%s5297_s0 + $0x88] sm:$0xff]  ;;  %v91_v2 = vld [vmem:[%s5297_s0 + $0x1b8] sm:$0xff] }
  0x14   :  { %626 = vmatpush.bf16.msra.mxu1 %v2994_v48  ;;  %3160 = vmatpush.bf16.msra.mxu2 %v2994_v48  ;;  %v88_v48 = vld [vmem:[%s5297_s0 + $0x1a0] sm:$0xff]  ;;  %v89_v49 = vld [vmem:[%s5297_s0 + $0x1a8] sm:$0xff] }
  0x15   :  { %v126_v51 = vpack.c.bf16 %v89_v49, %v88_v48 }
  0x18   :  { %627 = vmatpush.bf16.msra.mxu1 %v2986_v53  ;;  %3161 = vmatpush.bf16.msra.mxu2 %v2986_v53 }
  0x1c   :  { %628 = vmatpush.bf16.msra.mxu1 %v2978_v58  ;;  %3162 = vmatpush.bf16.msra.mxu2 %v2978_v58  ;;  %v3616_v58 = vld [vmem:[%s5297_s0 + $0xa8] sm:$0xff] }
  0x1d   :  { %v110_v60 = vpack.c.bf16 %v3616_v58, %v3611_v57 }
  0x20   :  { %629 = vmatpush.bf16.msra.mxu1 %v2970_v62  ;;  %3163 = vmatpush.bf16.msra.mxu2 %v2970_v62 }
  0x22   :  { %2920 = vmatmul.msk.bf16.gmra.mxu0 %vm156_vm1, %v101_v14  ;;  %2937 = vmatmul.msk.bf16.gmra.mxu3 %vm156_vm1, %v118_v17  ;;  %v107_v14 = vpack.c.bf16 %v3538_v11, %v3533_v10  ;;  %v124_v17 = vpack.c.bf16 %v85_v16, %v84_v15  ;;  %v3645_v15 = vld [vmem:[%s5297_s0 + $0xb8] sm:$0xff] }
  0x24   :  { %630 = vmatpush.bf16.msra.mxu1 %v2962_v1  ;;  %3164 = vmatpush.bf16.msra.mxu2 %v2962_v1  ;;  %v90_v1 = vld [vmem:[%s5297_s0 + $0x1b0] sm:$0xff] }
  0x28   :  { %631 = vmatpush.bf16.msra.mxu1 %v2954_v9  ;;  %3165 = vmatpush.bf16.msra.mxu2 %v2954_v9 }
  0x32   :  { %2921 = vmatmul.msk.bf16.gmra.mxu0 %vm156_vm1, %v102_v20  ;;  %2938 = vmatmul.msk.bf16.gmra.mxu3 %vm156_vm1, %v119_v23  ;;  %v3553_v20 = vld [vmem:[%s5297_s0 + $0x80] sm:$0xff] }
  0x33   :  { %v108_v22 = vpack.c.bf16 %v3558_v21, %v3553_v20 }
  0x42   :  { %2922 = vmatmul.msk.bf16.gmra.mxu0 %vm156_vm1, %v103_v26  ;;  %2939 = vmatmul.msk.bf16.gmra.mxu3 %vm156_vm1, %v120_v29  ;;  %v3565_v26 = vld [vmem:[%s5296_s2] ss:$0 sm:$0xff]  ;;  %v86_v29 = vld [vmem:[%s5297_s0 + $0x190] sm:$0xff] }
  0x52   :  { %2923 = vmatmul.msk.bf16.gmra.mxu0 %vm156_vm1, %v104_v32  ;;  %2940 = vmatmul.msk.bf16.gmra.mxu3 %vm156_vm1, %v121_v36  ;;  %v87_v32 = vld [vmem:[%s5297_s0 + $0x198] sm:$0xff] }
  0x53   :  { %v125_v34 = vpack.c.bf16 %v87_v32, %v86_v29  ;;  %v92_v29 = vld [vmem:[%s5297_s0 + $0x1c0] sm:$0xff]  ;;  %v93_v32 = vld [vmem:[%s5297_s0 + $0x1c8] sm:$0xff] }
  0x62   :  { %2924 = vmatmul.msk.bf16.gmra.mxu0 %vm156_vm1, %v105_v41  ;;  %2941 = vmatmul.msk.bf16.gmra.mxu3 %vm156_vm1, %v122_v50  ;;  %v3587_v41 = vld [vmem:[%s5297_s0 + $0x98] sm:$0xff] }
  0x63   :  { %v109_v43 = vpack.c.bf16 %v3587_v41, %v3582_v38 }
  0x72   :  { %2925 = vmatmul.msk.bf16.gmra.mxu0 %vm156_vm1, %v106_v59  ;;  %2942 = vmatmul.msk.bf16.gmra.mxu3 %vm156_vm1, %v123_v4  ;;  %v127_v4 = vpack.c.bf16 %v91_v2, %v90_v1 }
  0x82   :  { %2926 = vmatmul.msk.bf16.gmra.mxu0 %vm156_vm1, %v107_v14  ;;  %2943 = vmatmul.msk.bf16.gmra.mxu3 %vm156_vm1, %v124_v17  ;;  %v3640_v14 = vld [vmem:[%s5297_s0 + $0xb0] sm:$0xff] }
  0x83   :  { %v111_v17 = vpack.c.bf16 %v3645_v15, %v3640_v14 }
  0x8f   :  { %v266_v23 = vpop.f32.mrf.mxu0 }
  0x90   :  { %v267_v27 = vadd.f32 %v3565_v26, %v266_v23 }
  0x92   :  { %2927 = vmatmul.msk.bf16.gmra.mxu0 %vm156_vm1, %v108_v22  ;;  %v426_v35 = vmax.f32 %v267_v27, 0.0  ;;  %2944 = vmatmul.msk.bf16.gmra.mxu3 %vm156_vm1, %v125_v34  ;;  %v128_v34 = vpack.c.bf16 %v93_v32, %v92_v29  ;;  %v96_v29 = vld [vmem:[%s5297_s0 + $0x1e0] sm:$0xff]  ;;  %v97_v32 = vld [vmem:[%s5297_s0 + $0x1e8] sm:$0xff] }
  0x95   :  { %v3577_v37 = vpop.f32.mrf.mxu3 }
  0x97   :  { %v268_v28 = vpop.f32.mrf.mxu0 }
  0x98   :  { %v269_v33 = vadd.f32 %v3565_v26, %v268_v28 }
  0x9a   :  { %v427_v36 = vmax.f32 %v269_v33, 0.0 }
  0x9c   :  { %v3589_v42 = vpack.c.bf16 %v427_v36, %v426_v35 }
  0x9d   :  { %v3595_v45 = vpop.f32.mrf.mxu3 }
  0x9e   :  { %5329 = vst [vmem:[#allocation2_spill] sm:$0xff] %v3589_v42  ;;  %632 = vmatmul.bf16.vlgmr.msra.gmra.mxu1 %v3589_v42 }
  0x9f   :  { %v271_v44 = vpop.f32.mrf.mxu0 }
  0xa0   :  { %v272_v46 = vadd.f32 %v3565_v26, %v271_v44  ;;  %v3669_v44 = vld [vmem:[%s5297_s0 + $0xc0] sm:$0xff] }
  0xa2   :  { %2928 = vmatmul.msk.bf16.gmra.mxu0 %vm156_vm1, %v109_v43  ;;  %v428_v52 = vmax.f32 %v272_v46, 0.0  ;;  %2945 = vmatmul.msk.bf16.gmra.mxu3 %vm156_vm1, %v126_v51  ;;  %v3674_v46 = vld [vmem:[%s5297_s0 + $0xc8] sm:$0xff] }
  0xa3   :  { %v112_v48 = vpack.c.bf16 %v3674_v46, %v3669_v44 }
  0xa5   :  { %v3606_v56 = vpop.f32.mrf.mxu3 }
  0xa7   :  { %v273_v47 = vpop.f32.mrf.mxu0 }
  0xa8   :  { %v274_v50 = vadd.f32 %v3565_v26, %v273_v47 }
  0xaa   :  { %v429_v53 = vmax.f32 %v274_v50, 0.0 }
  0xac   :  { %v3618_v59 = vpack.c.bf16 %v429_v53, %v428_v52  ;;  %v94_v53 = vld [vmem:[%s5297_s0 + $0x1d0] sm:$0xff] }
  0xad   :  { %v3624_v62 = vpop.f32.mrf.mxu3 }
  0xae   :  { %5330 = vst [vmem:[#allocation3_spill] sm:$0xff] %v3618_v59  ;;  %637 = vmatmul.bf16.gmra.mxu1 %v3618_v59 }
  0xaf   :  { %v276_v61 = vpop.f32.mrf.mxu0 }
  0xb0   :  { %v277_v63 = vadd.f32 %v3565_v26, %v276_v61 }
  0xb2   :  { %2929 = vmatmul.msk.bf16.gmra.mxu0 %vm156_vm1, %v110_v60  ;;  %v430_v5 = vmax.f32 %v277_v63, 0.0  ;;  %2946 = vmatmul.msk.bf16.gmra.mxu3 %vm156_vm1, %v127_v4  ;;  %v95_v60 = vld [vmem:[%s5297_s0 + $0x1d8] sm:$0xff] }
  0xb3   :  { %v129_v63 = vpack.c.bf16 %v95_v60, %v94_v53  ;;  %v3703_v4 = vld [vmem:[%s5297_s0 + $0xd8] sm:$0xff]  ;;  %v3143_v60 = vld [vmem:[%s5299_s5 + $0x30] sm:$0xff] }
  0xb5   :  { %v3635_v9 = vpop.f32.mrf.mxu3 }
  0xb7   :  { %v278_v0 = vpop.f32.mrf.mxu0 }
  0xb8   :  { %v279_v3 = vadd.f32 %v3565_v26, %v278_v0 }
  0xba   :  { %v431_v8 = vmax.f32 %v279_v3, 0.0  ;;  %v3698_v3 = vld [vmem:[%s5297_s0 + $0xd0] sm:$0xff] }
  0xbc   :  { %v3647_v16 = vpack.c.bf16 %v431_v8, %v430_v5  ;;  %v113_v8 = vpack.c.bf16 %v3703_v4, %v3698_v3 }
  0xbd   :  { %v3653_v23 = vpop.f32.mrf.mxu3 }
  0xbe   :  { %5331 = vst [vmem:[#allocation4_spill] sm:$0xff] %v3647_v16  ;;  %642 = vmatmul.bf16.gmra.mxu1 %v3647_v16 }
  0xbf   :  { %v281_v22 = vpop.f32.mrf.mxu0 }
  0xc0   :  { %v282_v27 = vadd.f32 %v3565_v26, %v281_v22 }
  0xc2   :  { %2930 = vmatmul.msk.bf16.gmra.mxu0 %vm156_vm1, %v111_v17  ;;  %v432_v35 = vmax.f32 %v282_v27, 0.0  ;;  %2947 = vmatmul.msk.bf16.gmra.mxu3 %vm156_vm1, %v128_v34  ;;  %v130_v34 = vpack.c.bf16 %v97_v32, %v96_v29  ;;  %v99_v29 = vld [vmem:[%s5297_s0 + $0x1f8] sm:$0xff] }
  0xc5   :  { %v3664_v43 = vpop.f32.mrf.mxu3 }
  0xc7   :  { %v283_v28 = vpop.f32.mrf.mxu0 }
  0xc8   :  { %v284_v33 = vadd.f32 %v3565_v26, %v283_v28 }
  0xca   :  { %v433_v36 = vmax.f32 %v284_v33, 0.0 }
  0xcc   :  { %v3676_v47 = vpack.c.bf16 %v433_v36, %v432_v35  ;;  %v3144_v35 = vld [vmem:[%s5299_s5 + $0x38] sm:$0xff] }
  0xcd   :  { %v3682_v50 = vpop.f32.mrf.mxu3  ;;  %1668 = vmatpush.bf16.msrb.mxu3 %v3144_v35 }
  0xce   :  { %5332 = vst [vmem:[#allocation5_spill] sm:$0xff] %v3676_v47  ;;  %647 = vmatmul.bf16.gmra.mxu1 %v3676_v47 }
  0xcf   :  { %v286_v49 = vpop.f32.mrf.mxu0 }
  0xd0   :  { %v287_v51 = vadd.f32 %v3565_v26, %v286_v49 }
  0xd1   :  { %1669 = vmatpush.bf16.msrb.mxu3 %v3143_v60  ;;  %v3774_v60 = vld [vmem:[%s5297_s0 + $0xf8] sm:$0xff] }
  0xd2   :  { %2931 = vmatmul.msk.bf16.gmra.mxu0 %vm156_vm1, %v112_v48  ;;  %v434_v0 = vmax.f32 %v287_v51, 0.0  ;;  %2948 = vmatmul.msk.bf16.gmra.mxu3 %vm156_vm1, %v129_v63  ;;  %v3730_v51 = vld [vmem:[%s5297_s0 + $0xe0] sm:$0xff] }
  0xd5   :  { %v3693_v2 = vpop.f32.mrf.mxu3 }
  0xd7   :  { %v288_v52 = vpop.f32.mrf.mxu0 }
  0xd8   :  { %v289_v61 = vadd.f32 %v3565_v26, %v288_v52  ;;  %v3735_v52 = vld [vmem:[%s5297_s0 + $0xe8] sm:$0xff] }
  0xda   :  { %v435_v1 = vmax.f32 %v289_v61, 0.0  ;;  %v114_v61 = vpack.c.bf16 %v3735_v52, %v3730_v51 }
  0xdc   :  { %v3705_v5 = vpack.c.bf16 %v435_v1, %v434_v0  ;;  %v3142_v0 = vld [vmem:[%s5299_s5 + $0x28] sm:$0xff] }
  0xdd   :  { %v3711_v22 = vpop.f32.mrf.mxu3  ;;  %1670 = vmatpush.bf16.msrb.mxu3 %v3142_v0  ;;  %v3139_v0 = vld [vmem:[%s5299_s5 + $0x10] sm:$0xff] }
  0xde   :  { %5333 = vst [vmem:[#allocation6_spill] sm:$0xff] %v3705_v5  ;;  %652 = vmatmul.bf16.gmra.mxu1 %v3705_v5  ;;  %v5312_v5 = vmov 32  }
  0xdf   :  { %v291_v17 = vpop.f32.mrf.mxu0  ;;  %3168 = vset.pattern.permute.xlu0 %v5312_v5  ;;  %3169 = vset.pattern.permute.xlu1 %v5312_v5 }
  0xe0   :  { %v292_v27 = vadd.f32 %v3565_v26, %v291_v17  ;;  %1189 = vperm.xlu0 %3168, %v3345_v6   ;;  %1199 = vperm.xlu1 %3169, %v3365_v12  }
  0xe1   :  { %3170 = vset.pattern.permute.xlu2 %v5312_v5 }
  0xe2   :  { %2932 = vmatmul.msk.bf16.gmra.mxu0 %vm156_vm1, %v113_v8  ;;  %v436_v36 = vmax.f32 %v292_v27, 0.0  ;;  %2949 = vmatmul.msk.bf16.gmra.mxu3 %vm156_vm1, %v130_v34  ;;  %v3141_v8 = vld [vmem:[%s5299_s5 + $0x20] sm:$0xff]  ;;  %v3140_v34 = vld [vmem:[%s5299_s5 + $0x18] sm:$0xff] }
  0xe3   :  { %1671 = vmatpush.bf16.msrb.mxu3 %v3141_v8  ;;  %1209 = vperm.xlu2 %3170, %v3385_v18  }
  0xe5   :  { %v3725_v49 = vpop.f32.mrf.mxu3 }
  0xe7   :  { %v293_v28 = vpop.f32.mrf.mxu0  ;;  %1672 = vmatpush.bf16.msrb.mxu3 %v3140_v34 }
  0xe8   :  { %v294_v33 = vadd.f32 %v3565_v26, %v293_v28  ;;  %v98_v28 = vld [vmem:[%s5297_s0 + $0x1f0] sm:$0xff]  ;;  %1194 = vperm.xlu0 %3168, %v3350_v7   ;;  %1204 = vperm.xlu1 %3169, %v3370_v13  }
  0xea   :  { %v437_v48 = vmax.f32 %v294_v33, 0.0  ;;  %v131_v33 = vpack.c.bf16 %v99_v29, %v98_v28  ;;  %v3137_v29 = vld [vmem:[%s5299_s5] sm:$0xff] }
  0xeb   :  { %1673 = vmatpush.bf16.msrb.mxu3 %v3139_v0  ;;  %v3800_v0 = vld [vmem:[%s5297_s0 + $0x100] sm:$0xff]  ;;  %1214 = vperm.xlu2 %3170, %v3390_v19  }
  0xec   :  { %v3737_v53 = vpack.c.bf16 %v437_v48, %v436_v36  ;;  %v3769_v48 = vld [vmem:[%s5297_s0 + $0xf0] sm:$0xff] }
  0xed   :  { %v3749_v1 = vpop.f32.mrf.mxu3  ;;  %v115_v8 = vpack.c.bf16 %v3774_v60, %v3769_v48 }
  0xee   :  { %5334 = vst [vmem:[#allocation7_spill] sm:$0xff] %v3737_v53  ;;  %657 = vmatmul.bf16.gmra.mxu1 %v3737_v53 }
  0xef   :  { %v296_v63 = vpop.f32.mrf.mxu0 }
  0xf0   :  { %v297_v17 = vadd.f32 %v3565_v26, %v296_v63  ;;  %1219 = vperm.xlu0 %3168, %v3405_v24   ;;  %1224 = vperm.xlu1 %3169, %v3410_v25  }
  0xf2   :  { %2933 = vmatmul.msk.bf16.gmra.mxu0 %vm156_vm1, %v114_v61  ;;  %v438_v35 = vmax.f32 %v297_v17, 0.0  ;;  %2950 = vmatmul.msk.bf16.gmra.mxu3 %vm156_vm1, %v131_v33 }
  0xf3   :  { %1229 = vperm.xlu2 %3170, %v3425_v30  }
  0xf5   :  { %v3778_v63 = vpop.f32.mrf.mxu3 }
  0xf7   :  { %v298_v27 = vpop.f32.mrf.mxu0 }
  0xf8   :  { %v299_v32 = vadd.f32 %v3565_v26, %v298_v27  ;;  %v3138_v27 = vld [vmem:[%s5299_s5 + $0x8] sm:$0xff]  ;;  %1234 = vperm.xlu0 %3168, %v3430_v31   ;;  %1239 = vperm.xlu1 %3169, %v3451_v39  }
  0xf9   :  { %1674 = vmatpush.bf16.msrb.mxu3 %v3138_v27 }
  0xfa   :  { %v439_v36 = vmax.f32 %v299_v32, 0.0 }
  0xfb   :  { %1244 = vperm.xlu2 %3170, %v3456_v40  }
  0xfc   :  { %v3776_v61 = vpack.c.bf16 %v439_v36, %v438_v35 }
  0xfd   :  { %v3790_v28 = vpop.f32.mrf.mxu3  ;;  %1675 = vmatpush.bf16.msrb.mxu3 %v3137_v29 }
  0xfe   :  { %5335 = vst [vmem:[#allocation8_spill] sm:$0xff] %v3776_v61  ;;  %662 = vmatmul.bf16.gmra.mxu1 %v3776_v61 }
  0xff   :  { %v301_v17 = vpop.f32.mrf.mxu0  ;;  %5336 = vst [vmem:[#allocation9_spill] sm:$0xff] %v3790_v28 }
 0x100   :  { %v302_v32 = vadd.f32 %v3565_v26, %v301_v17  ;;  %1254 = vperm.xlu1 %3169, %v3494_v55   ;;  %1249 = vperm.xlu0 %3168, %v3489_v54  }
 0x102   :  { %2934 = vmatmul.msk.bf16.gmra.mxu0 %vm156_vm1, %v115_v8  ;;  %v440_v35 = vmax.f32 %v302_v32, 0.0  ;;  %v3805_v8 = vld [vmem:[%s5297_s0 + $0x108] sm:$0xff] }
 0x103   :  { %5337 = vst [vmem:[#allocation10_spill] sm:$0xff] %v3805_v8  ;;  %v116_v17 = vpack.c.bf16 %v3805_v8, %v3800_v0  ;;  %1259 = vperm.xlu2 %3170, %v3533_v10  }
 0x105   :  { %v3809_v61 = vpop.f32.mrf.mxu3 }
 0x106   :  { %5339 = vst [vmem:[#allocation12_spill] sm:$0xff] %v3809_v61 }
 0x107   :  { %v303_v33 = vpop.f32.mrf.mxu0 }
 0x108   :  { %v304_v34 = vadd.f32 %v3565_v26, %v303_v33 }
 0x10a   :  { %v441_v36 = vmax.f32 %v304_v34, 0.0 }
 0x10b   :  { %1264 = vperm.xlu2 %3170, %v3538_v11  }
 0x10c   :  { %v3807_v27 = vpack.c.bf16 %v441_v36, %v440_v35 }
 0x10d   :  { %v3816_v34 = vpop.f32.mrf.mxu3 }
 0x10e   :  { %5338 = vst [vmem:[#allocation11_spill] sm:$0xff] %v3807_v27  ;;  %667 = vmatmul.bf16.gmra.mxu1 %v3807_v27 }
 0x10f   :  { %v306_v29 = vpop.f32.mrf.mxu0  ;;  %5340 = vst [vmem:[#allocation13_spill] sm:$0xff] %v3816_v34 }
 0x110   :  { %v307_v32 = vadd.f32 %v3565_v26, %v306_v29 }
 0x112   :  { %2935 = vmatmul.msk.bf16.gmra.mxu0 %vm156_vm1, %v116_v17  ;;  %v442_v35 = vmax.f32 %v307_v32, 0.0  ;;  %v538_v17 = vld [vmem:[%s5300_s4] sm:$0x3] }
 0x113   :  { %v3830_v27 = vperm.slane %v538_v17, 0 }
 0x115   :  { %v3833_v16 = vpop.f32.mrf.mxu3 }
 0x116   :  { %5342 = vst [vmem:[#allocation15_spill] sm:$0xff] %v3833_v16 }
 0x117   :  { %v308_v33 = vpop.f32.mrf.mxu0 }
 0x118   :  { %v309_v53 = vadd.f32 %v3565_v26, %v308_v33 }
 0x11a   :  { %v443_v36 = vmax.f32 %v309_v53, 0.0 }
 0x11b   :  { %v633_v29 = vpop.f32.mrf.mxu1 }
 0x11c   :  { %v3828_v33 = vpack.c.bf16 %v443_v36, %v442_v35  ;;  %v634_v53 = vadd.f32 %v633_v29, %v3830_v27 }
 0x11d   :  { %v3844_v61 = vpop.f32.mrf.mxu3 }
 0x11e   :  { %5341 = vst [vmem:[#allocation14_spill] sm:$0xff] %v3828_v33  ;;  %672 = vmatmul.bf16.gmra.mxu1 %v3828_v33  ;;  %v962_v35 = vmax.f32 %v634_v53, 0.0 }
 0x11f   :  { %v311_v47 = vpop.f32.mrf.mxu0  ;;  %5343 = vst [vmem:[#allocation16_spill] sm:$0xff] %v3844_v61 }
 0x120   :  { %v312_v36 = vadd.f32 %v3565_v26, %v311_v47 }
 0x122   :  { %v444_v16 = vmax.f32 %v312_v36, 0.0 }
 0x123   :  { %v635_v32 = vpop.f32.mrf.mxu1 }
 0x124   :  { %v636_v5 = vadd.f32 %v635_v32, %v3830_v27 }
 0x126   :  { %v964_v17 = vmax.f32 %v636_v5, 0.0 }
 0x127   :  { %v313_v59 = vpop.f32.mrf.mxu0 }
 0x128   :  { %v1090_v33 = vpack.c.bf16 %v964_v17, %v962_v35  ;;  %v314_v42 = vadd.f32 %v3565_v26, %v313_v59 }
 0x12a   :  { %v445_v34 = vmax.f32 %v314_v42, 0.0  ;;  %1676 = vmatmul.bf16.vlgmr.msrb.gmra.mxu3 %v1090_v33  ;;  %v3855_v33 = vpop.f32.mrf.mxu3 }
 0x12b   :  { %v638_v29 = vpop.f32.mrf.mxu1  ;;  %5345 = vst [vmem:[#allocation18_spill] sm:$0xff] %v3855_v33 }
 0x12c   :  { %v3847_v53 = vpack.c.bf16 %v445_v34, %v444_v16  ;;  %v639_v59 = vadd.f32 %v638_v29, %v3830_v27 }
 0x12e   :  { %5344 = vst [vmem:[#allocation17_spill] sm:$0xff] %v3847_v53  ;;  %677 = vmatmul.bf16.gmra.mxu1 %v3847_v53  ;;  %v966_v32 = vmax.f32 %v639_v59, 0.0 }
 0x12f   :  { %v316_v47 = vpop.f32.mrf.mxu0 }
 0x130   :  { %v317_v16 = vadd.f32 %v3565_v26, %v316_v47 }
 0x132   :  { %v446_v29 = vmax.f32 %v317_v16, 0.0  ;;  %v3865_v59 = vpop.f32.mrf.mxu3 }
 0x133   :  { %v640_v5 = vpop.f32.mrf.mxu1  ;;  %5347 = vst [vmem:[#allocation20_spill] sm:$0xff] %v3865_v59 }
 0x134   :  { %v641_v42 = vadd.f32 %v640_v5, %v3830_v27 }
 0x136   :  { %v968_v34 = vmax.f32 %v641_v42, 0.0 }
 0x137   :  { %v318_v35 = vpop.f32.mrf.mxu0 }
 0x138   :  { %v319_v36 = vadd.f32 %v3565_v26, %v318_v35  ;;  %v1092_v17 = vpack.c.bf16 %v968_v34, %v966_v32 }
 0x13a   :  { %v447_v53 = vmax.f32 %v319_v36, 0.0  ;;  %1681 = vmatmul.bf16.gmra.mxu3 %v1092_v17  ;;  %v3872_v33 = vpop.f32.mrf.mxu3 }
 0x13b   :  { %v643_v61 = vpop.f32.mrf.mxu1  ;;  %5348 = vst [vmem:[#allocation21_spill] sm:$0xff] %v3872_v33 }
 0x13c   :  { %v3862_v5 = vpack.c.bf16 %v447_v53, %v446_v29  ;;  %v644_v42 = vadd.f32 %v643_v61, %v3830_v27 }
 0x13e   :  { %5346 = vst [vmem:[#allocation19_spill] sm:$0xff] %v3862_v5  ;;  %682 = vmatmul.bf16.gmra.mxu1 %v3862_v5  ;;  %v970_v16 = vmax.f32 %v644_v42, 0.0 }
 0x13f   :  { %v321_v47 = vpop.f32.mrf.mxu0 }
 0x140   :  { %v322_v35 = vadd.f32 %v3565_v26, %v321_v47 }
 0x142   :  { %v448_v5 = vmax.f32 %v322_v35, 0.0  ;;  %v3878_v47 = vpop.f32.mrf.mxu3 }
 0x143   :  { %v645_v32 = vpop.f32.mrf.mxu1  ;;  %5350 = vst [vmem:[#allocation23_spill] sm:$0xff] %v3878_v47 }
 0x144   :  { %v646_v34 = vadd.f32 %v645_v32, %v3830_v27 }
 0x146   :  { %v972_v36 = vmax.f32 %v646_v34, 0.0 }
 0x147   :  { %v323_v17 = vpop.f32.mrf.mxu0 }
 0x148   :  { %v324_v53 = vadd.f32 %v3565_v26, %v323_v17  ;;  %v1094_v29 = vpack.c.bf16 %v972_v36, %v970_v16 }
 0x14a   :  { %v449_v8 = vmax.f32 %v324_v53, 0.0  ;;  %1686 = vmatmul.bf16.gmra.mxu3 %v1094_v29 }
 0x14b   :  { %v648_v59 = vpop.f32.mrf.mxu1 }
 0x14c   :  { %v3874_v61 = vpack.c.bf16 %v449_v8, %v448_v5  ;;  %v649_v42 = vadd.f32 %v648_v59, %v3830_v27  ;;  %v3885_v59 = vpop.f32.mrf.mxu3 }
 0x14d   :  { %5352 = vst [vmem:[#allocation25_spill] sm:$0xff] %v3885_v59 }
 0x14e   :  { %5349 = vst [vmem:[#allocation22_spill] sm:$0xff] %v3874_v61  ;;  %687 = vmatmul.bf16.gmra.mxu1 %v3874_v61  ;;  %v974_v17 = vmax.f32 %v649_v42, 0.0 }
 0x14f   :  { %v326_v28 = vpop.f32.mrf.mxu0 }
 0x150   :  { %v327_v16 = vadd.f32 %v3565_v26, %v326_v28 }
 0x152   :  { %v450_v8 = vmax.f32 %v327_v16, 0.0 }
 0x153   :  { %v650_v32 = vpop.f32.mrf.mxu1 }
 0x154   :  { %v651_v34 = vadd.f32 %v650_v32, %v3830_v27 }
 0x156   :  { %v976_v36 = vmax.f32 %v651_v34, 0.0 }
 0x157   :  { %v328_v35 = vpop.f32.mrf.mxu0 }
 0x158   :  { %v329_v53 = vadd.f32 %v3565_v26, %v328_v35  ;;  %v1096_v29 = vpack.c.bf16 %v976_v36, %v974_v17  ;;  %v3891_v36 = vpop.f32.mrf.mxu3 }
 0x159   :  { %5353 = vst [vmem:[#allocation26_spill] sm:$0xff] %v3891_v36  ;;  %v5323_v36 = vmov 33  }
 0x15a   :  { %v451_v5 = vmax.f32 %v329_v53, 0.0  ;;  %1691 = vmatmul.bf16.gmra.mxu3 %v1096_v29  ;;  %3172 = vset.pattern.permute.xlu1 %v5323_v36 }
 0x15b   :  { %v653_v61 = vpop.f32.mrf.mxu1  ;;  %3171 = vset.pattern.permute.xlu0 %v5323_v36  ;;  %2012 = vperm.xlu1 %3172, %v3350_v7  }
 0x15c   :  { %v3883_v33 = vpack.c.bf16 %v451_v5, %v450_v8  ;;  %v654_v42 = vadd.f32 %v653_v61, %v3830_v27  ;;  %2008 = vperm.xlu0 %3171, %v3345_v6   ;;  %3173 = vset.pattern.permute.xlu2 %v5323_v36  ;;  %v354_v6 = vadd.f32 %v3565_v26, %v3595_v45 }
 0x15d   :  { %2020 = vperm.xlu2 %3173, %v3370_v13   ;;  %v3135_v13 = vld [vmem:[%s5298_s3 + $0x74] sm:$0xf] }
 0x15e   :  { %5351 = vst [vmem:[#allocation24_spill] sm:$0xff] %v3883_v33  ;;  %692 = vmatmul.bf16.gmra.mxu1 %v3883_v33  ;;  %v978_v34 = vmax.f32 %v654_v42, 0.0  ;;  %v461_v45 = vmax.f32 %v354_v6, 0.0 }
 0x15f   :  { %v331_v47 = vpop.f32.mrf.mxu0 }
 0x160   :  { %v332_v35 = vadd.f32 %v3565_v26, %v331_v47 }
 0x162   :  { %v452_v8 = vmax.f32 %v332_v35, 0.0 }
 0x163   :  { %v655_v32 = vpop.f32.mrf.mxu1  ;;  %2016 = vperm.xlu1 %3172, %v3365_v12  }
 0x164   :  { %v656_v28 = vadd.f32 %v655_v32, %v3830_v27  ;;  %v3897_v32 = vpop.f32.mrf.mxu3  ;;  %2024 = vperm.xlu0 %3171, %v3385_v18  }
 0x166   :  { %v980_v17 = vmax.f32 %v656_v28, 0.0 }
 0x167   :  { %v333_v16 = vpop.f32.mrf.mxu0 }
 0x168   :  { %v334_v53 = vadd.f32 %v3565_v26, %v333_v16  ;;  %v1098_v29 = vpack.c.bf16 %v980_v17, %v978_v34 }
 0x16a   :  { %v453_v5 = vmax.f32 %v334_v53, 0.0  ;;  %1696 = vmatmul.bf16.gmra.mxu3 %v1098_v29 }
 0x16b   :  { %v658_v33 = vpop.f32.mrf.mxu1  ;;  %2028 = vperm.xlu1 %3172, %v3390_v19  }
 0x16c   :  { %v3894_v59 = vpack.c.bf16 %v453_v5, %v452_v8  ;;  %v659_v47 = vadd.f32 %v658_v33, %v3830_v27  ;;  %2032 = vperm.xlu0 %3171, %v3405_v24  }
 0x16e   :  { %697 = vmatmul.bf16.gmra.mxu1 %v3894_v59  ;;  %v982_v34 = vmax.f32 %v659_v47, 0.0  ;;  %v3909_v47 = vpop.f32.mrf.mxu3 }
 0x16f   :  { %v336_v61 = vpop.f32.mrf.mxu0 }
 0x170   :  { %v337_v35 = vadd.f32 %v3565_v26, %v336_v61  ;;  %v352_v61 = vadd.f32 %v3565_v26, %v3577_v37 }
 0x172   :  { %v454_v29 = vmax.f32 %v337_v35, 0.0  ;;  %v460_v37 = vmax.f32 %v352_v61, 0.0  ;;  %v5354_v35 = vmov 32  }
 0x173   :  { %v660_v42 = vpop.f32.mrf.mxu1  ;;  %3174 = vset.pattern.permute.xlu2 %v5354_v35  ;;  %2036 = vperm.xlu1 %3172, %v3410_v25  }
 0x174   :  { %v661_v28 = vadd.f32 %v660_v42, %v3830_v27  ;;  %v3011_v42 = vld [vmem:[%s5298_s3 + $0x78] sm:$0xf0]  ;;  %1269 = vperm.xlu2 %3174, %v3553_v20   ;;  %2040 = vperm.xlu0 %3171, %v3425_v30  }
 0x176   :  { %v984_v17 = vmax.f32 %v661_v28, 0.0 }
 0x177   :  { %v338_v16 = vpop.f32.mrf.mxu0 }
 0x178   :  { %v339_v33 = vadd.f32 %v3565_v26, %v338_v16  ;;  %v1100_v53 = vpack.c.bf16 %v984_v17, %v982_v34  ;;  %v3014_v34 = vor.u32 %v3135_v13, %v3011_v42 }
 0x17a   :  { %v455_v8 = vmax.f32 %v339_v33, 0.0  ;;  %1701 = vmatmul.bf16.gmra.mxu3 %v1100_v53  ;;  %793 = vmatpush.bf16.msrb.mxu2 %v3014_v34  ;;  %v3930_v53 = vpack.c.bf16 %v461_v45, %v460_v37  ;;  %v357_v37 = vadd.f32 %v3565_v26, %v3606_v56 }
 0x17b   :  { %v663_v5 = vpop.f32.mrf.mxu1  ;;  %2044 = vperm.xlu1 %3172, %v3430_v31   ;;  %v364_v31 = vadd.f32 %v3565_v26, %v3653_v23 }
 0x17c   :  { %v3915_v7 = vpack.c.bf16 %v455_v8, %v454_v29  ;;  %v664_v17 = vadd.f32 %v663_v5, %v3830_v27  ;;  %v3932_v29 = vpop.f32.mrf.mxu3  ;;  %1274 = vperm.xlu2 %3174, %v3558_v21   ;;  %2052 = vperm.xlu0 %3171, %v3456_v40   ;;  %v3133_v40 = vld [vmem:[%s5298_s3 + $0x64] sm:$0xf] }
 0x17d   :  { %v465_v23 = vmax.f32 %v364_v31, 0.0 }
 0x17e   :  { %702 = vmatmul.bf16.gmra.mxu1 %v3915_v7  ;;  %v986_v12 = vmax.f32 %v664_v17, 0.0  ;;  %v462_v17 = vmax.f32 %v357_v37, 0.0 }
 0x17f   :  { %v341_v28 = vpop.f32.mrf.mxu0 }
 0x180   :  { %v342_v8 = vadd.f32 %v3565_v26, %v341_v28  ;;  %v359_v28 = vadd.f32 %v3565_v26, %v3624_v62 }
 0x182   :  { %v456_v5 = vmax.f32 %v342_v8, 0.0 }
 0x183   :  { %v665_v16 = vpop.f32.mrf.mxu1  ;;  %3176 = vset.pattern.permute.xlu1 %v5354_v35 }
 0x184   :  { %v666_v33 = vadd.f32 %v665_v16, %v3830_v27  ;;  %v3947_v24 = vpop.f32.mrf.mxu3  ;;  %v463_v16 = vmax.f32 %v359_v28, 0.0  ;;  %3175 = vset.pattern.permute.xlu2 %v5323_v36  ;;  %v3003_v28 = vld [vmem:[%s5298_s3 + $0x68] sm:$0xf0]  ;;  %1279 = vperm.xlu1 %3176, %v3582_v38  }
 0x185   :  { %2048 = vperm.xlu2 %3175, %v3451_v39   ;;  %2060 = vperm.xlu0 %3171, %v3494_v55  }
 0x186   :  { %v988_v18 = vmax.f32 %v666_v33, 0.0 }
 0x187   :  { %v343_v61 = vpop.f32.mrf.mxu0 }
 0x188   :  { %v344_v6 = vadd.f32 %v3565_v26, %v343_v61  ;;  %v1102_v13 = vpack.c.bf16 %v988_v18, %v986_v12  ;;  %v3954_v12 = vpack.c.bf16 %v463_v16, %v462_v17 }
 0x18a   :  { %v457_v42 = vmax.f32 %v344_v6, 0.0  ;;  %1706 = vmatmul.bf16.gmra.mxu3 %v1102_v13 }
 0x18b   :  { %v668_v34 = vpop.f32.mrf.mxu1 }
 0x18c   :  { %v3943_v45 = vpack.c.bf16 %v457_v42, %v456_v5  ;;  %v669_v56 = vadd.f32 %v668_v34, %v3830_v27  ;;  %v3960_v13 = vpop.f32.mrf.mxu3  ;;  %v362_v34 = vadd.f32 %v3565_v26, %v3635_v9  ;;  %1284 = vperm.xlu1 %3176, %v3587_v41  }
 0x18d   :  { %2056 = vperm.xlu2 %3175, %v3489_v54   ;;  %v3006_v54 = vor.u32 %v3133_v40, %v3003_v28  ;;  %2068 = vperm.xlu0 %3171, %v3538_v11   ;;  %v4022_v40 = vpop.permute.xlu0 %1189 }
 0x18e   :  { %707 = vmatmul.bf16.gmra.mxu1 %v3943_v45  ;;  %v990_v8 = vmax.f32 %v669_v56, 0.0  ;;  %v464_v9 = vmax.f32 %v362_v34, 0.0 }
 0x18f   :  { %v346_v19 = vpop.f32.mrf.mxu0  ;;  %794 = vmatpush.bf16.msrb.mxu2 %v3006_v54 }
 0x190   :  { %v347_v25 = vadd.f32 %v3565_v26, %v346_v19 }
 0x192   :  { %v458_v39 = vmax.f32 %v347_v25, 0.0 }
 0x193   :  { %v670_v62 = vpop.f32.mrf.mxu1 }
 0x194   :  { %v671_v33 = vadd.f32 %v670_v62, %v3830_v27  ;;  %v3981_v16 = vpop.f32.mrf.mxu3  ;;  %v3984_v62 = vpack.c.bf16 %v465_v23, %v464_v9  ;;  %3177 = vset.pattern.permute.xlu1 %v5323_v36 }
 0x195   :  { %2064 = vperm.xlu2 %3175, %v3533_v10   ;;  %3178 = vset.pattern.permute.xlu0 %v5354_v35 }
 0x196   :  { %v992_v18 = vmax.f32 %v671_v33, 0.0  ;;  %2072 = vperm.xlu1 %3177, %v3553_v20   ;;  %1289 = vperm.xlu0 %3178, %v3611_v57  }
 0x197   :  { %v348_v30 = vpop.f32.mrf.mxu0 }
 0x198   :  { %v349_v61 = vadd.f32 %v3565_v26, %v348_v30  ;;  %v1104_v6 = vpack.c.bf16 %v992_v18, %v990_v8 }
 0x19a   :  { %v459_v5 = vmax.f32 %v349_v61, 0.0  ;;  %1711 = vmatmul.bf16.gmra.mxu3 %v1104_v6 }
 0x19b   :  { %v673_v42 = vpop.f32.mrf.mxu1 }
 0x19c   :  { %v3967_v37 = vpack.c.bf16 %v459_v5, %v458_v39  ;;  %v674_v19 = vadd.f32 %v673_v42, %v3830_v27 }
 0x19d   :  { %2076 = vperm.xlu2 %3175, %v3558_v21  }
 0x19e   :  { %712 = vmatmul.bf16.vlgmr.msra.gmra.mxu2 %v3967_v37  ;;  %v994_v33 = vmax.f32 %v674_v19, 0.0  ;;  %2080 = vperm.xlu1 %3177, %v3582_v38   ;;  %v2995_v38 = vld [vmem:[%s5298_s3 + $0x58] sm:$0xf0]  ;;  %v4030_v19 = vpop.permute.xlu1 %1199 }
 0x19f   :  { %3180 = vset.pattern.permute.xlu0 %v5323_v36 }
 0x1a0   :  { %2092 = vperm.xlu0 %3180, %v3616_v58  }
 0x1a3   :  { %v675_v17 = vpop.f32.mrf.mxu1 }
 0x1a4   :  { %v676_v56 = vadd.f32 %v675_v17, %v3830_v27 }
 0x1a5   :  { %2084 = vperm.xlu2 %3175, %v3587_v41   ;;  %v3131_v41 = vld [vmem:[%s5298_s3 + $0x54] sm:$0xf] }
 0x1a6   :  { %v996_v8 = vmax.f32 %v676_v56, 0.0  ;;  %v2998_v42 = vor.u32 %v3131_v41, %v2995_v38  ;;  %3179 = vset.pattern.permute.xlu1 %v5354_v35  ;;  %v4035_v56 = vpop.permute.xlu0 %1194 }
 0x1a7   :  { %1294 = vperm.xlu1 %3179, %v3616_v58  }
 0x1a8   :  { %v1106_v55 = vpack.c.bf16 %v996_v8, %v994_v33  ;;  %795 = vmatpush.bf16.msrb.mxu2 %v2998_v42  ;;  %3184 = vset.pattern.permute.xlu0 %v5354_v35 }
 0x1a9   :  { %1309 = vperm.xlu0 %3184, %v3669_v44  }
 0x1aa   :  { %1716 = vmatmul.bf16.gmra.mxu3 %v1106_v55  ;;  %v369_v55 = vadd.f32 %v3565_v26, %v3682_v50 }
 0x1ab   :  { %v678_v25 = vpop.f32.mrf.mxu1 }
 0x1ac   :  { %v679_v10 = vadd.f32 %v678_v25, %v3830_v27 }
 0x1ad   :  { %v3989_v18 = vpop.f32.mrf.mxu3  ;;  %2088 = vperm.xlu2 %3175, %v3611_v57  }
 0x1ae   :  { %717 = vmatmul.bf16.gmra.mxu2 %v3930_v53  ;;  %v998_v61 = vmax.f32 %v679_v10, 0.0  ;;  %v4047_v10 = vpop.permute.xlu2 %1209 }
 0x1af   :  { %1299 = vperm.xlu1 %3179, %v3640_v14  }
 0x1b1   :  { %1324 = vperm.xlu0 %3184, %v3703_v4  }
 0x1b3   :  { %v680_v11 = vpop.f32.mrf.mxu1 }
 0x1b4   :  { %v681_v21 = vadd.f32 %v680_v11, %v3830_v27 }
 0x1b5   :  { %v3999_v30 = vpop.f32.mrf.mxu3  ;;  %3181 = vset.pattern.permute.xlu2 %v5354_v35 }
 0x1b6   :  { %v1000_v6 = vmax.f32 %v681_v21, 0.0  ;;  %1304 = vperm.xlu2 %3181, %v3645_v15  }
 0x1b7   :  { %3182 = vset.pattern.permute.xlu1 %v5323_v36 }
 0x1b8   :  { %v1108_v39 = vpack.c.bf16 %v1000_v6, %v998_v61  ;;  %2096 = vperm.xlu1 %3182, %v3640_v14   ;;  %v4051_v14 = vpop.permute.xlu1 %1204  ;;  %v1220_v6 = vpop.permute.xlu0 %1219 }
 0x1b9   :  { %1329 = vperm.xlu0 %3184, %v3730_v51  }
 0x1ba   :  { %1721 = vmatmul.bf16.gmra.mxu3 %v1108_v39 }
 0x1bb   :  { %v683_v20 = vpop.f32.mrf.mxu1 }
 0x1bc   :  { %v684_v57 = vadd.f32 %v683_v20, %v3830_v27  ;;  %v467_v20 = vmax.f32 %v369_v55, 0.0  ;;  %v374_v55 = vadd.f32 %v3565_v26, %v3711_v22 }
 0x1bd   :  { %v4005_v5 = vpop.f32.mrf.mxu3 }
 0x1be   :  { %722 = vmatmul.bf16.gmra.mxu2 %v3954_v12  ;;  %v1002_v54 = vmax.f32 %v684_v57, 0.0  ;;  %3183 = vset.pattern.permute.xlu2 %v5323_v36 }
 0x1bf   :  { %2100 = vperm.xlu2 %3183, %v3645_v15   ;;  %v367_v15 = vadd.f32 %v3565_v26, %v3664_v43  ;;  %v4056_v43 = vld [vmem:[%s5301_s6] ss:$0 sm:$0xff] }
 0x1c0   :  { %3185 = vset.pattern.permute.xlu1 %v5354_v35 }
 0x1c1   :  { %v466_v39 = vmax.f32 %v367_v15, 0.0  ;;  %1314 = vperm.xlu1 %3185, %v3674_v46   ;;  %3190 = vset.pattern.permute.xlu0 %v5323_v36  ;;  %v372_v15 = vadd.f32 %v3565_v26, %v3693_v2  ;;  %v469_v26 = vmax.f32 %v374_v55, 0.0 }
 0x1c2   :  { %2124 = vperm.xlu0 %3190, %v3735_v52  }
 0x1c3   :  { %v685_v34 = vpop.f32.mrf.mxu1  ;;  %v4062_v38 = vpack.c.bf16 %v467_v20, %v466_v39  ;;  %v468_v20 = vmax.f32 %v372_v15, 0.0  ;;  %v4124_v15 = vld [vmem:[%s5297_s0 + $0x120] sm:$0xff] }
 0x1c4   :  { %v686_v31 = vadd.f32 %v685_v34, %v3830_v27  ;;  %v3129_v34 = vld [vmem:[%s5298_s3 + $0x44] sm:$0xf] }
 0x1c5   :  { %v4024_v28 = vpop.f32.mrf.mxu3 }
 0x1c6   :  { %v1004_v9 = vmax.f32 %v686_v31, 0.0  ;;  %v2987_v31 = vld [vmem:[%s5298_s3 + $0x48] sm:$0xf0] }
 0x1c7   :  { %2104 = vperm.xlu2 %3183, %v3669_v44   ;;  %v1514_v44 = vmul.f32 %v4056_v43, %v1220_v6 }
 0x1c8   :  { %v1110_v58 = vpack.c.bf16 %v1004_v9, %v1002_v54  ;;  %v4076_v54 = vpop.permute.xlu2 %1214  ;;  %v1225_v9 = vpop.permute.xlu1 %1224 }
 0x1c9   :  { %3186 = vset.pattern.permute.xlu1 %v5323_v36 }
 0x1ca   :  { %1726 = vmatmul.bf16.gmra.mxu3 %v1110_v58  ;;  %v2990_v58 = vor.u32 %v3129_v34, %v2987_v31  ;;  %2108 = vperm.xlu1 %3186, %v3674_v46   ;;  %v1235_v34 = vpop.permute.xlu0 %1234 }
 0x1cb   :  { %v688_v23 = vpop.f32.mrf.mxu1  ;;  %3194 = vset.pattern.permute.xlu0 %v5354_v35 }
 0x1cc   :  { %v689_v33 = vadd.f32 %v688_v23, %v3830_v27  ;;  %796 = vmatpush.bf16.msrb.mxu2 %v2990_v58  ;;  %1349 = vperm.xlu0 %3194, %v3800_v0   ;;  %v4112_v58 = vld [vmem:[%s5296_s2] ss:$0 sm:$0xff] }
 0x1cd   :  { %v4032_v17 = vpop.f32.mrf.mxu3 }
 0x1ce   :  { %727 = vmatmul.bf16.gmra.mxu2 %v3984_v62  ;;  %v1006_v21 = vmax.f32 %v689_v33, 0.0  ;;  %v1515_v33 = vmul.f32 %v4056_v43, %v1225_v9  ;;  %v1517_v9 = vmul.f32 %v4056_v43, %v1235_v34  ;;  %v4151_v34 = vld [vmem:[%s5297_s0 + $0x128] sm:$0xff] }
 0x1cf   :  { %3187 = vset.pattern.permute.xlu2 %v5354_v35 }
 0x1d0   :  { %1319 = vperm.xlu2 %3187, %v3698_v3   ;;  %v1230_v2 = vpop.permute.xlu2 %1229 }
 0x1d1   :  { %v1516_v46 = vmul.f32 %v4056_v43, %v1230_v2 }
 0x1d2   :  { %2112 = vperm.xlu1 %3186, %v3698_v3  }
 0x1d3   :  { %v690_v8 = vpop.f32.mrf.mxu1 }
 0x1d4   :  { %v691_v25 = vadd.f32 %v690_v8, %v3830_v27 }
 0x1d5   :  { %v4049_v11 = vpop.f32.mrf.mxu3 }
 0x1d6   :  { %v1008_v61 = vmax.f32 %v691_v25, 0.0 }
 0x1d8   :  { %v1112_v50 = vpack.c.bf16 %v1008_v61, %v1006_v21  ;;  %3188 = vset.pattern.permute.xlu2 %v5323_v36 }
 0x1d9   :  { %2116 = vperm.xlu2 %3188, %v3703_v4  }
 0x1da   :  { %1731 = vmatmul.bf16.gmra.mxu3 %v1112_v50  ;;  %3189 = vset.pattern.permute.xlu1 %v5354_v35 }
 0x1db   :  { %v693_v41 = vpop.f32.mrf.mxu1  ;;  %1334 = vperm.xlu1 %3189, %v3735_v52  }
 0x1dc   :  { %v694_v23 = vadd.f32 %v693_v41, %v3830_v27 }
 0x1dd   :  { %v1692_v42 = vpop.f32.mrf.mxu3 }
 0x1de   :  { %v4067_v57 = vadd.f32 %v1692_v42, %v1514_v44  ;;  %732 = vmatmul.bf16.gmra.mxu2 %v4062_v38  ;;  %v1010_v61 = vmax.f32 %v694_v23, 0.0  ;;  %v4094_v44 = vpack.c.bf16 %v469_v26, %v468_v20  ;;  %v4100_v42 = vld [vmem:[%s5297_s0 + $0x118] sm:$0xff]  ;;  %v377_v23 = vadd.f32 %v4112_v58, %v3725_v49 }
 0x1df   :  { %1364 = vperm.xlu0 %3194, %v4100_v42  }
 0x1e1   :  { %2120 = vperm.xlu2 %3188, %v3730_v51  }
 0x1e3   :  { %v695_v8 = vpop.f32.mrf.mxu1  ;;  %1339 = vperm.xlu1 %3189, %v3769_v48  }
 0x1e4   :  { %v696_v25 = vadd.f32 %v695_v8, %v3830_v27 }
 0x1e5   :  { %v1694_v21 = vpop.f32.mrf.mxu3 }
 0x1e6   :  { %v1012_v6 = vmax.f32 %v696_v25, 0.0  ;;  %v4090_v39 = vadd.f32 %v1694_v21, %v1515_v33  ;;  %v379_v33 = vadd.f32 %v4112_v58, %v3749_v1  ;;  %v1240_v1 = vpop.permute.xlu1 %1239  ;;  %v470_v21 = vmax.f32 %v377_v23, 0.0 }
 0x1e7   :  { %1369 = vperm.xlu0 %3194, %v4124_v15   ;;  %v1518_v52 = vmul.f32 %v4056_v43, %v1240_v1 }
 0x1e8   :  { %v1114_v22 = vpack.c.bf16 %v1012_v6, %v1010_v61  ;;  %v471_v61 = vmax.f32 %v379_v33, 0.0 }
 0x1e9   :  { %3191 = vset.pattern.permute.xlu2 %v5354_v35 }
 0x1ea   :  { %1736 = vmatmul.bf16.gmra.mxu3 %v1114_v22  ;;  %1344 = vperm.xlu2 %3191, %v3774_v60   ;;  %v4132_v20 = vpack.c.bf16 %v471_v61, %v470_v21 }
 0x1eb   :  { %v698_v50 = vpop.f32.mrf.mxu1  ;;  %3192 = vset.pattern.permute.xlu1 %v5323_v36 }
 0x1ec   :  { %v699_v31 = vadd.f32 %v698_v50, %v3830_v27  ;;  %v2979_v50 = vld [vmem:[%s5298_s3 + $0x38] sm:$0xf0]  ;;  %2128 = vperm.xlu1 %3192, %v3769_v48  }
 0x1ed   :  { %v1697_v41 = vpop.f32.mrf.mxu3 }
 0x1ee   :  { %v4103_v4 = vadd.f32 %v1697_v41, %v1516_v46  ;;  %737 = vmatmul.bf16.gmra.mxu2 %v4094_v44  ;;  %v1014_v55 = vmax.f32 %v699_v31, 0.0  ;;  %v3127_v46 = vld [vmem:[%s5298_s3 + $0x34] sm:$0xf]  ;;  %v3152_v41 = vld [vmem:[%s5299_s5 + $0x78] sm:$0xff]  ;;  %v1245_v31 = vpop.permute.xlu2 %1244 }
 0x1ef   :  { %3200 = vset.pattern.permute.xlu0 %v5323_v36  ;;  %1837 = vmatpush.bf16.msrb.mxu0 %v3152_v41  ;;  %v1519_v23 = vmul.f32 %v4056_v43, %v1245_v31 }
 0x1f0   :  { %2156 = vperm.xlu0 %3200, %v4151_v34  }
 0x1f2   :  { %3193 = vset.pattern.permute.xlu2 %v5323_v36 }
 0x1f3   :  { %v700_v3 = vpop.f32.mrf.mxu1  ;;  %2132 = vperm.xlu2 %3193, %v3774_v60  }
 0x1f4   :  { %v701_v8 = vadd.f32 %v700_v3, %v3830_v27  ;;  %3195 = vset.pattern.permute.xlu1 %v5354_v35 }
 0x1f5   :  { %v1699_v51 = vpop.f32.mrf.mxu3 }
 0x1f6   :  { %v1016_v25 = vmax.f32 %v701_v8, 0.0  ;;  %v4127_v49 = vadd.f32 %v1699_v51, %v1517_v9  ;;  %v2982_v9 = vor.u32 %v3127_v46, %v2979_v50  ;;  %v382_v8 = vadd.f32 %v4112_v58, %v3778_v63  ;;  %v5355_v51 = vld [vmem:[#allocation9_spill] sm:$0xff]  ;;  %v4171_v63 = vld [vmem:[%s5297_s0 + $0x140] sm:$0xff] }
 0x1f8   :  { %v1116_v6 = vpack.c.bf16 %v1016_v25, %v1014_v55  ;;  %797 = vmatpush.bf16.msrb.mxu2 %v2982_v9  ;;  %v384_v55 = vadd.f32 %v4112_v58, %v5355_v51  ;;  %3204 = vset.pattern.permute.xlu0 %v5354_v35  ;;  %v5356_v9 = vld [vmem:[#allocation10_spill] sm:$0xff] }
 0x1f9   :  { %1389 = vperm.xlu0 %3204, %v4171_v63   ;;  %1354 = vperm.xlu1 %3195, %v5356_v9  }
 0x1fa   :  { %1741 = vmatmul.bf16.gmra.mxu3 %v1116_v6  ;;  %v1250_v6 = vpop.permute.xlu0 %1249 }
 0x1fb   :  { %v703_v2 = vpop.f32.mrf.mxu1  ;;  %2136 = vperm.xlu2 %3193, %v3800_v0   ;;  %v1520_v46 = vmul.f32 %v4056_v43, %v1250_v6  ;;  %v1255_v0 = vpop.permute.xlu1 %1254 }
 0x1fc   :  { %v704_v3 = vadd.f32 %v703_v2, %v3830_v27  ;;  %v473_v2 = vmax.f32 %v384_v55, 0.0  ;;  %v5357_v55 = vld [vmem:[#allocation12_spill] sm:$0xff] }
 0x1fd   :  { %v1702_v26 = vpop.f32.mrf.mxu3 }
 0x1fe   :  { %v4136_v22 = vadd.f32 %v1702_v26, %v1518_v52  ;;  %742 = vmatmul.bf16.gmra.mxu2 %v4132_v20  ;;  %v1018_v21 = vmax.f32 %v704_v3, 0.0  ;;  %v472_v52 = vmax.f32 %v382_v8, 0.0  ;;  %v4186_v3 = vld [vmem:[%s5297_s0 + $0x158] sm:$0xff] }
 0x200   :  { %v4176_v48 = vpack.c.bf16 %v473_v2, %v472_v52 }
 0x201   :  { %1404 = vperm.xlu0 %3204, %v4186_v3   ;;  %3196 = vset.pattern.permute.xlu1 %v5323_v36 }
 0x202   :  { %2140 = vperm.xlu1 %3196, %v5356_v9   ;;  %v2971_v9 = vld [vmem:[%s5298_s3 + $0x28] sm:$0xf0] }
 0x203   :  { %v705_v33 = vpop.f32.mrf.mxu1  ;;  %3197 = vset.pattern.permute.xlu2 %v5354_v35 }
 0x204   :  { %v706_v25 = vadd.f32 %v705_v33, %v3830_v27  ;;  %v1521_v33 = vmul.f32 %v4056_v43, %v1255_v0 }
 0x205   :  { %v1704_v1 = vpop.f32.mrf.mxu3 }
 0x206   :  { %v1020_v61 = vmax.f32 %v706_v25, 0.0  ;;  %v4164_v60 = vadd.f32 %v1704_v1, %v1519_v23  ;;  %v3245_v23 = vld [vmem:[%s5297_s0 + $0x110] sm:$0xff]  ;;  %v387_v25 = vadd.f32 %v4112_v58, %v5357_v55  ;;  %v5358_v1 = vld [vmem:[#allocation13_spill] sm:$0xff] }
 0x207   :  { %1359 = vperm.xlu2 %3197, %v3245_v23  }
 0x208   :  { %v1118_v26 = vpack.c.bf16 %v1020_v61, %v1018_v21  ;;  %v389_v21 = vadd.f32 %v4112_v58, %v5358_v1 }
 0x20a   :  { %1746 = vmatmul.bf16.gmra.mxu3 %v1118_v26  ;;  %v475_v0 = vmax.f32 %v389_v21, 0.0  ;;  %2144 = vperm.xlu1 %3196, %v3245_v23  }
 0x20b   :  { %v708_v50 = vpop.f32.mrf.mxu1 }
 0x20c   :  { %v709_v8 = vadd.f32 %v708_v50, %v3830_v27  ;;  %v4206_v50 = vld [vmem:[%s5297_s0 + $0x160] sm:$0xff] }
 0x20d   :  { %v1707_v41 = vpop.f32.mrf.mxu3  ;;  %1409 = vperm.xlu0 %3204, %v4206_v50  }
 0x20e   :  { %v4178_v31 = vadd.f32 %v1707_v41, %v1520_v46  ;;  %747 = vmatmul.bf16.gmra.mxu2 %v4176_v48  ;;  %v1022_v52 = vmax.f32 %v709_v8, 0.0  ;;  %v1260_v46 = vpop.permute.xlu2 %1259  ;;  %v474_v41 = vmax.f32 %v387_v25, 0.0  ;;  %v3125_v25 = vld [vmem:[%s5298_s3 + $0x24] sm:$0xf] }
 0x20f   :  { %3198 = vset.pattern.permute.xlu2 %v5323_v36  ;;  %v2974_v21 = vor.u32 %v3125_v25, %v2971_v9  ;;  %v4249_v9 = vld [vmem:[%s5297_s0 + $0x180] sm:$0xff] }
 0x210   :  { %2148 = vperm.xlu2 %3198, %v4100_v42   ;;  %v4213_v8 = vpack.c.bf16 %v475_v0, %v474_v41  ;;  %v4228_v42 = vld [vmem:[%s5297_s0 + $0x168] sm:$0xff]  ;;  %v5361_v41 = vld [vmem:[#allocation16_spill] sm:$0xff] }
 0x211   :  { %798 = vmatpush.bf16.msrb.mxu2 %v2974_v21  ;;  %v394_v23 = vadd.f32 %v4112_v58, %v5361_v41  ;;  %v3151_v0 = vld [vmem:[%s5299_s5 + $0x70] sm:$0xff] }
 0x212   :  { %1838 = vmatpush.bf16.msrb.mxu0 %v3151_v0  ;;  %3199 = vset.pattern.permute.xlu1 %v5354_v35  ;;  %v3250_v41 = vld [vmem:[%s5297_s0 + $0x130] sm:$0xff]  ;;  %v5364_v0 = vld [vmem:[#allocation18_spill] sm:$0xff] }
 0x213   :  { %v710_v51 = vpop.f32.mrf.mxu1  ;;  %v477_v25 = vmax.f32 %v394_v23, 0.0  ;;  %1374 = vperm.xlu1 %3199, %v4151_v34   ;;  %v4266_v23 = vld [vmem:[%s5297_s0 + $0x198] sm:$0xff] }
 0x214   :  { %v711_v61 = vadd.f32 %v710_v51, %v3830_v27 }
 0x215   :  { %v1709_v6 = vpop.f32.mrf.mxu3  ;;  %3210 = vset.pattern.permute.xlu0 %v5323_v36 }
 0x216   :  { %v1024_v2 = vmax.f32 %v711_v61, 0.0  ;;  %v4200_v26 = vadd.f32 %v1709_v6, %v1521_v33  ;;  %v1522_v33 = vmul.f32 %v4056_v43, %v1260_v46  ;;  %2188 = vperm.xlu0 %3210, %v4228_v42   ;;  %v1265_v61 = vpop.permute.xlu2 %1264 }
 0x218   :  { %v1120_v55 = vpack.c.bf16 %v1024_v2, %v1022_v52  ;;  %v1523_v52 = vmul.f32 %v4056_v43, %v1265_v61  ;;  %2152 = vperm.xlu2 %3198, %v4124_v15   ;;  %v5360_v2 = vld [vmem:[#allocation15_spill] sm:$0xff]  ;;  %v3249_v61 = vld [vmem:[%s5297_s0 + $0x138] sm:$0xff] }
 0x219   :  { %v392_v46 = vadd.f32 %v4112_v58, %v5360_v2 }
 0x21a   :  { %1751 = vmatmul.bf16.gmra.mxu3 %v1120_v55 }
 0x21b   :  { %1379 = vperm.xlu1 %3199, %v3250_v41  }
 0x21d   :  { %v1712_v51 = vpop.f32.mrf.mxu3 }
 0x21e   :  { %v4215_v1 = vadd.f32 %v1712_v51, %v1522_v33  ;;  %752 = vmatmul.bf16.gmra.mxu2 %v4213_v8  ;;  %v476_v51 = vmax.f32 %v392_v46, 0.0  ;;  %3214 = vset.pattern.permute.xlu0 %v5354_v35 }
 0x21f   :  { %1429 = vperm.xlu0 %3214, %v4249_v9  }
 0x220   :  { %5359 = vst [vmem:[#allocation9_spill] sm:$0xff] %v4215_v1  ;;  %3201 = vset.pattern.permute.xlu2 %v5354_v35  ;;  %v4257_v2 = vpack.c.bf16 %v477_v25, %v476_v51  ;;  %v5365_v51 = vld [vmem:[#allocation20_spill] sm:$0xff] }
 0x221   :  { %v713_v6 = vpop.f32.mrf.mxu2  ;;  %1384 = vperm.xlu2 %3201, %v3249_v61   ;;  %v399_v25 = vadd.f32 %v4112_v58, %v5365_v51 }
 0x222   :  { %v714_v43 = vadd.f32 %v713_v6, %v3830_v27  ;;  %5363 = vst [vmem:[#allocation12_spill] sm:$0xff] %v4257_v2 }
 0x223   :  { %3202 = vset.pattern.permute.xlu1 %v5323_v36 }
 0x224   :  { %v1026_v6 = vmax.f32 %v714_v43, 0.0  ;;  %2160 = vperm.xlu1 %3202, %v3250_v41  }
 0x225   :  { %v1714_v55 = vpop.f32.mrf.mxu3 }
 0x226   :  { %v4240_v33 = vadd.f32 %v1714_v55, %v1523_v52  ;;  %v397_v55 = vadd.f32 %v4112_v58, %v5364_v0 }
 0x227   :  { %1444 = vperm.xlu0 %3214, %v4266_v23  }
 0x228   :  { %5362 = vst [vmem:[#allocation10_spill] sm:$0xff] %v4240_v33  ;;  %v478_v43 = vmax.f32 %v397_v55, 0.0  ;;  %v4339_v33 = vld [vmem:[%s5297_s0 + $0x1d8] sm:$0xff] }
 0x229   :  { %v715_v15 = vpop.f32.mrf.mxu2  ;;  %3203 = vset.pattern.permute.xlu2 %v5323_v36 }
 0x22a   :  { %v716_v21 = vadd.f32 %v715_v15, %v3830_v27  ;;  %2164 = vperm.xlu2 %3203, %v3249_v61   ;;  %v479_v15 = vmax.f32 %v399_v25, 0.0  ;;  %v3123_v25 = vld [vmem:[%s5298_s3 + $0x14] sm:$0xf] }
 0x22c   :  { %v1028_v52 = vmax.f32 %v716_v21, 0.0  ;;  %v4285_v51 = vpack.c.bf16 %v479_v15, %v478_v43  ;;  %3205 = vset.pattern.permute.xlu1 %v5354_v35  ;;  %v3254_v43 = vld [vmem:[%s5297_s0 + $0x148] sm:$0xff]  ;;  %v5369_v15 = vld [vmem:[#allocation21_spill] sm:$0xff] }
 0x22d   :  { %v4283_v0 = vpop.f32.mrf.mxu3  ;;  %1394 = vperm.xlu1 %3205, %v3254_v43  }
 0x22e   :  { %757 = vmatmul.bf16.gmra.mxu2 %v4257_v2  ;;  %v1122_v34 = vpack.c.bf16 %v1028_v52, %v1026_v6  ;;  %v4279_v52 = vld [vmem:[%s5297_s0 + $0x1a0] sm:$0xff]  ;;  %5366 = vst [vmem:[#allocation13_spill] sm:$0xff] %v4283_v0 }
 0x22f   :  { %1449 = vperm.xlu0 %3214, %v4279_v52   ;;  %5367 = vst [vmem:[#allocation15_spill] sm:$0xff] %v4285_v51  ;;  %v4326_v0 = vld [vmem:[%s5297_s0 + $0x1c0] sm:$0xff] }
 0x230   :  { %1756 = vmatmul.bf16.gmra.mxu3 %v1122_v34 }
 0x231   :  { %v718_v46 = vpop.f32.mrf.mxu2 }
 0x232   :  { %v719_v21 = vadd.f32 %v718_v46, %v3830_v27  ;;  %2168 = vperm.xlu2 %3203, %v4171_v63   ;;  %v4300_v63 = vld [vmem:[%s5297_s0 + $0x1a8] sm:$0xff] }
 0x234   :  { %v1030_v61 = vmax.f32 %v719_v21, 0.0  ;;  %v5368_v21 = vmov 33  }
 0x235   :  { %3206 = vset.pattern.permute.xlu1 %v5368_v21 }
 0x236   :  { %2172 = vperm.xlu1 %3206, %v3254_v43  }
 0x237   :  { %3220 = vset.pattern.permute.xlu0 %v5368_v21 }
 0x238   :  { %2220 = vperm.xlu0 %3220, %v4300_v63  }
 0x239   :  { %v720_v6 = vpop.f32.mrf.mxu2 }
 0x23a   :  { %v721_v34 = vadd.f32 %v720_v6, %v3830_v27  ;;  %v2963_v6 = vld [vmem:[%s5298_s3 + $0x18] sm:$0xf0]  ;;  %3207 = vset.pattern.permute.xlu2 %v5354_v35 }
 0x23b   :  { %v2966_v41 = vor.u32 %v3123_v25, %v2963_v6  ;;  %v3255_v25 = vld [vmem:[%s5297_s0 + $0x150] sm:$0xff]  ;;  %v4317_v6 = vpop.f32.mrf.mxu3 }
 0x23c   :  { %v1032_v55 = vmax.f32 %v721_v34, 0.0  ;;  %v402_v34 = vadd.f32 %v4112_v58, %v5369_v15  ;;  %1399 = vperm.xlu2 %3207, %v3255_v25   ;;  %5371 = vst [vmem:[#allocation16_spill] sm:$0xff] %v4317_v6 }
 0x23d   :  { %799 = vmatpush.bf16.msrb.mxu2 %v2966_v41 }
 0x23e   :  { %762 = vmatmul.bf16.gmra.mxu2 %v4285_v51  ;;  %v1124_v46 = vpack.c.bf16 %v1032_v55, %v1030_v61  ;;  %v5370_v61 = vld [vmem:[#allocation23_spill] sm:$0xff]  ;;  %v480_v41 = vmax.f32 %v402_v34, 0.0  ;;  %2176 = vperm.xlu1 %3206, %v3255_v25  }
 0x23f   :  { %v404_v55 = vadd.f32 %v4112_v58, %v5370_v61 }
 0x240   :  { %1761 = vmatmul.bf16.gmra.mxu3 %v1124_v46  ;;  %v3150_v46 = vld [vmem:[%s5299_s5 + $0x68] sm:$0xff]  ;;  %3224 = vset.pattern.permute.xlu0 %v5354_v35 }
 0x241   :  { %v723_v36 = vpop.f32.mrf.mxu2  ;;  %1839 = vmatpush.bf16.msrb.mxu0 %v3150_v46  ;;  %v481_v51 = vmax.f32 %v404_v55, 0.0  ;;  %1469 = vperm.xlu0 %3224, %v4326_v0  }
 0x242   :  { %v724_v15 = vadd.f32 %v723_v36, %v3830_v27 }
 0x243   :  { %v4329_v34 = vpack.c.bf16 %v481_v51, %v480_v41  ;;  %v5374_v51 = vld [vmem:[#allocation25_spill] sm:$0xff]  ;;  %v5375_v41 = vld [vmem:[#allocation26_spill] sm:$0xff] }
 0x244   :  { %v1034_v6 = vmax.f32 %v724_v15, 0.0  ;;  %3208 = vset.pattern.permute.xlu2 %v5368_v21  ;;  %v407_v43 = vadd.f32 %v4112_v58, %v5374_v51  ;;  %v409_v15 = vadd.f32 %v4112_v58, %v5375_v41 }
 0x245   :  { %5372 = vst [vmem:[#allocation18_spill] sm:$0xff] %v4329_v34  ;;  %2180 = vperm.xlu2 %3208, %v4186_v3  }
 0x246   :  { %v482_v3 = vmax.f32 %v407_v43, 0.0  ;;  %3209 = vset.pattern.permute.xlu1 %v5354_v35  ;;  %v2955_v43 = vld [vmem:[%s5298_s3 + $0x8] sm:$0xf0] }
 0x247   :  { %1414 = vperm.xlu1 %3209, %v4228_v42  }
 0x249   :  { %v725_v2 = vpop.f32.mrf.mxu2  ;;  %1484 = vperm.xlu0 %3224, %v4339_v33  }
 0x24a   :  { %v726_v61 = vadd.f32 %v725_v2, %v3830_v27  ;;  %v4334_v2 = vpop.f32.mrf.mxu3 }
 0x24b   :  { %5373 = vst [vmem:[#allocation20_spill] sm:$0xff] %v4334_v2  ;;  %v4354_v2 = vld [vmem:[%s5297_s0 + $0x1e0] sm:$0xff] }
 0x24c   :  { %v1036_v46 = vmax.f32 %v726_v61, 0.0 }
 0x24d   :  { %2184 = vperm.xlu2 %3208, %v4206_v50  }
 0x24e   :  { %767 = vmatmul.bf16.gmra.mxu2 %v4329_v34  ;;  %v1126_v36 = vpack.c.bf16 %v1036_v46, %v1034_v6  ;;  %v483_v6 = vmax.f32 %v409_v15, 0.0  ;;  %v3259_v15 = vld [vmem:[%s5297_s0 + $0x178] sm:$0xff] }
 0x250   :  { %1766 = vmatmul.bf16.gmra.mxu3 %v1126_v36  ;;  %v4357_v41 = vpack.c.bf16 %v483_v6, %v482_v3  ;;  %v412_v3 = vadd.f32 %v4112_v58, %v3897_v32  ;;  %v414_v6 = vadd.f32 %v4112_v58, %v3909_v47  ;;  %v3149_v32 = vld [vmem:[%s5299_s5 + $0x60] sm:$0xff] }
 0x251   :  { %v728_v55 = vpop.f32.mrf.mxu2  ;;  %1489 = vperm.xlu0 %3224, %v4354_v2   ;;  %1840 = vmatpush.bf16.msrb.mxu0 %v3149_v32 }
 0x252   :  { %v729_v61 = vadd.f32 %v728_v55, %v3830_v27  ;;  %v4348_v36 = vpop.f32.mrf.mxu3  ;;  %5377 = vst [vmem:[#allocation23_spill] sm:$0xff] %v4357_v41  ;;  %v3121_v55 = vld [vmem:[%s5298_s3 + $0x4] sm:$0xf]  ;;  %v484_v47 = vmax.f32 %v412_v3, 0.0  ;;  %v419_v3 = vadd.f32 %v4112_v58, %v3947_v24 }
 0x253   :  { %5376 = vst [vmem:[#allocation21_spill] sm:$0xff] %v4348_v36 }
 0x254   :  { %v1038_v51 = vmax.f32 %v729_v61, 0.0 }
 0x255   :  { %3211 = vset.pattern.permute.xlu2 %v5354_v35 }
 0x256   :  { %1424 = vperm.xlu2 %3211, %v3259_v15  }
 0x259   :  { %v730_v46 = vpop.f32.mrf.mxu2  ;;  %3230 = vset.pattern.permute.xlu0 %v5368_v21 }
 0x25a   :  { %v731_v34 = vadd.f32 %v730_v46, %v3830_v27  ;;  %v4377_v61 = vpop.f32.mrf.mxu3  ;;  %v4382_v46 = vld [vmem:[%s5297_s0 + $0x1e8] sm:$0xff] }
 0x25b   :  { %5378 = vst [vmem:[#allocation25_spill] sm:$0xff] %v4377_v61  ;;  %2252 = vperm.xlu0 %3230, %v4382_v46  }
 0x25c   :  { %v1040_v25 = vmax.f32 %v731_v34, 0.0  ;;  %v2958_v34 = vor.u32 %v3121_v55, %v2955_v43 }
 0x25e   :  { %772 = vmatmul.bf16.gmra.mxu2 %v4357_v41  ;;  %v1128_v50 = vpack.c.bf16 %v1040_v25, %v1038_v51  ;;  %v3261_v51 = vld [vmem:[%s5297_s0 + $0x170] sm:$0xff]  ;;  %3213 = vset.pattern.permute.xlu2 %v5368_v21  ;;  %v485_v25 = vmax.f32 %v414_v6, 0.0  ;;  %v3262_v6 = vld [vmem:[%s5297_s0 + $0x188] sm:$0xff] }
 0x25f   :  { %800 = vmatpush.bf16.msrb.mxu2 %v2958_v34  ;;  %1419 = vperm.xlu1 %3209, %v3261_v51  }
 0x260   :  { %1771 = vmatmul.bf16.gmra.mxu3 %v1128_v50  ;;  %2196 = vperm.xlu2 %3213, %v3259_v15   ;;  %v4394_v61 = vpack.c.bf16 %v485_v25, %v484_v47  ;;  %v417_v15 = vadd.f32 %v4112_v58, %v3932_v29  ;;  %v3263_v29 = vld [vmem:[%s5297_s0 + $0x190] sm:$0xff] }
 0x261   :  { %v733_v42 = vpop.f32.mrf.mxu2 }
 0x262   :  { %v734_v50 = vadd.f32 %v733_v42, %v3830_v27  ;;  %v4397_v36 = vpop.f32.mrf.mxu3  ;;  %v486_v32 = vmax.f32 %v417_v15, 0.0  ;;  %v424_v15 = vadd.f32 %v4112_v58, %v3981_v16 }
 0x264   :  { %v1042_v34 = vmax.f32 %v734_v50, 0.0 }
 0x267   :  { %3212 = vset.pattern.permute.xlu1 %v5368_v21 }
 0x268   :  { %2192 = vperm.xlu1 %3212, %v3261_v51   ;;  %2200 = vperm.xlu2 %3213, %v4249_v9  }
 0x269   :  { %v735_v55 = vpop.f32.mrf.mxu2 }
 0x26a   :  { %v736_v43 = vadd.f32 %v735_v55, %v3830_v27  ;;  %v4409_v51 = vpop.f32.mrf.mxu3 }
 0x26c   :  { %v1044_v41 = vmax.f32 %v736_v43, 0.0 }
 0x26e   :  { %777 = vmatmul.bf16.gmra.mxu2 %v4394_v61  ;;  %v1130_v1 = vpack.c.bf16 %v1044_v41, %v1042_v34  ;;  %v487_v41 = vmax.f32 %v419_v3, 0.0  ;;  %v3148_v3 = vld [vmem:[%s5299_s5 + $0x58] sm:$0xff] }
 0x26f   :  { %1841 = vmatpush.bf16.msrb.mxu0 %v3148_v3  ;;  %v5379_v3 = vld [vmem:[#allocation2_spill] sm:$0xff] }
 0x270   :  { %1776 = vmatmul.bf16.gmra.mxu3 %v1130_v1  ;;  %3215 = vset.pattern.permute.xlu1 %v5354_v35  ;;  %v4417_v50 = vpack.c.bf16 %v487_v41, %v486_v32  ;;  %v489_v41 = vmax.f32 %v424_v15, 0.0 }
 0x271   :  { %v738_v42 = vpop.f32.mrf.mxu2  ;;  %1434 = vperm.xlu1 %3215, %v3262_v6   ;;  %3217 = vset.pattern.permute.xlu2 %v5354_v35 }
 0x272   :  { %v739_v1 = vadd.f32 %v738_v42, %v3830_v27  ;;  %1439 = vperm.xlu2 %3217, %v3263_v29   ;;  %v4422_v34 = vpop.f32.mrf.mxu3  ;;  %v422_v42 = vadd.f32 %v4112_v58, %v3960_v13 }
 0x274   :  { %v1046_v47 = vmax.f32 %v739_v1, 0.0  ;;  %v488_v32 = vmax.f32 %v422_v42, 0.0 }
 0x276   :  { %v4437_v16 = vpack.c.bf16 %v489_v41, %v488_v32 }
 0x279   :  { %v740_v9 = vpop.f32.mrf.mxu2  ;;  %3216 = vset.pattern.permute.xlu1 %v5368_v21 }
 0x27a   :  { %v741_v24 = vadd.f32 %v740_v9, %v3830_v27  ;;  %2204 = vperm.xlu1 %3216, %v3262_v6   ;;  %3218 = vset.pattern.permute.xlu2 %v5368_v21 }
 0x27b   :  { %2212 = vperm.xlu2 %3218, %v4266_v23   ;;  %v4435_v23 = vpop.f32.mrf.mxu3 }
 0x27c   :  { %v1048_v25 = vmax.f32 %v741_v24, 0.0 }
 0x27e   :  { %782 = vmatmul.bf16.gmra.mxu2 %v4417_v50  ;;  %v1132_v55 = vpack.c.bf16 %v1048_v25, %v1046_v47 }
 0x280   :  { %1781 = vmatmul.bf16.gmra.mxu3 %v1132_v55 }
 0x281   :  { %v743_v43 = vpop.f32.mrf.mxu2 }
 0x282   :  { %v744_v6 = vadd.f32 %v743_v43, %v3830_v27  ;;  %2208 = vperm.xlu1 %3216, %v3263_v29   ;;  %v3265_v43 = vld [vmem:[%s5297_s0 + $0x1b0] sm:$0xff] }
 0x283   :  { %2216 = vperm.xlu2 %3218, %v4279_v52   ;;  %v3264_v52 = vld [vmem:[%s5297_s0 + $0x1b8] sm:$0xff]  ;;  %v4446_v29 = vpop.f32.mrf.mxu3 }
 0x284   :  { %v1050_v13 = vmax.f32 %v744_v6, 0.0  ;;  %v3154_v6 = vld [vmem:[%s5302_s8 + $0x8] sm:$0xff] }
 0x285   :  { %2679 = vmatpush.bf16.msrb.mxu1 %v3154_v6 }
 0x289   :  { %v745_v1 = vpop.f32.mrf.mxu2 }
 0x28a   :  { %v746_v9 = vadd.f32 %v745_v1, %v3830_v27  ;;  %3219 = vset.pattern.permute.xlu1 %v5354_v35 }
 0x28b   :  { %1454 = vperm.xlu1 %3219, %v4300_v63   ;;  %3221 = vset.pattern.permute.xlu2 %v5354_v35  ;;  %v4455_v41 = vpop.f32.mrf.mxu3 }
 0x28c   :  { %v1052_v24 = vmax.f32 %v746_v9, 0.0  ;;  %1464 = vperm.xlu2 %3221, %v3264_v52  }
 0x28e   :  { %787 = vmatmul.bf16.gmra.mxu2 %v4437_v16  ;;  %v1134_v58 = vpack.c.bf16 %v1052_v24, %v1050_v13 }
 0x290   :  { %1786 = vmatmul.bf16.gmra.mxu3 %v1134_v58 }
 0x291   :  { %v748_v47 = vpop.f32.mrf.mxu2 }
 0x292   :  { %v749_v25 = vadd.f32 %v748_v47, %v3830_v27  ;;  %v3266_v47 = vld [vmem:[%s5297_s0 + $0x1c8] sm:$0xff] }
 0x293   :  { %1459 = vperm.xlu1 %3219, %v3265_v43   ;;  %v4463_v24 = vpop.f32.mrf.mxu3 }
 0x294   :  { %3223 = vset.pattern.permute.xlu2 %v5368_v21  ;;  %v1054_v63 = vmax.f32 %v749_v25, 0.0 }
 0x295   :  { %2228 = vperm.xlu2 %3223, %v3264_v52  }
 0x299   :  { %v750_v55 = vpop.f32.mrf.mxu2 }
 0x29a   :  { %v751_v42 = vadd.f32 %v750_v55, %v3830_v27  ;;  %v3267_v55 = vld [vmem:[%s5297_s0 + $0x1d0] sm:$0xff] }
 0x29b   :  { %3222 = vset.pattern.permute.xlu1 %v5368_v21 }
 0x29c   :  { %v1056_v15 = vmax.f32 %v751_v42, 0.0  ;;  %2224 = vperm.xlu1 %3222, %v3265_v43   ;;  %v5380_v43 = vld [vmem:[#allocation3_spill] sm:$0xff] }
 0x29d   :  { %2232 = vperm.xlu2 %3223, %v4326_v0   ;;  %v3147_v0 = vld [vmem:[%s5299_s5 + $0x50] sm:$0xff] }
 0x29e   :  { %801 = vmatmul.bf16.vlgmr.msrb.gmra.mxu2 %v5379_v3  ;;  %v1136_v32 = vpack.c.bf16 %v1056_v15, %v1054_v63  ;;  %1842 = vmatpush.bf16.msrb.mxu0 %v3147_v0  ;;  %v4479_v15 = vpop.f32.mrf.mxu3 }
 0x2a0   :  { %1791 = vmatmul.bf16.gmra.mxu3 %v1136_v32 }
 0x2a1   :  { %v753_v1 = vpop.f32.mrf.mxu2 }
 0x2a2   :  { %v754_v9 = vadd.f32 %v753_v1, %v3830_v27 }
 0x2a4   :  { %3225 = vset.pattern.permute.xlu1 %v5354_v35  ;;  %v1058_v52 = vmax.f32 %v754_v9, 0.0 }
 0x2a5   :  { %1474 = vperm.xlu1 %3225, %v3266_v47   ;;  %3227 = vset.pattern.permute.xlu2 %v5354_v35 }
 0x2a6   :  { %1479 = vperm.xlu2 %3227, %v3267_v55  }
 0x2a9   :  { %v755_v13 = vpop.f32.mrf.mxu2 }
 0x2aa   :  { %v756_v58 = vadd.f32 %v755_v13, %v3830_v27  ;;  %v4485_v13 = vpop.f32.mrf.mxu3 }
 0x2ac   :  { %v1060_v25 = vmax.f32 %v756_v58, 0.0  ;;  %v5381_v58 = vld [vmem:[#allocation4_spill] sm:$0xff] }
 0x2ad   :  { %3226 = vset.pattern.permute.xlu1 %v5368_v21 }
 0x2ae   :  { %806 = vmatmul.bf16.gmra.mxu2 %v5380_v43  ;;  %v1138_v42 = vpack.c.bf16 %v1060_v25, %v1058_v52  ;;  %2236 = vperm.xlu1 %3226, %v3266_v47  }
 0x2af   :  { %3228 = vset.pattern.permute.xlu2 %v5368_v21 }
 0x2b0   :  { %1796 = vmatmul.bf16.gmra.mxu3 %v1138_v42  ;;  %2244 = vperm.xlu2 %3228, %v4339_v33   ;;  %v3268_v33 = vld [vmem:[%s5297_s0 + $0x1f8] sm:$0xff] }
 0x2b1   :  { %v758_v63 = vpop.f32.mrf.mxu2 }
 0x2b2   :  { %v759_v3 = vadd.f32 %v758_v63, %v3830_v27  ;;  %v4495_v25 = vpop.f32.mrf.mxu3  ;;  %v5382_v63 = vld [vmem:[#allocation5_spill] sm:$0xff] }
 0x2b4   :  { %v1062_v1 = vmax.f32 %v759_v3, 0.0 }
 0x2b6   :  { %2240 = vperm.xlu1 %3226, %v3267_v55  }
 0x2b8   :  { %2248 = vperm.xlu2 %3228, %v4354_v2  }
 0x2b9   :  { %v760_v32 = vpop.f32.mrf.mxu2 }
 0x2ba   :  { %v761_v6 = vadd.f32 %v760_v32, %v3830_v27 }
 0x2bc   :  { %v1064_v9 = vmax.f32 %v761_v6, 0.0  ;;  %v4507_v6 = vpop.f32.mrf.mxu3 }
 0x2be   :  { %811 = vmatmul.bf16.gmra.mxu2 %v5381_v58  ;;  %v1140_v52 = vpack.c.bf16 %v1064_v9, %v1062_v1  ;;  %3229 = vset.pattern.permute.xlu1 %v5354_v35 }
 0x2bf   :  { %1494 = vperm.xlu1 %3229, %v4382_v46   ;;  %v3146_v46 = vld [vmem:[%s5299_s5 + $0x48] sm:$0xff] }
 0x2c0   :  { %1801 = vmatmul.bf16.gmra.mxu3 %v1140_v52  ;;  %3231 = vset.pattern.permute.xlu2 %v5354_v35  ;;  %v3269_v35 = vld [vmem:[%s5297_s0 + $0x1f0] sm:$0xff] }
 0x2c1   :  { %v763_v47 = vpop.f32.mrf.mxu2  ;;  %1504 = vperm.xlu2 %3231, %v3268_v33   ;;  %1843 = vmatpush.bf16.msrb.mxu0 %v3146_v46 }
 0x2c2   :  { %v764_v0 = vadd.f32 %v763_v47, %v3830_v27 }
 0x2c4   :  { %v1066_v43 = vmax.f32 %v764_v0, 0.0  ;;  %v4511_v58 = vpop.f32.mrf.mxu3 }
 0x2c7   :  { %1499 = vperm.xlu1 %3229, %v3269_v35  }
 0x2c9   :  { %v765_v55 = vpop.f32.mrf.mxu2  ;;  %3233 = vset.pattern.permute.xlu2 %v5368_v21 }
 0x2ca   :  { %v766_v2 = vadd.f32 %v765_v55, %v3830_v27  ;;  %2260 = vperm.xlu2 %3233, %v3268_v33   ;;  %v5383_v55 = vld [vmem:[#allocation6_spill] sm:$0xff] }
 0x2cc   :  { %v1068_v42 = vmax.f32 %v766_v2, 0.0 }
 0x2ce   :  { %816 = vmatmul.bf16.gmra.mxu2 %v5382_v63  ;;  %v1142_v3 = vpack.c.bf16 %v1068_v42, %v1066_v43  ;;  %v4515_v43 = vpop.f32.mrf.mxu3 }
 0x2cf   :  { %3232 = vset.pattern.permute.xlu1 %v5368_v21  ;;  %5384 = vst [vmem:[#allocation26_spill] sm:$0xff] %v4515_v43  ;;  %v5391_v43 = vld [vmem:[#allocation11_spill] sm:$0xff] }
 0x2d0   :  { %1806 = vmatmul.bf16.gmra.mxu3 %v1142_v3  ;;  %2256 = vperm.xlu1 %3232, %v3269_v35  }
 0x2d1   :  { %v768_v32 = vpop.f32.mrf.mxu2 }
 0x2d2   :  { %v769_v1 = vadd.f32 %v768_v32, %v3830_v27  ;;  %v5386_v32 = vld [vmem:[#allocation7_spill] sm:$0xff] }
 0x2d4   :  { %v1070_v47 = vmax.f32 %v769_v1, 0.0 }
 0x2d6   :  { %v4519_v3 = vpop.f32.mrf.mxu3 }
 0x2d7   :  { %5385 = vst [vmem:[#allocation2_spill] sm:$0xff] %v4519_v3 }
 0x2d9   :  { %v770_v9 = vpop.f32.mrf.mxu2 }
 0x2da   :  { %v771_v52 = vadd.f32 %v770_v9, %v3830_v27  ;;  %v3145_v9 = vld [vmem:[%s5299_s5 + $0x40] sm:$0xff] }
 0x2db   :  { %1844 = vmatpush.bf16.msrb.mxu0 %v3145_v9 }
 0x2dc   :  { %v1072_v0 = vmax.f32 %v771_v52, 0.0 }
 0x2de   :  { %821 = vmatmul.bf16.gmra.mxu2 %v5383_v55  ;;  %v1144_v2 = vpack.c.bf16 %v1072_v0, %v1070_v47  ;;  %v4525_v47 = vpop.f32.mrf.mxu3 }
 0x2df   :  { %5387 = vst [vmem:[#allocation3_spill] sm:$0xff] %v4525_v47 }
 0x2e0   :  { %1811 = vmatmul.bf16.gmra.mxu3 %v1144_v2 }
 0x2e1   :  { %v773_v33 = vpop.f32.mrf.mxu2 }
 0x2e2   :  { %v774_v42 = vadd.f32 %v773_v33, %v3830_v27 }
 0x2e4   :  { %v1074_v35 = vmax.f32 %v774_v42, 0.0 }
 0x2e9   :  { %v775_v21 = vpop.f32.mrf.mxu2 }
 0x2ea   :  { %v776_v46 = vadd.f32 %v775_v21, %v3830_v27  ;;  %v5388_v21 = vld [vmem:[#allocation8_spill] sm:$0xff] }
 0x2ec   :  { %v1076_v63 = vmax.f32 %v776_v46, 0.0 }
 0x2ee   :  { %826 = vmatmul.bf16.gmra.mxu2 %v5386_v32  ;;  %v1146_v1 = vpack.c.bf16 %v1076_v63, %v1074_v35  ;;  %v4530_v63 = vpop.f32.mrf.mxu3 }
 0x2ef   :  { %5389 = vst [vmem:[#allocation4_spill] sm:$0xff] %v4530_v63  ;;  %v5393_v63 = vld [vmem:[#allocation14_spill] sm:$0xff] }
 0x2f0   :  { %1816 = vmatmul.bf16.gmra.mxu3 %v1146_v1 }
 0x2f1   :  { %v778_v52 = vpop.f32.mrf.mxu2 }
 0x2f2   :  { %v779_v0 = vadd.f32 %v778_v52, %v3830_v27 }
 0x2f4   :  { %v1078_v33 = vmax.f32 %v779_v0, 0.0 }
 0x2f6   :  { %v4534_v47 = vpop.f32.mrf.mxu3 }
 0x2f7   :  { %5390 = vst [vmem:[#allocation5_spill] sm:$0xff] %v4534_v47 }
 0x2f9   :  { %v780_v55 = vpop.f32.mrf.mxu2 }
 0x2fa   :  { %v781_v2 = vadd.f32 %v780_v55, %v3830_v27 }
 0x2fc   :  { %v1080_v42 = vmax.f32 %v781_v2, 0.0 }
 0x2fe   :  { %831 = vmatmul.bf16.gmra.mxu2 %v5388_v21  ;;  %v1148_v46 = vpack.c.bf16 %v1080_v42, %v1078_v33  ;;  %v4537_v2 = vpop.f32.mrf.mxu3 }
 0x2ff   :  { %5392 = vst [vmem:[#allocation6_spill] sm:$0xff] %v4537_v2 }
 0x300   :  { %1821 = vmatmul.bf16.gmra.mxu3 %v1148_v46 }
 0x301   :  { %v783_v35 = vpop.f32.mrf.mxu2 }
 0x302   :  { %v784_v32 = vadd.f32 %v783_v35, %v3830_v27 }
 0x304   :  { %v1082_v52 = vmax.f32 %v784_v32, 0.0  ;;  %v3270_v32 = vld [vmem:[%s5300_s4] sm:$0x3] }
 0x306   :  { %v4542_v47 = vpop.f32.mrf.mxu3 }
 0x307   :  { %5394 = vst [vmem:[#allocation7_spill] sm:$0xff] %v4542_v47  ;;  %v5396_v47 = vld [vmem:[#allocation19_spill] sm:$0xff] }
 0x309   :  { %v785_v1 = vpop.f32.mrf.mxu2 }
 0x30a   :  { %v786_v9 = vadd.f32 %v785_v1, %v3830_v27 }
 0x30c   :  { %v1084_v3 = vmax.f32 %v786_v9, 0.0  ;;  %v4550_v9 = vperm.slane %v3270_v32, 1 }
 0x30e   :  { %836 = vmatmul.bf16.gmra.mxu2 %v5391_v43  ;;  %v1150_v0 = vpack.c.bf16 %v1084_v3, %v1082_v52  ;;  %v3153_v43 = vld [vmem:[%s5302_s8] sm:$0xff] }
 0x30f   :  { %2680 = vmatpush.bf16.msrb.mxu1 %v3153_v43 }
 0x310   :  { %1826 = vmatmul.bf16.gmra.mxu3 %v1150_v0 }
 0x311   :  { %v788_v55 = vpop.f32.mrf.mxu2 }
 0x312   :  { %v789_v33 = vadd.f32 %v788_v55, %v3830_v27 }
 0x314   :  { %v1086_v46 = vmax.f32 %v789_v33, 0.0 }
 0x319   :  { %v790_v42 = vpop.f32.mrf.mxu2 }
 0x31a   :  { %v791_v21 = vadd.f32 %v790_v42, %v3830_v27  ;;  %v5395_v42 = vld [vmem:[#allocation17_spill] sm:$0xff] }
 0x31c   :  { %v1088_v35 = vmax.f32 %v791_v21, 0.0 }
 0x31e   :  { %841 = vmatmul.bf16.gmra.mxu2 %v5393_v63  ;;  %v1152_v1 = vpack.c.bf16 %v1088_v35, %v1086_v46 }
 0x320   :  { %1831 = vmatmul.bf16.gmra.mxu3 %v1152_v1 }
 0x321   :  { %v802_v3 = vpop.f32.mrf.mxu2 }
 0x322   :  { %v803_v27 = vadd.f32 %v802_v3, %v4550_v9 }
 0x324   :  { %v963_v0 = vmax.f32 %v803_v27, 0.0 }
 0x329   :  { %v804_v52 = vpop.f32.mrf.mxu2 }
 0x32a   :  { %v805_v63 = vadd.f32 %v804_v52, %v4550_v9 }
 0x32c   :  { %v965_v55 = vmax.f32 %v805_v63, 0.0 }
 0x32e   :  { %v1091_v33 = vpack.c.bf16 %v965_v55, %v963_v0  ;;  %846 = vmatmul.bf16.gmra.mxu2 %v5395_v42 }
 0x330   :  { %1845 = vmatmul.bf16.vlgmr.msrb.gmra.mxu0 %v1091_v33  ;;  %v5397_v33 = vld [vmem:[#allocation22_spill] sm:$0xff] }
 0x331   :  { %v807_v21 = vpop.f32.mrf.mxu2 }
 0x332   :  { %v808_v46 = vadd.f32 %v807_v21, %v4550_v9 }
 0x334   :  { %v967_v43 = vmax.f32 %v808_v46, 0.0 }
 0x339   :  { %v809_v35 = vpop.f32.mrf.mxu2 }
 0x33a   :  { %v810_v1 = vadd.f32 %v809_v35, %v4550_v9 }
 0x33c   :  { %v969_v32 = vmax.f32 %v810_v1, 0.0 }
 0x33e   :  { %851 = vmatmul.bf16.gmra.mxu2 %v5396_v47  ;;  %v1093_v3 = vpack.c.bf16 %v969_v32, %v967_v43  ;;  %v5398_v32 = vld [vmem:[#allocation24_spill] sm:$0xff] }
 0x340   :  { %1850 = vmatmul.bf16.gmra.mxu0 %v1093_v3 }
 0x341   :  { %v812_v2 = vpop.f32.mrf.mxu2 }
 0x342   :  { %v813_v27 = vadd.f32 %v812_v2, %v4550_v9 }
 0x344   :  { %v971_v0 = vmax.f32 %v813_v27, 0.0 }
 0x349   :  { %v814_v52 = vpop.f32.mrf.mxu2 }
 0x34a   :  { %v815_v63 = vadd.f32 %v814_v52, %v4550_v9 }
 0x34c   :  { %v973_v55 = vmax.f32 %v815_v63, 0.0 }
 0x34e   :  { %856 = vmatmul.bf16.gmra.mxu2 %v5397_v33  ;;  %v1095_v42 = vpack.c.bf16 %v973_v55, %v971_v0 }
 0x350   :  { %1855 = vmatmul.bf16.gmra.mxu0 %v1095_v42 }
 0x351   :  { %v817_v21 = vpop.f32.mrf.mxu2 }
 0x352   :  { %v818_v46 = vadd.f32 %v817_v21, %v4550_v9 }
 0x354   :  { %v975_v1 = vmax.f32 %v818_v46, 0.0 }
 0x359   :  { %v819_v35 = vpop.f32.mrf.mxu2 }
 0x35a   :  { %v820_v47 = vadd.f32 %v819_v35, %v4550_v9 }
 0x35c   :  { %v977_v43 = vmax.f32 %v820_v47, 0.0 }
 0x35e   :  { %861 = vmatmul.bf16.gmra.mxu2 %v5398_v32  ;;  %v1097_v2 = vpack.c.bf16 %v977_v43, %v975_v1 }
 0x360   :  { %1860 = vmatmul.bf16.gmra.mxu0 %v1097_v2 }
 0x361   :  { %v822_v3 = vpop.f32.mrf.mxu2 }
 0x362   :  { %v823_v27 = vadd.f32 %v822_v3, %v4550_v9 }
 0x364   :  { %v979_v0 = vmax.f32 %v823_v27, 0.0 }
 0x369   :  { %v824_v52 = vpop.f32.mrf.mxu2 }
 0x36a   :  { %v825_v63 = vadd.f32 %v824_v52, %v4550_v9 }
 0x36c   :  { %v981_v55 = vmax.f32 %v825_v63, 0.0 }
 0x36e   :  { %866 = vmatmul.bf16.gmra.mxu2 %v3894_v59  ;;  %v1099_v33 = vpack.c.bf16 %v981_v55, %v979_v0 }
 0x370   :  { %1865 = vmatmul.bf16.gmra.mxu0 %v1099_v33 }
 0x371   :  { %v827_v42 = vpop.f32.mrf.mxu2 }
 0x372   :  { %v828_v21 = vadd.f32 %v827_v42, %v4550_v9 }
 0x374   :  { %v983_v47 = vmax.f32 %v828_v21, 0.0 }
 0x379   :  { %v829_v46 = vpop.f32.mrf.mxu2 }
 0x37a   :  { %v830_v35 = vadd.f32 %v829_v46, %v4550_v9 }
 0x37c   :  { %v985_v1 = vmax.f32 %v830_v35, 0.0 }
 0x37e   :  { %871 = vmatmul.bf16.gmra.mxu2 %v3915_v7  ;;  %v1101_v43 = vpack.c.bf16 %v985_v1, %v983_v47 }
 0x380   :  { %1870 = vmatmul.bf16.gmra.mxu0 %v1101_v43 }
 0x381   :  { %v832_v32 = vpop.f32.mrf.mxu2 }
 0x382   :  { %v833_v2 = vadd.f32 %v832_v32, %v4550_v9 }
 0x384   :  { %v987_v27 = vmax.f32 %v833_v2, 0.0 }
 0x389   :  { %v834_v3 = vpop.f32.mrf.mxu2 }
 0x38a   :  { %v835_v59 = vadd.f32 %v834_v3, %v4550_v9 }
 0x38c   :  { %v989_v52 = vmax.f32 %v835_v59, 0.0 }
 0x38e   :  { %876 = vmatmul.bf16.gmra.mxu2 %v3943_v45  ;;  %v1103_v63 = vpack.c.bf16 %v989_v52, %v987_v27  ;;  %v4580_v45 = vld [vmem:[%s5301_s6] ss:$0 sm:$0xff] }
 0x38f   :  { %v1508_v43 = vmul.f32 %v4580_v45, %v4022_v40 }
 0x390   :  { %1875 = vmatmul.bf16.gmra.mxu0 %v1103_v63  ;;  %v2009_v63 = vpop.permute.xlu0 %2008 }
 0x391   :  { %v837_v0 = vpop.f32.mrf.mxu2  ;;  %v1678_v27 = vadd.f32 %v3989_v18, %v1508_v43 }
 0x392   :  { %v838_v55 = vadd.f32 %v837_v0, %v4550_v9  ;;  %v1509_v0 = vmul.f32 %v4580_v45, %v4035_v56 }
 0x394   :  { %v991_v42 = vmax.f32 %v838_v55, 0.0 }
 0x399   :  { %v839_v33 = vpop.f32.mrf.mxu2 }
 0x39a   :  { %v840_v7 = vadd.f32 %v839_v33, %v4550_v9 }
 0x39c   :  { %v993_v21 = vmax.f32 %v840_v7, 0.0  ;;  %v2013_v7 = vpop.permute.xlu1 %2012 }
 0x39e   :  { %881 = vmatmul.bf16.gmra.mxu2 %v3967_v37  ;;  %v1105_v46 = vpack.c.bf16 %v993_v21, %v991_v42  ;;  %v4588_v37 = vld [vmem:[%s5301_s6 + $0x1] ss:$0 sm:$0xff]  ;;  %v1680_v42 = vadd.f32 %v3999_v30, %v1509_v0 }
 0x39f   :  { %v2264_v40 = vmul.f32 %v4588_v37, %v2009_v63  ;;  %v2265_v21 = vmul.f32 %v4588_v37, %v2013_v7 }
 0x3a0   :  { %1880 = vmatmul.bf16.gmra.mxu0 %v1105_v46 }
 0x3a1   :  { %v842_v35 = vpop.f32.mrf.mxu2 }
 0x3a2   :  { %v843_v47 = vadd.f32 %v842_v35, %v4550_v9 }
 0x3a4   :  { %v995_v2 = vmax.f32 %v843_v47, 0.0  ;;  %v2017_v7 = vpop.permute.xlu1 %2016 }
 0x3a9   :  { %v844_v1 = vpop.f32.mrf.mxu2 }
 0x3aa   :  { %v845_v32 = vadd.f32 %v844_v1, %v4550_v9 }
 0x3ac   :  { %v997_v3 = vmax.f32 %v845_v32, 0.0  ;;  %v1510_v32 = vmul.f32 %v4580_v45, %v4030_v19 }
 0x3ad   :  { %v1846_v59 = vpop.f32.mrf.mxu0 }
 0x3ae   :  { %886 = vmatmul.bf16.gmra.mxu2 %v3930_v53  ;;  %v1107_v52 = vpack.c.bf16 %v997_v3, %v995_v2  ;;  %v1847_v55 = vadd.f32 %v1846_v59, %v1678_v27  ;;  %v4600_v53 = vld [vmem:[%s5303_s7] ss:$0 sm:$0xff]  ;;  %v1683_v0 = vadd.f32 %v4005_v5, %v1510_v32  ;;  %v1512_v32 = vmul.f32 %v4580_v45, %v4047_v10  ;;  %v2025_v10 = vpop.permute.xlu0 %2024 }
 0x3b0   :  { %1885 = vmatmul.bf16.gmra.mxu0 %v1107_v52  ;;  %v2328_v46 = vadd.f32 %v2264_v40, %v1847_v55 }
 0x3b1   :  { %v847_v33 = vpop.f32.mrf.mxu2 }
 0x3b2   :  { %v2396_v56 = vadd.f32 %v4600_v53, %v2328_v46  ;;  %v848_v47 = vadd.f32 %v847_v33, %v4550_v9  ;;  %v1511_v33 = vmul.f32 %v4580_v45, %v4051_v14  ;;  %v2021_v46 = vpop.permute.xlu2 %2020 }
 0x3b3   :  { %v2267_v5 = vmul.f32 %v4588_v37, %v2021_v46  ;;  %v2029_v46 = vpop.permute.xlu1 %2028 }
 0x3b4   :  { %v2460_v3 = vmax.f32 %v2396_v56, 0.0  ;;  %v999_v59 = vmax.f32 %v848_v47, 0.0 }
 0x3b5   :  { %v1848_v18 = vpop.f32.mrf.mxu0 }
 0x3b6   :  { %v1849_v35 = vadd.f32 %v1848_v18, %v1680_v42  ;;  %v1685_v18 = vadd.f32 %v4024_v28, %v1511_v33 }
 0x3b8   :  { %v2329_v1 = vadd.f32 %v2265_v21, %v1849_v35  ;;  %v2266_v21 = vmul.f32 %v4588_v37, %v2017_v7  ;;  %v2268_v7 = vmul.f32 %v4588_v37, %v2025_v10 }
 0x3b9   :  { %v849_v43 = vpop.f32.mrf.mxu2 }
 0x3ba   :  { %v2397_v30 = vadd.f32 %v4600_v53, %v2329_v1  ;;  %v850_v2 = vadd.f32 %v849_v43, %v4550_v9 }
 0x3bc   :  { %v2461_v27 = vmax.f32 %v2397_v30, 0.0  ;;  %v1001_v52 = vmax.f32 %v850_v2, 0.0 }
 0x3bd   :  { %v1851_v63 = vpop.f32.mrf.mxu0 }
 0x3be   :  { %v2524_v40 = vpack.c.bf16 %v2461_v27, %v2460_v3  ;;  %891 = vmatmul.bf16.gmra.mxu2 %v3954_v12  ;;  %v1109_v55 = vpack.c.bf16 %v1001_v52, %v999_v59  ;;  %v1852_v19 = vadd.f32 %v1851_v63, %v1683_v0  ;;  %v1688_v63 = vadd.f32 %v4032_v17, %v1512_v32 }
 0x3c0   :  { %1890 = vmatmul.bf16.gmra.mxu0 %v1109_v55  ;;  %3087 = vmatmul.msk.bf16.vlgmr.msrb.gmra.mxu1 %vm2576_vm2, %v2524_v40  ;;  %v2330_v35 = vadd.f32 %v2266_v21, %v1852_v19  ;;  %v1513_v55 = vmul.f32 %v4580_v45, %v4076_v54 }
 0x3c1   :  { %v852_v42 = vpop.f32.mrf.mxu2 }
 0x3c2   :  { %v2398_v47 = vadd.f32 %v4600_v53, %v2330_v35  ;;  %v853_v14 = vadd.f32 %v852_v42, %v4550_v9  ;;  %v1690_v42 = vadd.f32 %v4049_v11, %v1513_v55 }
 0x3c4   :  { %v2462_v3 = vmax.f32 %v2398_v47, 0.0  ;;  %v1003_v28 = vmax.f32 %v853_v14, 0.0 }
 0x3c5   :  { %v1853_v56 = vpop.f32.mrf.mxu0 }
 0x3c6   :  { %v1854_v12 = vadd.f32 %v1853_v56, %v1685_v18 }
 0x3c8   :  { %v2331_v1 = vadd.f32 %v2267_v5, %v1854_v12 }
 0x3c9   :  { %v854_v43 = vpop.f32.mrf.mxu2 }
 0x3ca   :  { %v2399_v30 = vadd.f32 %v4600_v53, %v2331_v1  ;;  %v855_v2 = vadd.f32 %v854_v43, %v4550_v9 }
 0x3cc   :  { %v2463_v59 = vmax.f32 %v2399_v30, 0.0  ;;  %v1005_v27 = vmax.f32 %v855_v2, 0.0 }
 0x3cd   :  { %v1856_v52 = vpop.f32.mrf.mxu0 }
 0x3ce   :  { %896 = vmatmul.bf16.gmra.mxu2 %v3984_v62  ;;  %v1111_v0 = vpack.c.bf16 %v1005_v27, %v1003_v28  ;;  %v2525_v40 = vpack.c.bf16 %v2463_v59, %v2462_v3  ;;  %v1857_v33 = vadd.f32 %v1856_v52, %v1688_v63  ;;  %v2269_v62 = vmul.f32 %v4588_v37, %v2029_v46  ;;  %v2033_v28 = vpop.permute.xlu0 %2032  ;;  %v2037_v63 = vpop.permute.xlu1 %2036 }
 0x3cf   :  { %v2270_v27 = vmul.f32 %v4588_v37, %v2033_v28 }
 0x3d0   :  { %1895 = vmatmul.bf16.gmra.mxu0 %v1111_v0  ;;  %3088 = vmatmul.msk.bf16.gmra.mxu1 %vm2576_vm2, %v2525_v40  ;;  %v2332_v21 = vadd.f32 %v2268_v7, %v1857_v33  ;;  %v2271_v40 = vmul.f32 %v4588_v37, %v2037_v63 }
 0x3d1   :  { %v857_v19 = vpop.f32.mrf.mxu2 }
 0x3d2   :  { %v2400_v5 = vadd.f32 %v4600_v53, %v2332_v21  ;;  %v858_v54 = vadd.f32 %v857_v19, %v4550_v9  ;;  %v4642_v19 = vpop.permute.xlu2 %1269 }
 0x3d4   :  { %v2464_v14 = vmax.f32 %v2400_v5, 0.0  ;;  %v1007_v1 = vmax.f32 %v858_v54, 0.0 }
 0x3d5   :  { %v1858_v17 = vpop.f32.mrf.mxu0 }
 0x3d6   :  { %v1859_v18 = vadd.f32 %v1858_v17, %v1690_v42 }
 0x3d8   :  { %v2333_v35 = vadd.f32 %v2269_v62, %v1859_v18 }
 0x3d9   :  { %v859_v56 = vpop.f32.mrf.mxu2 }
 0x3da   :  { %v2401_v12 = vadd.f32 %v4600_v53, %v2333_v35  ;;  %v860_v47 = vadd.f32 %v859_v56, %v4550_v9  ;;  %v2041_v35 = vpop.permute.xlu0 %2040 }
 0x3dc   :  { %v2465_v43 = vmax.f32 %v2401_v12, 0.0  ;;  %v1009_v11 = vmax.f32 %v860_v47, 0.0  ;;  %v2272_v12 = vmul.f32 %v4588_v37, %v2041_v35  ;;  %v4650_v47 = vpop.permute.xlu2 %1274 }
 0x3dd   :  { %v1861_v32 = vpop.f32.mrf.mxu0 }
 0x3de   :  { %901 = vmatmul.bf16.gmra.mxu2 %v4062_v38  ;;  %v1113_v30 = vpack.c.bf16 %v1009_v11, %v1007_v1  ;;  %v2526_v2 = vpack.c.bf16 %v2465_v43, %v2464_v14  ;;  %v1862_v3 = vadd.f32 %v1861_v32, %v4067_v57  ;;  %v2045_v1 = vpop.permute.xlu1 %2044 }
 0x3df   :  { %v2273_v11 = vmul.f32 %v4588_v37, %v2045_v1 }
 0x3e0   :  { %1900 = vmatmul.bf16.gmra.mxu0 %v1113_v30  ;;  %3089 = vmatmul.msk.bf16.gmra.mxu1 %vm2576_vm2, %v2526_v2  ;;  %v2334_v52 = vadd.f32 %v2270_v27, %v1862_v3 }
 0x3e1   :  { %v862_v59 = vpop.f32.mrf.mxu2 }
 0x3e2   :  { %v2402_v38 = vadd.f32 %v4600_v53, %v2334_v52  ;;  %v863_v33 = vadd.f32 %v862_v59, %v4550_v9 }
 0x3e4   :  { %v2466_v21 = vmax.f32 %v2402_v38, 0.0  ;;  %v1011_v46 = vmax.f32 %v863_v33, 0.0 }
 0x3e5   :  { %v1863_v0 = vpop.f32.mrf.mxu0 }
 0x3e6   :  { %v1864_v55 = vadd.f32 %v1863_v0, %v4090_v39 }
 0x3e8   :  { %v2335_v10 = vadd.f32 %v2271_v40, %v1864_v55 }
 0x3e9   :  { %v864_v57 = vpop.f32.mrf.mxu2 }
 0x3ea   :  { %v2403_v7 = vadd.f32 %v4600_v53, %v2335_v10  ;;  %v865_v42 = vadd.f32 %v864_v57, %v4550_v9 }
 0x3ec   :  { %v2467_v17 = vmax.f32 %v2403_v7, 0.0  ;;  %v1013_v62 = vmax.f32 %v865_v42, 0.0  ;;  %v2053_v7 = vpop.permute.xlu0 %2052 }
 0x3ed   :  { %v1866_v18 = vpop.f32.mrf.mxu0 }
 0x3ee   :  { %906 = vmatmul.bf16.gmra.mxu2 %v4094_v44  ;;  %v1115_v39 = vpack.c.bf16 %v1013_v62, %v1011_v46  ;;  %v2527_v5 = vpack.c.bf16 %v2467_v17, %v2466_v21  ;;  %v1867_v54 = vadd.f32 %v1866_v18, %v4103_v4  ;;  %v2275_v21 = vmul.f32 %v4588_v37, %v2053_v7 }
 0x3f0   :  { %1905 = vmatmul.bf16.gmra.mxu0 %v1115_v39  ;;  %3090 = vmatmul.msk.bf16.gmra.mxu1 %vm2576_vm2, %v2527_v5  ;;  %v2336_v14 = vadd.f32 %v2272_v12, %v1867_v54 }
 0x3f1   :  { %v867_v56 = vpop.f32.mrf.mxu2 }
 0x3f2   :  { %v2404_v32 = vadd.f32 %v4600_v53, %v2336_v14  ;;  %v868_v4 = vadd.f32 %v867_v56, %v4550_v9 }
 0x3f4   :  { %v2468_v59 = vmax.f32 %v2404_v32, 0.0  ;;  %v1015_v27 = vmax.f32 %v868_v4, 0.0  ;;  %v2061_v4 = vpop.permute.xlu0 %2060 }
 0x3f5   :  { %v1868_v43 = vpop.f32.mrf.mxu0 }
 0x3f6   :  { %v1869_v44 = vadd.f32 %v1868_v43, %v4127_v49  ;;  %v2049_v49 = vpop.permute.xlu2 %2048 }
 0x3f7   :  { %v2274_v38 = vmul.f32 %v4588_v37, %v2049_v49 }
 0x3f8   :  { %v2337_v30 = vadd.f32 %v2273_v11, %v1869_v44 }
 0x3f9   :  { %v869_v2 = vpop.f32.mrf.mxu2 }
 0x3fa   :  { %v2405_v3 = vadd.f32 %v4600_v53, %v2337_v30  ;;  %v870_v28 = vadd.f32 %v869_v2, %v4550_v9  ;;  %v2277_v2 = vmul.f32 %v4588_v37, %v2061_v4 }
 0x3fc   :  { %v2469_v52 = vmax.f32 %v2405_v3, 0.0  ;;  %v1017_v63 = vmax.f32 %v870_v28, 0.0 }
 0x3fd   :  { %v1871_v0 = vpop.f32.mrf.mxu0 }
 0x3fe   :  { %911 = vmatmul.bf16.gmra.mxu2 %v4132_v20  ;;  %v1117_v40 = vpack.c.bf16 %v1017_v63, %v1015_v27  ;;  %v2528_v55 = vpack.c.bf16 %v2469_v52, %v2468_v59  ;;  %v1872_v33 = vadd.f32 %v1871_v0, %v4136_v22  ;;  %v2057_v43 = vpop.permute.xlu2 %2056  ;;  %v1280_v27 = vpop.permute.xlu1 %1279 }
 0x3ff   :  { %v2276_v44 = vmul.f32 %v4588_v37, %v2057_v43 }
 0x400   :  { %1910 = vmatmul.bf16.gmra.mxu0 %v1117_v40  ;;  %3091 = vmatmul.msk.bf16.gmra.mxu1 %vm2576_vm2, %v2528_v55  ;;  %v2338_v57 = vadd.f32 %v2274_v38, %v1872_v33 }
 0x401   :  { %v872_v10 = vpop.f32.mrf.mxu2 }
 0x402   :  { %v2406_v20 = vadd.f32 %v4600_v53, %v2338_v57  ;;  %v873_v17 = vadd.f32 %v872_v10, %v4550_v9  ;;  %v5399_v10 = vld [vmem:[#allocation9_spill] sm:$0xff] }
 0x404   :  { %v2470_v5 = vmax.f32 %v2406_v20, 0.0  ;;  %v1019_v54 = vmax.f32 %v873_v17, 0.0  ;;  %v2069_v17 = vpop.permute.xlu0 %2068 }
 0x405   :  { %v1873_v42 = vpop.f32.mrf.mxu0 }
 0x406   :  { %v1874_v46 = vadd.f32 %v1873_v42, %v4164_v60  ;;  %v2065_v7 = vpop.permute.xlu2 %2064 }
 0x408   :  { %v2339_v62 = vadd.f32 %v2275_v21, %v1874_v46  ;;  %v2278_v21 = vmul.f32 %v4588_v37, %v2065_v7  ;;  %v1285_v46 = vpop.permute.xlu1 %1284 }
 0x409   :  { %v874_v18 = vpop.f32.mrf.mxu2 }
 0x40a   :  { %v2407_v39 = vadd.f32 %v4600_v53, %v2339_v62  ;;  %v875_v22 = vadd.f32 %v874_v18, %v4550_v9  ;;  %v2279_v18 = vmul.f32 %v4588_v37, %v2069_v17 }
 0x40c   :  { %v2471_v35 = vmax.f32 %v2407_v39, 0.0  ;;  %v1021_v56 = vmax.f32 %v875_v22, 0.0  ;;  %v5400_v39 = vld [vmem:[#allocation10_spill] sm:$0xff] }
 0x40d   :  { %v1876_v12 = vpop.f32.mrf.mxu0 }
 0x40e   :  { %916 = vmatmul.bf16.gmra.mxu2 %v4176_v48  ;;  %v1119_v14 = vpack.c.bf16 %v1021_v56, %v1019_v54  ;;  %v2529_v1 = vpack.c.bf16 %v2471_v35, %v2470_v5  ;;  %v1877_v60 = vadd.f32 %v1876_v12, %v4178_v31  ;;  %v1524_v56 = vmul.f32 %v4580_v45, %v4642_v19 }
 0x410   :  { %1915 = vmatmul.bf16.gmra.mxu0 %v1119_v14  ;;  %3092 = vmatmul.msk.bf16.gmra.mxu1 %vm2576_vm2, %v2529_v1  ;;  %v2340_v32 = vadd.f32 %v2276_v44, %v1877_v60 }
 0x411   :  { %v877_v11 = vpop.f32.mrf.mxu2 }
 0x412   :  { %v2408_v48 = vadd.f32 %v4600_v53, %v2340_v32  ;;  %v878_v28 = vadd.f32 %v877_v11, %v4550_v9  ;;  %v5401_v32 = vld [vmem:[#allocation13_spill] sm:$0xff] }
 0x413   :  { %v1718_v4 = vadd.f32 %v5401_v32, %v1524_v56 }
 0x414   :  { %v2472_v0 = vmax.f32 %v2408_v48, 0.0  ;;  %v1023_v40 = vmax.f32 %v878_v28, 0.0  ;;  %v2073_v48 = vpop.permute.xlu1 %2072  ;;  %v1525_v28 = vmul.f32 %v4580_v45, %v4650_v47 }
 0x415   :  { %v1878_v30 = vpop.f32.mrf.mxu0  ;;  %v2280_v19 = vmul.f32 %v4588_v37, %v2073_v48 }
 0x416   :  { %v1879_v3 = vadd.f32 %v1878_v30, %v4200_v26  ;;  %v5402_v30 = vld [vmem:[#allocation12_spill] sm:$0xff] }
 0x418   :  { %v2341_v59 = vadd.f32 %v2277_v2, %v1879_v3 }
 0x419   :  { %v879_v31 = vpop.f32.mrf.mxu2 }
 0x41a   :  { %v2409_v52 = vadd.f32 %v4600_v53, %v2341_v59  ;;  %v880_v63 = vadd.f32 %v879_v31, %v4550_v9 }
 0x41c   :  { %v2473_v55 = vmax.f32 %v2409_v52, 0.0  ;;  %v1025_v49 = vmax.f32 %v880_v63, 0.0  ;;  %v5403_v52 = vld [vmem:[#allocation16_spill] sm:$0xff] }
 0x41d   :  { %v1881_v38 = vpop.f32.mrf.mxu0  ;;  %v1720_v63 = vadd.f32 %v5403_v52, %v1525_v28  ;;  %v1290_v28 = vpop.permute.xlu0 %1289 }
 0x41e   :  { %921 = vmatmul.bf16.gmra.mxu2 %v4213_v8  ;;  %v1121_v33 = vpack.c.bf16 %v1025_v49, %v1023_v40  ;;  %v2530_v26 = vpack.c.bf16 %v2473_v55, %v2472_v0  ;;  %v1882_v57 = vadd.f32 %v1881_v38, %v5399_v10  ;;  %v2077_v40 = vpop.permute.xlu2 %2076 }
 0x41f   :  { %v2281_v49 = vmul.f32 %v4588_v37, %v2077_v40 }
 0x420   :  { %1920 = vmatmul.bf16.gmra.mxu0 %v1121_v33  ;;  %3093 = vmatmul.msk.bf16.gmra.mxu1 %vm2576_vm2, %v2530_v26  ;;  %v2342_v20 = vadd.f32 %v2278_v21, %v1882_v57  ;;  %v1526_v57 = vmul.f32 %v4580_v45, %v1280_v27  ;;  %v4706_v21 = vld [vmem:[%s5304_s9] ss:$0 sm:$0xff] }
 0x421   :  { %v882_v42 = vpop.f32.mrf.mxu2 }
 0x422   :  { %v2410_v8 = vadd.f32 %v4600_v53, %v2342_v20  ;;  %v883_v5 = vadd.f32 %v882_v42, %v4550_v9 }
 0x424   :  { %v2474_v1 = vmax.f32 %v2410_v8, 0.0  ;;  %v1027_v60 = vmax.f32 %v883_v5, 0.0  ;;  %v5404_v8 = vld [vmem:[#allocation20_spill] sm:$0xff] }
 0x425   :  { %v1883_v62 = vpop.f32.mrf.mxu0  ;;  %v1723_v5 = vadd.f32 %v5404_v8, %v1526_v57  ;;  %v5407_v57 = vld [vmem:[#allocation25_spill] sm:$0xff] }
 0x426   :  { %v1884_v22 = vadd.f32 %v1883_v62, %v5400_v39  ;;  %v2085_v32 = vpop.permute.xlu2 %2084 }
 0x428   :  { %v2343_v54 = vadd.f32 %v2279_v18, %v1884_v22 }
 0x429   :  { %v884_v35 = vpop.f32.mrf.mxu2 }
 0x42a   :  { %v2411_v12 = vadd.f32 %v4600_v53, %v2343_v54  ;;  %v885_v14 = vadd.f32 %v884_v35, %v4550_v9  ;;  %v5405_v54 = vld [vmem:[#allocation15_spill] sm:$0xff] }
 0x42c   :  { %v2475_v43 = vmax.f32 %v2411_v12, 0.0  ;;  %v1029_v11 = vmax.f32 %v885_v14, 0.0  ;;  %v1527_v12 = vmul.f32 %v4580_v45, %v1285_v46  ;;  %v2283_v46 = vmul.f32 %v4588_v37, %v2085_v32 }
 0x42d   :  { %v1886_v44 = vpop.f32.mrf.mxu0 }
 0x42e   :  { %926 = vmatmul.bf16.gmra.mxu2 %v5402_v30  ;;  %v1123_v2 = vpack.c.bf16 %v1029_v11, %v1027_v60  ;;  %v2531_v3 = vpack.c.bf16 %v2475_v43, %v2474_v1  ;;  %v1887_v59 = vadd.f32 %v1886_v44, %v1718_v4  ;;  %v2081_v1 = vpop.permute.xlu1 %2080  ;;  %v5406_v11 = vld [vmem:[#allocation21_spill] sm:$0xff] }
 0x42f   :  { %v2282_v43 = vmul.f32 %v4588_v37, %v2081_v1  ;;  %v1725_v44 = vadd.f32 %v5406_v11, %v1527_v12 }
 0x430   :  { %1925 = vmatmul.bf16.gmra.mxu0 %v1123_v2  ;;  %3094 = vmatmul.msk.bf16.gmra.mxu1 %vm2576_vm2, %v2531_v3  ;;  %v2344_v0 = vadd.f32 %v2280_v19, %v1887_v59 }
 0x431   :  { %v887_v31 = vpop.f32.mrf.mxu2 }
 0x432   :  { %v2412_v33 = vadd.f32 %v4600_v53, %v2344_v0  ;;  %v888_v26 = vadd.f32 %v887_v31, %v4550_v9 }
 0x434   :  { %v2476_v20 = vmax.f32 %v2412_v33, 0.0  ;;  %v1031_v17 = vmax.f32 %v888_v26, 0.0 }
 0x435   :  { %v1888_v55 = vpop.f32.mrf.mxu0 }
 0x436   :  { %v1889_v38 = vadd.f32 %v1888_v55, %v1720_v63  ;;  %v1528_v63 = vmul.f32 %v4580_v45, %v1290_v28  ;;  %v1295_v55 = vpop.permute.xlu1 %1294 }
 0x438   :  { %v2345_v47 = vadd.f32 %v2281_v49, %v1889_v38 }
 0x439   :  { %v889_v10 = vpop.f32.mrf.mxu2 }
 0x43a   :  { %v2413_v7 = vadd.f32 %v4600_v53, %v2345_v47  ;;  %v890_v42 = vadd.f32 %v889_v10, %v4550_v9 }
 0x43c   :  { %v2477_v62 = vmax.f32 %v2413_v7, 0.0  ;;  %v1033_v18 = vmax.f32 %v890_v42, 0.0  ;;  %v1728_v7 = vadd.f32 %v5407_v57, %v1528_v63  ;;  %v2089_v42 = vpop.permute.xlu2 %2088 }
 0x43d   :  { %v1891_v39 = vpop.f32.mrf.mxu0  ;;  %v2682_v22 = vpop.f32.mrf.mxu1 }
 0x43e   :  { %v2683_v27 = vadd.f32 %v4706_v21, %v2682_v22  ;;  %931 = vmatmul.bf16.gmra.mxu2 %v5405_v54  ;;  %v1125_v35 = vpack.c.bf16 %v1033_v18, %v1031_v17  ;;  %v2532_v56 = vpack.c.bf16 %v2477_v62, %v2476_v20  ;;  %v1892_v14 = vadd.f32 %v1891_v39, %v1723_v5  ;;  %v5408_v17 = vld [vmem:[#allocation18_spill] sm:$0xff] }
 0x43f   :  { %v1529_v39 = vmul.f32 %v4580_v45, %v1295_v55  ;;  %v2284_v5 = vmul.f32 %v4588_v37, %v2089_v42 }
 0x440   :  { %2843 = vst.msk [vmem:[%s5305_s10] sm:$0xff] %vm2842_vm3, %v2683_v27  ;;  %1930 = vmatmul.bf16.gmra.mxu0 %v1125_v35  ;;  %3095 = vmatmul.msk.bf16.gmra.mxu1 %vm2576_vm2, %v2532_v56  ;;  %v2346_v4 = vadd.f32 %v2282_v43, %v1892_v14  ;;  %v2093_v27 = vpop.permute.xlu0 %2092  ;;  %v1300_v43 = vpop.permute.xlu1 %1299 }
 0x441   :  { %v892_v60 = vpop.f32.mrf.mxu2  ;;  %v1730_v54 = vadd.f32 %v4397_v36, %v1529_v39  ;;  %v2285_v35 = vmul.f32 %v4588_v37, %v2093_v27 }
 0x442   :  { %v2414_v19 = vadd.f32 %v4600_v53, %v2346_v4  ;;  %v893_v59 = vadd.f32 %v892_v60, %v4550_v9 }
 0x444   :  { %v2478_v49 = vmax.f32 %v2414_v19, 0.0  ;;  %v1035_v38 = vmax.f32 %v893_v59, 0.0  ;;  %v1305_v11 = vpop.permute.xlu2 %1304 }
 0x445   :  { %v1893_v30 = vpop.f32.mrf.mxu0  ;;  %v2684_v2 = vpop.f32.mrf.mxu1 }
 0x446   :  { %v1894_v3 = vadd.f32 %v1893_v30, %v1725_v44  ;;  %v2685_v48 = vadd.f32 %v4706_v21, %v2684_v2  ;;  %v1530_v30 = vmul.f32 %v4580_v45, %v1300_v43 }
 0x448   :  { %v2347_v31 = vadd.f32 %v2283_v46, %v1894_v3  ;;  %2844 = vst.msk [vmem:[%s5305_s10 + $0x8] sm:$0xff] %vm2842_vm3, %v2685_v48 }
 0x449   :  { %v894_v52 = vpop.f32.mrf.mxu2 }
 0x44a   :  { %v2415_v0 = vadd.f32 %v4600_v53, %v2347_v31  ;;  %v895_v40 = vadd.f32 %v894_v52, %v4550_v9  ;;  %v1733_v52 = vadd.f32 %v4409_v51, %v1530_v30 }
 0x44c   :  { %v2479_v33 = vmax.f32 %v2415_v0, 0.0  ;;  %v1037_v26 = vmax.f32 %v895_v40, 0.0  ;;  %v5409_v0 = vld [vmem:[#allocation23_spill] sm:$0xff] }
 0x44d   :  { %v1896_v47 = vpop.f32.mrf.mxu0  ;;  %v2687_v10 = vpop.f32.mrf.mxu1 }
 0x44e   :  { %v2688_v20 = vadd.f32 %v4706_v21, %v2687_v10  ;;  %936 = vmatmul.bf16.gmra.mxu2 %v5408_v17  ;;  %v1127_v62 = vpack.c.bf16 %v1037_v26, %v1035_v38  ;;  %v2533_v18 = vpack.c.bf16 %v2479_v33, %v2478_v49  ;;  %v1897_v22 = vadd.f32 %v1896_v47, %v1728_v7  ;;  %v2097_v49 = vpop.permute.xlu1 %2096  ;;  %v2101_v47 = vpop.permute.xlu2 %2100 }
 0x44f   :  { %v1531_v38 = vmul.f32 %v4580_v45, %v1305_v11  ;;  %v2286_v33 = vmul.f32 %v4588_v37, %v2097_v49  ;;  %v2287_v57 = vmul.f32 %v4588_v37, %v2101_v47 }
 0x450   :  { %2845 = vst.msk [vmem:[%s5305_s10 + $0x10] sm:$0xff] %vm2842_vm3, %v2688_v20  ;;  %1935 = vmatmul.bf16.gmra.mxu0 %v1127_v62  ;;  %3096 = vmatmul.msk.bf16.gmra.mxu1 %vm2576_vm2, %v2533_v18  ;;  %v2348_v56 = vadd.f32 %v2284_v5, %v1897_v22  ;;  %v1310_v18 = vpop.permute.xlu0 %1309 }
 0x451   :  { %v897_v8 = vpop.f32.mrf.mxu2  ;;  %v1735_v10 = vadd.f32 %v4422_v34, %v1531_v38  ;;  %v1532_v5 = vmul.f32 %v4580_v45, %v1310_v18 }
 0x452   :  { %v2416_v44 = vadd.f32 %v4600_v53, %v2348_v56  ;;  %v898_v32 = vadd.f32 %v897_v8, %v4550_v9 }
 0x454   :  { %v2480_v3 = vmax.f32 %v2416_v44, 0.0  ;;  %v1039_v48 = vmax.f32 %v898_v32, 0.0  ;;  %v1738_v44 = vadd.f32 %v4435_v23, %v1532_v5 }
 0x455   :  { %v1898_v12 = vpop.f32.mrf.mxu0  ;;  %v2689_v14 = vpop.f32.mrf.mxu1 }
 0x456   :  { %v1899_v1 = vadd.f32 %v1898_v12, %v1730_v54  ;;  %v2690_v60 = vadd.f32 %v4706_v21, %v2689_v14  ;;  %v2105_v56 = vpop.permute.xlu2 %2104 }
 0x457   :  { %v2288_v23 = vmul.f32 %v4588_v37, %v2105_v56 }
 0x458   :  { %v2349_v4 = vadd.f32 %v2285_v35, %v1899_v1  ;;  %2846 = vst.msk [vmem:[%s5305_s10 + $0x18] sm:$0xff] %vm2842_vm3, %v2690_v60  ;;  %v1315_v35 = vpop.permute.xlu1 %1314 }
 0x459   :  { %v899_v36 = vpop.f32.mrf.mxu2  ;;  %v1533_v30 = vmul.f32 %v4580_v45, %v1315_v35 }
 0x45a   :  { %v2417_v2 = vadd.f32 %v4600_v53, %v2349_v4  ;;  %v900_v46 = vadd.f32 %v899_v36, %v4550_v9 }
 0x45c   :  { %v2481_v28 = vmax.f32 %v2417_v2, 0.0  ;;  %v1041_v19 = vmax.f32 %v900_v46, 0.0 }
 0x45d   :  { %v1901_v59 = vpop.f32.mrf.mxu0  ;;  %v2692_v31 = vpop.f32.mrf.mxu1 }
 0x45e   :  { %v2693_v63 = vadd.f32 %v4706_v21, %v2692_v31  ;;  %941 = vmatmul.bf16.gmra.mxu2 %v5409_v0  ;;  %v1129_v40 = vpack.c.bf16 %v1041_v19, %v1039_v48  ;;  %v2534_v55 = vpack.c.bf16 %v2481_v28, %v2480_v3  ;;  %v1902_v26 = vadd.f32 %v1901_v59, %v1733_v52 }
 0x45f   :  { %v1740_v48 = vadd.f32 %v4446_v29, %v1533_v30 }
 0x460   :  { %2847 = vst.msk [vmem:[%s5305_s10 + $0x20] sm:$0xff] %vm2842_vm3, %v2693_v63  ;;  %1940 = vmatmul.bf16.gmra.mxu0 %v1129_v40  ;;  %3097 = vmatmul.msk.bf16.gmra.mxu1 %vm2576_vm2, %v2534_v55  ;;  %v2350_v7 = vadd.f32 %v2286_v33, %v1902_v26  ;;  %v2109_v3 = vpop.permute.xlu1 %2108  ;;  %v1320_v63 = vpop.permute.xlu2 %1319 }
 0x461   :  { %v902_v51 = vpop.f32.mrf.mxu2  ;;  %v1534_v49 = vmul.f32 %v4580_v45, %v1320_v63  ;;  %v1325_v26 = vpop.permute.xlu0 %1324 }
 0x462   :  { %v2418_v39 = vadd.f32 %v4600_v53, %v2350_v7  ;;  %v903_v22 = vadd.f32 %v902_v51, %v4550_v9 }
 0x464   :  { %v2482_v12 = vmax.f32 %v2418_v39, 0.0  ;;  %v1043_v14 = vmax.f32 %v903_v22, 0.0  ;;  %v1535_v39 = vmul.f32 %v4580_v45, %v1325_v26 }
 0x465   :  { %v1903_v42 = vpop.f32.mrf.mxu0  ;;  %v2694_v20 = vpop.f32.mrf.mxu1 }
 0x466   :  { %v1904_v17 = vadd.f32 %v1903_v42, %v1735_v10  ;;  %v2695_v62 = vadd.f32 %v4706_v21, %v2694_v20  ;;  %v1743_v20 = vadd.f32 %v4455_v41, %v1534_v49 }
 0x468   :  { %v2351_v8 = vadd.f32 %v2287_v57, %v1904_v17  ;;  %2848 = vst.msk [vmem:[%s5305_s10 + $0x28] sm:$0xff] %vm2842_vm3, %v2695_v62  ;;  %v2117_v5 = vpop.permute.xlu2 %2116 }
 0x469   :  { %v904_v34 = vpop.f32.mrf.mxu2 }
 0x46a   :  { %v2419_v27 = vadd.f32 %v4600_v53, %v2351_v8  ;;  %v905_v54 = vadd.f32 %v904_v34, %v4550_v9  ;;  %v2113_v8 = vpop.permute.xlu1 %2112 }
 0x46b   :  { %v2290_v41 = vmul.f32 %v4588_v37, %v2113_v8 }
 0x46c   :  { %v2483_v1 = vmax.f32 %v2419_v27, 0.0  ;;  %v1045_v60 = vmax.f32 %v905_v54, 0.0  ;;  %v1745_v27 = vadd.f32 %v4463_v24, %v1535_v39 }
 0x46d   :  { %v1906_v43 = vpop.f32.mrf.mxu0  ;;  %v2697_v11 = vpop.f32.mrf.mxu1 }
 0x46e   :  { %v1131_v32 = vpack.c.bf16 %v1045_v60, %v1043_v14  ;;  %v2698_v4 = vadd.f32 %v4706_v21, %v2697_v11  ;;  %946 = vmatmul.bf16.gmra.mxu2 %v4394_v61  ;;  %v2535_v36 = vpack.c.bf16 %v2483_v1, %v2482_v12  ;;  %v1907_v2 = vadd.f32 %v1906_v43, %v1738_v44  ;;  %v1330_v1 = vpop.permute.xlu0 %1329 }
 0x46f   :  { %v2289_v61 = vmul.f32 %v4588_v37, %v2109_v3  ;;  %v1536_v44 = vmul.f32 %v4580_v45, %v1330_v1 }
 0x470   :  { %2849 = vst.msk [vmem:[%s5305_s10 + $0x30] sm:$0xff] %vm2842_vm3, %v2698_v4  ;;  %1945 = vmatmul.bf16.gmra.mxu0 %v1131_v32  ;;  %3098 = vmatmul.msk.bf16.gmra.mxu1 %vm2576_vm2, %v2535_v36  ;;  %v2352_v28 = vadd.f32 %v2288_v23, %v1907_v2 }
 0x471   :  { %v907_v46 = vpop.f32.mrf.mxu2 }
 0x472   :  { %v2420_v0 = vadd.f32 %v4600_v53, %v2352_v28  ;;  %v908_v40 = vadd.f32 %v907_v46, %v4550_v9  ;;  %v1335_v36 = vpop.permute.xlu1 %1334 }
 0x474   :  { %v2484_v51 = vmax.f32 %v2420_v0, 0.0  ;;  %v1047_v47 = vmax.f32 %v908_v40, 0.0 }
 0x475   :  { %v1908_v19 = vpop.f32.mrf.mxu0  ;;  %v2699_v59 = vpop.f32.mrf.mxu1 }
 0x476   :  { %v1909_v31 = vadd.f32 %v1908_v19, %v1740_v48  ;;  %v2700_v52 = vadd.f32 %v4706_v21, %v2699_v59  ;;  %v2125_v40 = vpop.permute.xlu0 %2124 }
 0x478   :  { %v2353_v55 = vadd.f32 %v2289_v61, %v1909_v31  ;;  %2850 = vst.msk [vmem:[%s5305_s10 + $0x38] sm:$0xff] %vm2842_vm3, %v2700_v52  ;;  %v1748_v61 = vadd.f32 %v4479_v15, %v1536_v44  ;;  %v1537_v31 = vmul.f32 %v4580_v45, %v1335_v36  ;;  %v2121_v52 = vpop.permute.xlu2 %2120 }
 0x479   :  { %v909_v29 = vpop.f32.mrf.mxu2  ;;  %v2292_v15 = vmul.f32 %v4588_v37, %v2121_v52 }
 0x47a   :  { %v2421_v38 = vadd.f32 %v4600_v53, %v2353_v55  ;;  %v910_v33 = vadd.f32 %v909_v29, %v4550_v9  ;;  %v1750_v55 = vadd.f32 %v4485_v13, %v1537_v31 }
 0x47c   :  { %v2485_v10 = vmax.f32 %v2421_v38, 0.0  ;;  %v1049_v57 = vmax.f32 %v910_v33, 0.0 }
 0x47d   :  { %v1911_v7 = vpop.f32.mrf.mxu0  ;;  %v2702_v42 = vpop.f32.mrf.mxu1 }
 0x47e   :  { %v1133_v17 = vpack.c.bf16 %v1049_v57, %v1047_v47  ;;  %v2703_v62 = vadd.f32 %v4706_v21, %v2702_v42  ;;  %951 = vmatmul.bf16.gmra.mxu2 %v4417_v50  ;;  %v2536_v18 = vpack.c.bf16 %v2485_v10, %v2484_v51  ;;  %v1912_v22 = vadd.f32 %v1911_v7, %v1743_v20  ;;  %v1340_v51 = vpop.permute.xlu1 %1339 }
 0x47f   :  { %v2291_v50 = vmul.f32 %v4588_v37, %v2117_v5  ;;  %v1538_v7 = vmul.f32 %v4580_v45, %v1340_v51 }
 0x480   :  { %2851 = vst.msk [vmem:[%s5305_s10 + $0x40] sm:$0xff] %vm2842_vm3, %v2703_v62  ;;  %1950 = vmatmul.bf16.gmra.mxu0 %v1133_v17  ;;  %3099 = vmatmul.msk.bf16.gmra.mxu1 %vm2576_vm2, %v2536_v18  ;;  %v2354_v54 = vadd.f32 %v2290_v41, %v1912_v22  ;;  %v1345_v42 = vpop.permute.xlu2 %1344 }
 0x481   :  { %v912_v34 = vpop.f32.mrf.mxu2  ;;  %v1753_v41 = vadd.f32 %v4495_v25, %v1538_v7 }
 0x482   :  { %v2422_v60 = vadd.f32 %v4600_v53, %v2354_v54  ;;  %v913_v43 = vadd.f32 %v912_v34, %v4550_v9 }
 0x484   :  { %v2486_v30 = vmax.f32 %v2422_v60, 0.0  ;;  %v1051_v2 = vmax.f32 %v913_v43, 0.0 }
 0x485   :  { %v1913_v35 = vpop.f32.mrf.mxu0  ;;  %v2704_v56 = vpop.f32.mrf.mxu1 }
 0x486   :  { %v1914_v12 = vadd.f32 %v1913_v35, %v1745_v27  ;;  %v2705_v14 = vadd.f32 %v4706_v21, %v2704_v56  ;;  %v2129_v54 = vpop.permute.xlu1 %2128  ;;  %v1539_v35 = vmul.f32 %v4580_v45, %v1345_v42  ;;  %v4886_v42 = vld [vmem:[%s5303_s7] ss:$0 sm:$0xff] }
 0x487   :  { %v2294_v56 = vmul.f32 %v4588_v37, %v2129_v54 }
 0x488   :  { %v2355_v11 = vadd.f32 %v2291_v50, %v1914_v12  ;;  %2852 = vst.msk [vmem:[%s5305_s10 + $0x48] sm:$0xff] %vm2842_vm3, %v2705_v14  ;;  %v2133_v25 = vpop.permute.xlu2 %2132  ;;  %v1755_v1 = vadd.f32 %v4507_v6, %v1539_v35 }
 0x489   :  { %v914_v24 = vpop.f32.mrf.mxu2  ;;  %v2295_v60 = vmul.f32 %v4588_v37, %v2133_v25 }
 0x48a   :  { %v2423_v32 = vadd.f32 %v4600_v53, %v2355_v11  ;;  %v915_v4 = vadd.f32 %v914_v24, %v4550_v9 }
 0x48c   :  { %v2487_v46 = vmax.f32 %v2423_v32, 0.0  ;;  %v1053_v23 = vmax.f32 %v915_v4, 0.0  ;;  %v1350_v4 = vpop.permute.xlu0 %1349 }
 0x48d   :  { %v1916_v3 = vpop.f32.mrf.mxu0  ;;  %v2707_v48 = vpop.f32.mrf.mxu1 }
 0x48e   :  { %v1135_v28 = vpack.c.bf16 %v1053_v23, %v1051_v2  ;;  %v2708_v19 = vadd.f32 %v4706_v21, %v2707_v48  ;;  %956 = vmatmul.bf16.gmra.mxu2 %v4437_v16  ;;  %v2537_v59 = vpack.c.bf16 %v2487_v46, %v2486_v30  ;;  %v1917_v63 = vadd.f32 %v1916_v3, %v1748_v61  ;;  %v1355_v3 = vpop.permute.xlu1 %1354 }
 0x48f   :  { %v2293_v16 = vmul.f32 %v4588_v37, %v2125_v40  ;;  %v1540_v37 = vmul.f32 %v4580_v45, %v1350_v4  ;;  %v4866_v45 = vld [vmem:[%s5301_s6] ss:$0 sm:$0xff] }
 0x490   :  { %2853 = vst.msk [vmem:[%s5305_s10 + $0x50] sm:$0xff] %vm2842_vm3, %v2708_v19  ;;  %1955 = vmatmul.bf16.gmra.mxu0 %v1135_v28  ;;  %3100 = vmatmul.msk.bf16.gmra.mxu1 %vm2576_vm2, %v2537_v59  ;;  %v2356_v29 = vadd.f32 %v2292_v15, %v1917_v63  ;;  %v2137_v48 = vpop.permute.xlu2 %2136 }
 0x491   :  { %v917_v0 = vpop.f32.mrf.mxu2  ;;  %v1758_v63 = vadd.f32 %v4511_v58, %v1540_v37 }
 0x492   :  { %v2424_v47 = vadd.f32 %v4600_v53, %v2356_v29  ;;  %v918_v10 = vadd.f32 %v917_v0, %v4550_v9 }
 0x494   :  { %v2488_v62 = vmax.f32 %v2424_v47, 0.0  ;;  %v1055_v18 = vmax.f32 %v918_v10, 0.0 }
 0x495   :  { %v1918_v49 = vpop.f32.mrf.mxu0  ;;  %v2709_v38 = vpop.f32.mrf.mxu1 }
 0x496   :  { %v1919_v33 = vadd.f32 %v1918_v49, %v1750_v55  ;;  %v2710_v26 = vadd.f32 %v4706_v21, %v2709_v38  ;;  %v2141_v49 = vpop.permute.xlu1 %2140  ;;  %v5410_v38 = vld [vmem:[#allocation26_spill] sm:$0xff] }
 0x498   :  { %v2357_v57 = vadd.f32 %v2293_v16, %v1919_v33  ;;  %2854 = vst.msk [vmem:[%s5305_s10 + $0x58] sm:$0xff] %vm2842_vm3, %v2710_v26  ;;  %v4877_v16 = vld [vmem:[%s5301_s6 + $0x1] ss:$0 sm:$0xff]  ;;  %v1360_v7 = vpop.permute.xlu2 %1359 }
 0x499   :  { %v919_v13 = vpop.f32.mrf.mxu2  ;;  %v2296_v29 = vmul.f32 %v4877_v16, %v2137_v48  ;;  %v2297_v26 = vmul.f32 %v4877_v16, %v2141_v49 }
 0x49a   :  { %v2425_v20 = vadd.f32 %v4600_v53, %v2357_v57  ;;  %v920_v17 = vadd.f32 %v919_v13, %v4550_v9 }
 0x49c   :  { %v2489_v39 = vmax.f32 %v2425_v20, 0.0  ;;  %v1057_v22 = vmax.f32 %v920_v17, 0.0 }
 0x49d   :  { %v1921_v8 = vpop.f32.mrf.mxu0  ;;  %v2712_v34 = vpop.f32.mrf.mxu1 }
 0x49e   :  { %v1137_v5 = vpack.c.bf16 %v1057_v22, %v1055_v18  ;;  %v2713_v27 = vadd.f32 %v4706_v21, %v2712_v34  ;;  %v2538_v50 = vpack.c.bf16 %v2489_v39, %v2488_v62  ;;  %v1922_v12 = vadd.f32 %v1921_v8, %v1753_v41  ;;  %v4895_v22 = vpop.f32.mrf.mxu3  ;;  %v1365_v41 = vpop.permute.xlu0 %1364 }
 0x49f   :  { %v1542_v39 = vmul.f32 %v4866_v45, %v1360_v7 }
 0x4a0   :  { %2855 = vst.msk [vmem:[%s5305_s10 + $0x60] sm:$0xff] %vm2842_vm3, %v2713_v27  ;;  %1960 = vmatmul.bf16.gmra.mxu0 %v1137_v5  ;;  %3101 = vmatmul.msk.bf16.gmra.mxu1 %vm2576_vm2, %v2538_v50  ;;  %v2358_v43 = vadd.f32 %v2294_v56, %v1922_v12  ;;  %v5411_v12 = vld [vmem:[#allocation2_spill] sm:$0xff]  ;;  %v2149_v4 = vpop.permute.xlu2 %2148 }
 0x4a1   :  { %v922_v14 = vpop.f32.mrf.mxu2 }
 0x4a2   :  { %v2426_v36 = vadd.f32 %v4600_v53, %v2358_v43  ;;  %v923_v30 = vadd.f32 %v922_v14, %v4550_v9  ;;  %v1763_v14 = vadd.f32 %v5411_v12, %v1542_v39  ;;  %v1543_v43 = vmul.f32 %v4866_v45, %v1365_v41 }
 0x4a4   :  { %v2490_v61 = vmax.f32 %v2426_v36, 0.0  ;;  %v1059_v28 = vmax.f32 %v923_v30, 0.0  ;;  %v5412_v36 = vld [vmem:[#allocation3_spill] sm:$0xff] }
 0x4a5   :  { %v1923_v11 = vpop.f32.mrf.mxu0  ;;  %v2714_v24 = vpop.f32.mrf.mxu1  ;;  %v1765_v30 = vadd.f32 %v5412_v36, %v1543_v43 }
 0x4a6   :  { %v1924_v44 = vadd.f32 %v1923_v11, %v1755_v1  ;;  %v2715_v32 = vadd.f32 %v4706_v21, %v2714_v24  ;;  %v2145_v24 = vpop.permute.xlu1 %2144 }
 0x4a8   :  { %v2359_v2 = vadd.f32 %v2295_v60, %v1924_v44  ;;  %2856 = vst.msk [vmem:[%s5305_s10 + $0x68] sm:$0xff] %vm2842_vm3, %v2715_v32  ;;  %v2298_v32 = vmul.f32 %v4877_v16, %v2145_v24 }
 0x4a9   :  { %v924_v6 = vpop.f32.mrf.mxu2 }
 0x4aa   :  { %v2427_v46 = vadd.f32 %v4600_v53, %v2359_v2  ;;  %v925_v23 = vadd.f32 %v924_v6, %v4550_v9  ;;  %v1541_v53 = vmul.f32 %v4866_v45, %v1355_v3  ;;  %v2299_v2 = vmul.f32 %v4877_v16, %v2149_v4  ;;  %v4910_v6 = vpop.f32.mrf.mxu3 }
 0x4ac   :  { %v2491_v19 = vmax.f32 %v2427_v46, 0.0  ;;  %v1061_v59 = vmax.f32 %v925_v23, 0.0  ;;  %v1760_v33 = vadd.f32 %v5410_v38, %v1541_v53  ;;  %v5413_v38 = vld [vmem:[#allocation4_spill] sm:$0xff] }
 0x4ad   :  { %v1926_v31 = vpop.f32.mrf.mxu0  ;;  %v2717_v52 = vpop.f32.mrf.mxu1 }
 0x4ae   :  { %v1139_v0 = vpack.c.bf16 %v1061_v59, %v1059_v28  ;;  %v2718_v15 = vadd.f32 %v4706_v21, %v2717_v52  ;;  %v2539_v40 = vpack.c.bf16 %v2491_v19, %v2490_v61  ;;  %v1927_v55 = vadd.f32 %v1926_v31, %v1758_v63  ;;  %v1370_v61 = vpop.permute.xlu0 %1369 }
 0x4af   :  { %v1544_v52 = vmul.f32 %v4866_v45, %v1370_v61 }
 0x4b0   :  { %2857 = vst.msk [vmem:[%s5305_s10 + $0x70] sm:$0xff] %vm2842_vm3, %v2718_v15  ;;  %1965 = vmatmul.bf16.gmra.mxu0 %v1139_v0  ;;  %3102 = vmatmul.msk.bf16.gmra.mxu1 %vm2576_vm2, %v2539_v40  ;;  %v2360_v51 = vadd.f32 %v2296_v29, %v1927_v55  ;;  %v1375_v15 = vpop.permute.xlu1 %1374 }
 0x4b1   :  { %v927_v58 = vpop.f32.mrf.mxu2 }
 0x4b2   :  { %v2428_v20 = vadd.f32 %v4886_v42, %v2360_v51  ;;  %v928_v17 = vadd.f32 %v927_v58, %v4550_v9  ;;  %v4923_v51 = vpop.f32.mrf.mxu3 }
 0x4b4   :  { %v2492_v5 = vmax.f32 %v2428_v20, 0.0  ;;  %v1063_v27 = vmax.f32 %v928_v17, 0.0 }
 0x4b5   :  { %v1928_v47 = vpop.f32.mrf.mxu0  ;;  %v2719_v10 = vpop.f32.mrf.mxu1 }
 0x4b6   :  { %v1929_v57 = vadd.f32 %v1928_v47, %v1760_v33  ;;  %v2720_v13 = vadd.f32 %v4706_v21, %v2719_v10  ;;  %v1768_v33 = vadd.f32 %v5413_v38, %v1544_v52 }
 0x4b8   :  { %v2361_v62 = vadd.f32 %v2297_v26, %v1929_v57  ;;  %2858 = vst.msk [vmem:[%s5305_s10 + $0x78] sm:$0xff] %vm2842_vm3, %v2720_v13  ;;  %v2153_v26 = vpop.permute.xlu2 %2152  ;;  %v1545_v13 = vmul.f32 %v4866_v45, %v1375_v15 }
 0x4b9   :  { %v929_v18 = vpop.f32.mrf.mxu2  ;;  %v2300_v17 = vmul.f32 %v4877_v16, %v2153_v26 }
 0x4ba   :  { %v2429_v8 = vadd.f32 %v4886_v42, %v2361_v62  ;;  %v930_v34 = vadd.f32 %v929_v18, %v4550_v9  ;;  %v2157_v62 = vpop.permute.xlu0 %2156  ;;  %v5414_v18 = vld [vmem:[#allocation5_spill] sm:$0xff] }
 0x4bb   :  { %v1770_v39 = vadd.f32 %v5414_v18, %v1545_v13 }
 0x4bc   :  { %v2493_v50 = vmax.f32 %v2429_v8, 0.0  ;;  %v1065_v54 = vmax.f32 %v930_v34, 0.0  ;;  %v2301_v8 = vmul.f32 %v4877_v16, %v2157_v62 }
 0x4bd   :  { %v1931_v35 = vpop.f32.mrf.mxu0  ;;  %v2722_v56 = vpop.f32.mrf.mxu1 }
 0x4be   :  { %v1141_v25 = vpack.c.bf16 %v1065_v54, %v1063_v27  ;;  %v2723_v1 = vadd.f32 %v4706_v21, %v2722_v56  ;;  %v2540_v60 = vpack.c.bf16 %v2493_v50, %v2492_v5  ;;  %v1932_v11 = vadd.f32 %v1931_v35, %v1763_v14  ;;  %v1380_v54 = vpop.permute.xlu1 %1379  ;;  %v4936_v56 = vpop.f32.mrf.mxu3 }
 0x4c0   :  { %2859 = vst.msk [vmem:[%s5305_s10 + $0x80] sm:$0xff] %vm2842_vm3, %v2723_v1  ;;  %1970 = vmatmul.bf16.gmra.mxu0 %v1141_v25  ;;  %3103 = vmatmul.msk.bf16.gmra.mxu1 %vm2576_vm2, %v2540_v60  ;;  %v2362_v37 = vadd.f32 %v2298_v32, %v1932_v11  ;;  %v1385_v35 = vpop.permute.xlu2 %1384  ;;  %v1546_v60 = vmul.f32 %v4866_v45, %v1380_v54 }
 0x4c1   :  { %v932_v44 = vpop.f32.mrf.mxu2  ;;  %v1547_v61 = vmul.f32 %v4866_v45, %v1385_v35 }
 0x4c2   :  { %v2430_v28 = vadd.f32 %v4886_v42, %v2362_v37  ;;  %v933_v19 = vadd.f32 %v932_v44, %v4550_v9 }
 0x4c4   :  { %v2494_v40 = vmax.f32 %v2430_v28, 0.0  ;;  %v1067_v53 = vmax.f32 %v933_v19, 0.0 }
 0x4c5   :  { %v1933_v46 = vpop.f32.mrf.mxu0  ;;  %v2724_v23 = vpop.f32.mrf.mxu1 }
 0x4c6   :  { %v1934_v3 = vadd.f32 %v1933_v46, %v1765_v30  ;;  %v2725_v48 = vadd.f32 %v4706_v21, %v2724_v23  ;;  %v4956_v52 = vpop.f32.mrf.mxu3 }
 0x4c8   :  { %v2363_v59 = vadd.f32 %v2299_v2, %v1934_v3  ;;  %2860 = vst.msk [vmem:[%s5305_s10 + $0x88] sm:$0xff] %vm2842_vm3, %v2725_v48  ;;  %v5415_v2 = vld [vmem:[#allocation6_spill] sm:$0xff]  ;;  %v2161_v48 = vpop.permute.xlu1 %2160 }
 0x4c9   :  { %v934_v31 = vpop.f32.mrf.mxu2  ;;  %v1773_v37 = vadd.f32 %v5415_v2, %v1546_v60  ;;  %v2302_v28 = vmul.f32 %v4877_v16, %v2161_v48 }
 0x4ca   :  { %v2431_v63 = vadd.f32 %v4886_v42, %v2363_v59  ;;  %v935_v0 = vadd.f32 %v934_v31, %v4550_v9  ;;  %v2165_v31 = vpop.permute.xlu2 %2164 }
 0x4cb   :  { %v2303_v15 = vmul.f32 %v4877_v16, %v2165_v31 }
 0x4cc   :  { %v2495_v55 = vmax.f32 %v2431_v63, 0.0  ;;  %v1069_v58 = vmax.f32 %v935_v0, 0.0  ;;  %v5416_v63 = vld [vmem:[#allocation7_spill] sm:$0xff] }
 0x4cd   :  { %v1936_v29 = vpop.f32.mrf.mxu0  ;;  %v2727_v49 = vpop.f32.mrf.mxu1  ;;  %v1775_v0 = vadd.f32 %v5416_v63, %v1547_v61 }
 0x4ce   :  { %v1143_v47 = vpack.c.bf16 %v1069_v58, %v1067_v53  ;;  %v2728_v10 = vadd.f32 %v4706_v21, %v2727_v49  ;;  %v2541_v57 = vpack.c.bf16 %v2495_v55, %v2494_v40  ;;  %v1937_v7 = vadd.f32 %v1936_v29, %v1768_v33  ;;  %v1390_v49 = vpop.permute.xlu0 %1389 }
 0x4d0   :  { %2861 = vst.msk [vmem:[%s5305_s10 + $0x90] sm:$0xff] %vm2842_vm3, %v2728_v10  ;;  %1975 = vmatmul.bf16.gmra.mxu0 %v1143_v47  ;;  %3104 = vmatmul.msk.bf16.gmra.mxu1 %vm2576_vm2, %v2541_v57  ;;  %v2364_v34 = vadd.f32 %v2300_v17, %v1937_v7  ;;  %v1548_v10 = vmul.f32 %v4866_v45, %v1390_v49  ;;  %v1395_v7 = vpop.permute.xlu1 %1394  ;;  %v4970_v17 = vpop.f32.mrf.mxu3 }
 0x4d1   :  { %v937_v20 = vpop.f32.mrf.mxu2  ;;  %v1549_v35 = vmul.f32 %v4866_v45, %v1395_v7 }
 0x4d2   :  { %v2432_v12 = vadd.f32 %v4886_v42, %v2364_v34  ;;  %v938_v14 = vadd.f32 %v937_v20, %v4550_v9  ;;  %v2169_v20 = vpop.permute.xlu2 %2168 }
 0x4d4   :  { %v2496_v24 = vmax.f32 %v2432_v12, 0.0  ;;  %v1071_v44 = vmax.f32 %v938_v14, 0.0 }
 0x4d5   :  { %v1938_v41 = vpop.f32.mrf.mxu0  ;;  %v2729_v5 = vpop.f32.mrf.mxu1 }
 0x4d6   :  { %v1939_v27 = vadd.f32 %v1938_v41, %v1770_v39  ;;  %v2730_v50 = vadd.f32 %v4706_v21, %v2729_v5  ;;  %v1778_v5 = vadd.f32 %v4895_v22, %v1548_v10  ;;  %v1780_v22 = vadd.f32 %v4910_v6, %v1549_v35  ;;  %v1405_v48 = vpop.permute.xlu0 %1404 }
 0x4d8   :  { %v2365_v25 = vadd.f32 %v2301_v8, %v1939_v27  ;;  %2862 = vst.msk [vmem:[%s5305_s10 + $0x98] sm:$0xff] %vm2842_vm3, %v2730_v50 }
 0x4d9   :  { %v939_v1 = vpop.f32.mrf.mxu2 }
 0x4da   :  { %v2433_v43 = vadd.f32 %v4886_v42, %v2365_v25  ;;  %v940_v11 = vadd.f32 %v939_v1, %v4550_v9  ;;  %v2304_v25 = vmul.f32 %v4877_v16, %v2169_v20  ;;  %v2173_v1 = vpop.permute.xlu1 %2172 }
 0x4db   :  { %v2305_v60 = vmul.f32 %v4877_v16, %v2173_v1 }
 0x4dc   :  { %v2497_v32 = vmax.f32 %v2433_v43, 0.0  ;;  %v1073_v4 = vmax.f32 %v940_v11, 0.0 }
 0x4dd   :  { %v1941_v36 = vpop.f32.mrf.mxu0  ;;  %v2732_v30 = vpop.f32.mrf.mxu1 }
 0x4de   :  { %v1145_v46 = vpack.c.bf16 %v1073_v4, %v1071_v44  ;;  %v2733_v23 = vadd.f32 %v4706_v21, %v2732_v30  ;;  %v2542_v3 = vpack.c.bf16 %v2497_v32, %v2496_v24  ;;  %v1942_v19 = vadd.f32 %v1941_v36, %v1773_v37  ;;  %v4983_v44 = vpop.f32.mrf.mxu3  ;;  %v1400_v36 = vpop.permute.xlu2 %1399 }
 0x4e0   :  { %2863 = vst.msk [vmem:[%s5305_s10 + $0xa0] sm:$0xff] %vm2842_vm3, %v2733_v23  ;;  %1980 = vmatmul.bf16.gmra.mxu0 %v1145_v46  ;;  %3105 = vmatmul.msk.bf16.gmra.mxu1 %vm2576_vm2, %v2542_v3  ;;  %v2366_v40 = vadd.f32 %v2302_v28, %v1942_v19  ;;  %v1550_v46 = vmul.f32 %v4866_v45, %v1400_v36 }
 0x4e1   :  { %v942_v59 = vpop.f32.mrf.mxu2 }
 0x4e2   :  { %v2434_v38 = vadd.f32 %v4886_v42, %v2366_v40  ;;  %v943_v33 = vadd.f32 %v942_v59, %v4550_v9  ;;  %v2177_v49 = vpop.permute.xlu1 %2176 }
 0x4e4   :  { %v2498_v62 = vmax.f32 %v2434_v38, 0.0  ;;  %v1075_v18 = vmax.f32 %v943_v33, 0.0 }
 0x4e5   :  { %v1943_v53 = vpop.f32.mrf.mxu0  ;;  %v2734_v55 = vpop.f32.mrf.mxu1 }
 0x4e6   :  { %v1944_v58 = vadd.f32 %v1943_v53, %v1775_v0  ;;  %v2735_v29 = vadd.f32 %v4706_v21, %v2734_v55  ;;  %v1783_v0 = vadd.f32 %v4923_v51, %v1550_v46  ;;  %v1551_v55 = vmul.f32 %v4866_v45, %v1405_v48  ;;  %v2181_v33 = vpop.permute.xlu2 %2180  ;;  %v5036_v48 = vld [vmem:[%s5304_s9] ss:$0 sm:$0xff] }
 0x4e7   :  { %v2306_v51 = vmul.f32 %v4877_v16, %v2177_v49 }
 0x4e8   :  { %v2367_v26 = vadd.f32 %v2303_v15, %v1944_v58  ;;  %2864 = vst.msk [vmem:[%s5305_s10 + $0xa8] sm:$0xff] %vm2842_vm3, %v2735_v29  ;;  %v4998_v58 = vpop.f32.mrf.mxu3 }
 0x4e9   :  { %v944_v47 = vpop.f32.mrf.mxu2 }
 0x4ea   :  { %v2435_v57 = vadd.f32 %v4886_v42, %v2367_v26  ;;  %v945_v13 = vadd.f32 %v944_v47, %v4550_v9  ;;  %v1785_v26 = vadd.f32 %v4936_v56, %v1551_v55  ;;  %v2307_v47 = vmul.f32 %v4877_v16, %v2181_v33 }
 0x4ec   :  { %v2499_v39 = vmax.f32 %v2435_v57, 0.0  ;;  %v1077_v8 = vmax.f32 %v945_v13, 0.0 }
 0x4ed   :  { %v1946_v34 = vpop.f32.mrf.mxu0  ;;  %v2737_v41 = vpop.f32.mrf.mxu1 }
 0x4ee   :  { %v1147_v27 = vpack.c.bf16 %v1077_v8, %v1075_v18  ;;  %v2738_v50 = vadd.f32 %v4706_v21, %v2737_v41  ;;  %v2543_v54 = vpack.c.bf16 %v2499_v39, %v2498_v62  ;;  %v1947_v12 = vadd.f32 %v1946_v34, %v1778_v5  ;;  %v1410_v62 = vpop.permute.xlu0 %1409 }
 0x4ef   :  { %v1552_v34 = vmul.f32 %v4866_v45, %v1410_v62 }
 0x4f0   :  { %2865 = vst.msk [vmem:[%s5305_s10 + $0xb0] sm:$0xff] %vm2842_vm3, %v2738_v50  ;;  %1985 = vmatmul.bf16.gmra.mxu0 %v1147_v27  ;;  %3106 = vmatmul.msk.bf16.gmra.mxu1 %vm2576_vm2, %v2543_v54  ;;  %v2368_v43 = vadd.f32 %v2304_v25, %v1947_v12  ;;  %v5016_v41 = vpop.f32.mrf.mxu3  ;;  %v1415_v50 = vpop.permute.xlu1 %1414 }
 0x4f1   :  { %v947_v14 = vpop.f32.mrf.mxu2 }
 0x4f2   :  { %v2436_v30 = vadd.f32 %v4886_v42, %v2368_v43  ;;  %v948_v2 = vadd.f32 %v947_v14, %v4550_v9 }
 0x4f4   :  { %v2500_v61 = vmax.f32 %v2436_v30, 0.0  ;;  %v1079_v28 = vmax.f32 %v948_v2, 0.0 }
 0x4f5   :  { %v1948_v11 = vpop.f32.mrf.mxu0  ;;  %v2739_v24 = vpop.f32.mrf.mxu1 }
 0x4f6   :  { %v1949_v32 = vadd.f32 %v1948_v11, %v1780_v22  ;;  %v2740_v4 = vadd.f32 %v4706_v21, %v2739_v24  ;;  %v1788_v22 = vadd.f32 %v4956_v52, %v1552_v34  ;;  %v2189_v52 = vpop.permute.xlu0 %2188 }
 0x4f8   :  { %v2369_v37 = vadd.f32 %v2305_v60, %v1949_v32  ;;  %2866 = vst.msk [vmem:[%s5305_s10 + $0xb8] sm:$0xff] %vm2842_vm3, %v2740_v4  ;;  %v2185_v60 = vpop.permute.xlu2 %2184  ;;  %v1553_v32 = vmul.f32 %v4866_v45, %v1415_v50 }
 0x4f9   :  { %v949_v6 = vpop.f32.mrf.mxu2  ;;  %v2308_v30 = vmul.f32 %v4877_v16, %v2185_v60 }
 0x4fa   :  { %v2437_v23 = vadd.f32 %v4886_v42, %v2369_v37  ;;  %v950_v3 = vadd.f32 %v949_v6, %v4550_v9  ;;  %v1790_v2 = vadd.f32 %v4970_v17, %v1553_v32  ;;  %v2309_v37 = vmul.f32 %v4877_v16, %v2189_v52 }
 0x4fc   :  { %v2501_v19 = vmax.f32 %v2437_v23, 0.0  ;;  %v1081_v59 = vmax.f32 %v950_v3, 0.0 }
 0x4fd   :  { %v1951_v31 = vpop.f32.mrf.mxu0  ;;  %v2742_v63 = vpop.f32.mrf.mxu1 }
 0x4fe   :  { %v2544_v15 = vpack.c.bf16 %v2501_v19, %v2500_v61  ;;  %v1149_v40 = vpack.c.bf16 %v1081_v59, %v1079_v28  ;;  %v2743_v53 = vadd.f32 %v4706_v21, %v2742_v63  ;;  %v1952_v29 = vadd.f32 %v1951_v31, %v1783_v0  ;;  %v1420_v28 = vpop.permute.xlu1 %1419 }
 0x4ff   :  { %v1554_v0 = vmul.f32 %v4866_v45, %v1420_v28 }
 0x500   :  { %2867 = vst.msk [vmem:[%s5305_s10 + $0xc0] sm:$0xff] %vm2842_vm3, %v2743_v53  ;;  %1990 = vmatmul.bf16.gmra.mxu0 %v1149_v40  ;;  %3107 = vmatmul.msk.bf16.gmra.mxu1 %vm2576_vm2, %v2544_v15  ;;  %v2370_v10 = vadd.f32 %v2306_v51, %v1952_v29  ;;  %v1425_v19 = vpop.permute.xlu2 %1424 }
 0x501   :  { %v952_v38 = vpop.f32.mrf.mxu2  ;;  %v1793_v33 = vadd.f32 %v4983_v44, %v1554_v0 }
 0x502   :  { %v2438_v18 = vadd.f32 %v4886_v42, %v2370_v10  ;;  %v953_v39 = vadd.f32 %v952_v38, %v4550_v9 }
 0x504   :  { %v2502_v54 = vmax.f32 %v2438_v18, 0.0  ;;  %v1083_v35 = vmax.f32 %v953_v39, 0.0 }
 0x505   :  { %v1953_v57 = vpop.f32.mrf.mxu0  ;;  %v2744_v13 = vpop.f32.mrf.mxu1 }
 0x506   :  { %v1954_v7 = vadd.f32 %v1953_v57, %v1785_v26  ;;  %v2745_v20 = vadd.f32 %v4706_v21, %v2744_v13  ;;  %v2193_v13 = vpop.permute.xlu1 %2192 }
 0x508   :  { %v2371_v8 = vadd.f32 %v2307_v47, %v1954_v7  ;;  %2868 = vst.msk [vmem:[%s5305_s10 + $0xc8] sm:$0xff] %vm2842_vm3, %v2745_v20  ;;  %v1555_v7 = vmul.f32 %v4866_v45, %v1425_v19  ;;  %v2310_v20 = vmul.f32 %v4877_v16, %v2193_v13 }
 0x509   :  { %v954_v56 = vpop.f32.mrf.mxu2 }
 0x50a   :  { %v2439_v5 = vadd.f32 %v4886_v42, %v2371_v8  ;;  %v955_v27 = vadd.f32 %v954_v56, %v4550_v9  ;;  %v1795_v44 = vadd.f32 %v4998_v58, %v1555_v7 }
 0x50c   :  { %v2503_v12 = vmax.f32 %v2439_v5, 0.0  ;;  %v1085_v14 = vmax.f32 %v955_v27, 0.0  ;;  %v1430_v27 = vpop.permute.xlu0 %1429 }
 0x50d   :  { %v1956_v25 = vpop.f32.mrf.mxu0  ;;  %v2747_v1 = vpop.f32.mrf.mxu1  ;;  %v1556_v58 = vmul.f32 %v4866_v45, %v1430_v27 }
 0x50e   :  { %v2545_v43 = vpack.c.bf16 %v2503_v12, %v2502_v54  ;;  %v1151_v11 = vpack.c.bf16 %v1085_v14, %v1083_v35  ;;  %v2748_v24 = vadd.f32 %v4706_v21, %v2747_v1  ;;  %v1957_v4 = vadd.f32 %v1956_v25, %v1788_v22  ;;  %v5031_v21 = vpop.f32.mrf.mxu3  ;;  %v1435_v14 = vpop.permute.xlu1 %1434 }
 0x510   :  { %2869 = vst.msk [vmem:[%s5305_s10 + $0xd0] sm:$0xff] %vm2842_vm3, %v2748_v24  ;;  %1995 = vmatmul.bf16.gmra.mxu0 %v1151_v11  ;;  %3108 = vmatmul.msk.bf16.gmra.mxu1 %vm2576_vm2, %v2545_v43  ;;  %v2372_v6 = vadd.f32 %v2308_v30, %v1957_v4  ;;  %v1798_v11 = vadd.f32 %v5016_v41, %v1556_v58 }
 0x511   :  { %v957_v36 = vpop.f32.mrf.mxu2  ;;  %v1557_v4 = vmul.f32 %v4866_v45, %v1435_v14 }
 0x512   :  { %v2440_v59 = vadd.f32 %v4886_v42, %v2372_v6  ;;  %v958_v17 = vadd.f32 %v957_v36, %v4550_v9 }
 0x514   :  { %v2504_v53 = vmax.f32 %v2440_v59, 0.0  ;;  %v1087_v55 = vmax.f32 %v958_v17, 0.0 }
 0x515   :  { %v1958_v46 = vpop.f32.mrf.mxu0  ;;  %v2749_v23 = vpop.f32.mrf.mxu1 }
 0x516   :  { %v1959_v3 = vadd.f32 %v1958_v46, %v1790_v2  ;;  %v2750_v61 = vadd.f32 %v5036_v48, %v2749_v23  ;;  %v1802_v26 = vpop.f32.mrf.mxu3  ;;  %v2205_v2 = vpop.permute.xlu1 %2204 }
 0x517   :  { %v2313_v41 = vmul.f32 %v4877_v16, %v2205_v2 }
 0x518   :  { %v2373_v31 = vadd.f32 %v2309_v37, %v1959_v3  ;;  %2870 = vst.msk [vmem:[%s5305_s10 + $0xd8] sm:$0xff] %vm2842_vm3, %v2750_v61  ;;  %v1800_v37 = vadd.f32 %v5031_v21, %v1557_v4 }
 0x519   :  { %v959_v63 = vpop.f32.mrf.mxu2 }
 0x51a   :  { %v2441_v15 = vadd.f32 %v4886_v42, %v2373_v31  ;;  %v960_v40 = vadd.f32 %v959_v63, %v4550_v9  ;;  %v2197_v9 = vpop.permute.xlu2 %2196  ;;  %v1445_v31 = vpop.permute.xlu0 %1444 }
 0x51b   :  { %v2311_v18 = vmul.f32 %v4877_v16, %v2197_v9 }
 0x51c   :  { %v2505_v29 = vmax.f32 %v2441_v15, 0.0  ;;  %v1089_v49 = vmax.f32 %v960_v40, 0.0 }
 0x51d   :  { %v1961_v38 = vpop.f32.mrf.mxu0  ;;  %v2752_v51 = vpop.f32.mrf.mxu1 }
 0x51e   :  { %v2546_v47 = vpack.c.bf16 %v2505_v29, %v2504_v53  ;;  %v1153_v10 = vpack.c.bf16 %v1089_v49, %v1087_v55  ;;  %v2753_v57 = vadd.f32 %v5036_v48, %v2752_v51  ;;  %v1962_v62 = vadd.f32 %v1961_v38, %v1793_v33  ;;  %v1804_v50 = vpop.f32.mrf.mxu3  ;;  %v2209_v33 = vpop.permute.xlu1 %2208 }
 0x51f   :  { %v1559_v38 = vmul.f32 %v4866_v45, %v1445_v31 }
 0x520   :  { %2871 = vst.msk [vmem:[%s5305_s10 + $0xe0] sm:$0xff] %vm2842_vm3, %v2753_v57  ;;  %2000 = vmatmul.bf16.gmra.mxu0 %v1153_v10  ;;  %3109 = vmatmul.msk.bf16.gmra.mxu1 %vm2576_vm2, %v2546_v47  ;;  %v2374_v39 = vadd.f32 %v2310_v20, %v1962_v62  ;;  %v2314_v47 = vmul.f32 %v4877_v16, %v2209_v33 }
 0x521   :  { %v1805_v57 = vadd.f32 %v1804_v50, %v1559_v38 }
 0x522   :  { %v2442_v54 = vadd.f32 %v4886_v42, %v2374_v39  ;;  %v2201_v25 = vpop.permute.xlu2 %2200 }
 0x523   :  { %v2312_v30 = vmul.f32 %v4877_v16, %v2201_v25 }
 0x524   :  { %v2506_v1 = vmax.f32 %v2442_v54, 0.0 }
 0x525   :  { %v1963_v8 = vpop.f32.mrf.mxu0  ;;  %v2754_v56 = vpop.f32.mrf.mxu1 }
 0x526   :  { %v1964_v34 = vadd.f32 %v1963_v8, %v1795_v44  ;;  %v2755_v5 = vadd.f32 %v5036_v48, %v2754_v56  ;;  %v1807_v52 = vpop.f32.mrf.mxu3 }
 0x528   :  { %v2375_v35 = vadd.f32 %v2311_v18, %v1964_v34  ;;  %2872 = vst.msk [vmem:[%s5305_s10 + $0xe8] sm:$0xff] %vm2842_vm3, %v2755_v5  ;;  %v1450_v18 = vpop.permute.xlu0 %1449  ;;  %v1455_v5 = vpop.permute.xlu1 %1454 }
 0x529   :  { %v1560_v56 = vmul.f32 %v4866_v45, %v1450_v18 }
 0x52a   :  { %v2443_v12 = vadd.f32 %v4886_v42, %v2375_v35  ;;  %v1440_v28 = vpop.permute.xlu2 %1439 }
 0x52b   :  { %v1558_v17 = vmul.f32 %v4866_v45, %v1440_v28  ;;  %v1808_v58 = vadd.f32 %v1807_v52, %v1560_v56 }
 0x52c   :  { %v2507_v22 = vmax.f32 %v2443_v12, 0.0 }
 0x52d   :  { %v1966_v60 = vpop.f32.mrf.mxu0  ;;  %v2757_v43 = vpop.f32.mrf.mxu1  ;;  %v1803_v55 = vadd.f32 %v1802_v26, %v1558_v17 }
 0x52e   :  { %v2547_v24 = vpack.c.bf16 %v2507_v22, %v2506_v1  ;;  %v2758_v32 = vadd.f32 %v5036_v48, %v2757_v43  ;;  %v1967_v36 = vadd.f32 %v1966_v60, %v1798_v11  ;;  %v1809_v63 = vpop.f32.mrf.mxu3  ;;  %v1561_v1 = vmul.f32 %v4866_v45, %v1455_v5 }
 0x530   :  { %2873 = vst.msk [vmem:[%s5305_s10 + $0xf0] sm:$0xff] %vm2842_vm3, %v2758_v32  ;;  %3110 = vmatmul.msk.bf16.gmra.mxu1 %vm2576_vm2, %v2547_v24  ;;  %v2376_v6 = vadd.f32 %v2312_v30, %v1967_v36  ;;  %v2221_v11 = vpop.permute.xlu0 %2220  ;;  %v1810_v24 = vadd.f32 %v1809_v63, %v1561_v1 }
 0x531   :  { %v2317_v32 = vmul.f32 %v4877_v16, %v2221_v11 }
 0x532   :  { %v2444_v19 = vadd.f32 %v4886_v42, %v2376_v6  ;;  %v2213_v10 = vpop.permute.xlu2 %2212 }
 0x533   :  { %v2315_v26 = vmul.f32 %v4877_v16, %v2213_v10 }
 0x534   :  { %v2508_v0 = vmax.f32 %v2444_v19, 0.0 }
 0x535   :  { %v1968_v46 = vpop.f32.mrf.mxu0  ;;  %v2759_v23 = vpop.f32.mrf.mxu1 }
 0x536   :  { %v1969_v3 = vadd.f32 %v1968_v46, %v1800_v37  ;;  %v2760_v61 = vadd.f32 %v5036_v48, %v2759_v23  ;;  %v1812_v62 = vpop.f32.mrf.mxu3  ;;  %v1460_v37 = vpop.permute.xlu1 %1459 }
 0x537   :  { %v1562_v23 = vmul.f32 %v4866_v45, %v1460_v37 }
 0x538   :  { %v2377_v59 = vadd.f32 %v2313_v41, %v1969_v3  ;;  %2874 = vst.msk [vmem:[%s5305_s10 + $0xf8] sm:$0xff] %vm2842_vm3, %v2760_v61 }
 0x53a   :  { %v2445_v21 = vadd.f32 %v4886_v42, %v2377_v59  ;;  %v2217_v12 = vpop.permute.xlu2 %2216 }
 0x53b   :  { %v2316_v43 = vmul.f32 %v4877_v16, %v2217_v12 }
 0x53c   :  { %v2509_v15 = vmax.f32 %v2445_v21, 0.0  ;;  %v1813_v21 = vadd.f32 %v1812_v62, %v1562_v23 }
 0x53d   :  { %v1971_v40 = vpop.f32.mrf.mxu0  ;;  %v2762_v53 = vpop.f32.mrf.mxu1 }
 0x53e   :  { %v2548_v29 = vpack.c.bf16 %v2509_v15, %v2508_v0  ;;  %v2763_v49 = vadd.f32 %v5036_v48, %v2762_v53  ;;  %v1972_v51 = vadd.f32 %v1971_v40, %v1803_v55  ;;  %v1814_v22 = vpop.f32.mrf.mxu3  ;;  %v2225_v0 = vpop.permute.xlu1 %2224 }
 0x53f   :  { %v2318_v40 = vmul.f32 %v4877_v16, %v2225_v0 }
 0x540   :  { %2875 = vst.msk [vmem:[%s5305_s10 + $0x100] sm:$0xff] %vm2842_vm3, %v2763_v49  ;;  %3111 = vmatmul.msk.bf16.gmra.mxu1 %vm2576_vm2, %v2548_v29  ;;  %v2378_v13 = vadd.f32 %v2314_v47, %v1972_v51 }
 0x542   :  { %v2446_v39 = vadd.f32 %v4886_v42, %v2378_v13  ;;  %v1465_v41 = vpop.permute.xlu2 %1464 }
 0x543   :  { %v1563_v15 = vmul.f32 %v4866_v45, %v1465_v41 }
 0x544   :  { %v2510_v27 = vmax.f32 %v2446_v39, 0.0 }
 0x545   :  { %v1973_v7 = vpop.f32.mrf.mxu0  ;;  %v2764_v20 = vpop.f32.mrf.mxu1  ;;  %v1815_v29 = vadd.f32 %v1814_v22, %v1563_v15 }
 0x546   :  { %v1974_v9 = vadd.f32 %v1973_v7, %v1805_v57  ;;  %v2765_v44 = vadd.f32 %v5036_v48, %v2764_v20  ;;  %v1817_v3 = vpop.f32.mrf.mxu3 }
 0x548   :  { %v2379_v8 = vadd.f32 %v2315_v26, %v1974_v9  ;;  %2876 = vst.msk [vmem:[%s5305_s10 + $0x108] sm:$0xff] %vm2842_vm3, %v2765_v44  ;;  %v1470_v26 = vpop.permute.xlu0 %1469  ;;  %v1475_v9 = vpop.permute.xlu1 %1474 }
 0x549   :  { %v1564_v20 = vmul.f32 %v4866_v45, %v1470_v26 }
 0x54a   :  { %v2447_v34 = vadd.f32 %v4886_v42, %v2379_v8  ;;  %v2229_v55 = vpop.permute.xlu2 %2228 }
 0x54b   :  { %v2319_v49 = vmul.f32 %v4877_v16, %v2229_v55 }
 0x54c   :  { %v2511_v50 = vmax.f32 %v2447_v34, 0.0  ;;  %v1818_v34 = vadd.f32 %v1817_v3, %v1564_v20 }
 0x54d   :  { %v1976_v54 = vpop.f32.mrf.mxu0  ;;  %v2767_v35 = vpop.f32.mrf.mxu1 }
 0x54e   :  { %v2549_v14 = vpack.c.bf16 %v2511_v50, %v2510_v27  ;;  %v2768_v25 = vadd.f32 %v5036_v48, %v2767_v35  ;;  %v1977_v60 = vadd.f32 %v1976_v54, %v1808_v58  ;;  %v1819_v38 = vpop.f32.mrf.mxu3  ;;  %v1565_v54 = vmul.f32 %v4866_v45, %v1475_v9 }
 0x550   :  { %2877 = vst.msk [vmem:[%s5305_s10 + $0x110] sm:$0xff] %vm2842_vm3, %v2768_v25  ;;  %3112 = vmatmul.msk.bf16.gmra.mxu1 %vm2576_vm2, %v2549_v14  ;;  %v2380_v4 = vadd.f32 %v2316_v43, %v1977_v60  ;;  %v2237_v12 = vpop.permute.xlu1 %2236  ;;  %v1820_v14 = vadd.f32 %v1819_v38, %v1565_v54 }
 0x551   :  { %v2321_v25 = vmul.f32 %v4877_v16, %v2237_v12 }
 0x552   :  { %v2448_v6 = vadd.f32 %v4886_v42, %v2380_v4  ;;  %v2233_v44 = vpop.permute.xlu2 %2232 }
 0x553   :  { %v2320_v58 = vmul.f32 %v4877_v16, %v2233_v44 }
 0x554   :  { %v2512_v28 = vmax.f32 %v2448_v6, 0.0 }
 0x555   :  { %v1978_v36 = vpop.f32.mrf.mxu0  ;;  %v2769_v30 = vpop.f32.mrf.mxu1 }
 0x556   :  { %v1979_v52 = vadd.f32 %v1978_v36, %v1810_v24  ;;  %v2770_v2 = vadd.f32 %v5036_v48, %v2769_v30  ;;  %v1822_v5 = vpop.f32.mrf.mxu3 }
 0x558   :  { %v2381_v46 = vadd.f32 %v2317_v32, %v1979_v52  ;;  %2878 = vst.msk [vmem:[%s5305_s10 + $0x118] sm:$0xff] %vm2842_vm3, %v2770_v2  ;;  %v1485_v2 = vpop.permute.xlu0 %1484 }
 0x55a   :  { %v2449_v61 = vadd.f32 %v4886_v42, %v2381_v46  ;;  %v1480_v24 = vpop.permute.xlu2 %1479 }
 0x55b   :  { %v1566_v30 = vmul.f32 %v4866_v45, %v1480_v24 }
 0x55c   :  { %v2513_v19 = vmax.f32 %v2449_v61, 0.0 }
 0x55d   :  { %v1981_v59 = vpop.f32.mrf.mxu0  ;;  %v2772_v17 = vpop.f32.mrf.mxu1  ;;  %v1823_v23 = vadd.f32 %v1822_v5, %v1566_v30 }
 0x55e   :  { %v2550_v31 = vpack.c.bf16 %v2513_v19, %v2512_v28  ;;  %v2773_v63 = vadd.f32 %v5036_v48, %v2772_v17  ;;  %v1982_v53 = vadd.f32 %v1981_v59, %v1813_v21  ;;  %v1824_v32 = vpop.f32.mrf.mxu3  ;;  %v1567_v28 = vmul.f32 %v4866_v45, %v1485_v2  ;;  %v2241_v19 = vpop.permute.xlu1 %2240 }
 0x55f   :  { %v2322_v17 = vmul.f32 %v4877_v16, %v2241_v19 }
 0x560   :  { %2879 = vst.msk [vmem:[%s5305_s10 + $0x120] sm:$0xff] %vm2842_vm3, %v2773_v63  ;;  %3113 = vmatmul.msk.bf16.gmra.mxu1 %vm2576_vm2, %v2550_v31  ;;  %v2382_v51 = vadd.f32 %v2318_v40, %v1982_v53  ;;  %v1825_v63 = vadd.f32 %v1824_v32, %v1567_v28 }
 0x562   :  { %v2450_v13 = vadd.f32 %v4886_v42, %v2382_v51  ;;  %v2245_v31 = vpop.permute.xlu2 %2244 }
 0x563   :  { %v2323_v0 = vmul.f32 %v4877_v16, %v2245_v31 }
 0x564   :  { %v2514_v18 = vmax.f32 %v2450_v13, 0.0 }
 0x565   :  { %v1983_v33 = vpop.f32.mrf.mxu0  ;;  %v2774_v47 = vpop.f32.mrf.mxu1 }
 0x566   :  { %v1984_v10 = vadd.f32 %v1983_v33, %v1815_v29  ;;  %v2775_v57 = vadd.f32 %v5036_v48, %v2774_v47  ;;  %v1827_v21 = vpop.f32.mrf.mxu3  ;;  %v1495_v47 = vpop.permute.xlu1 %1494 }
 0x568   :  { %v2383_v7 = vadd.f32 %v2319_v49, %v1984_v10  ;;  %2880 = vst.msk [vmem:[%s5305_s10 + $0x128] sm:$0xff] %vm2842_vm3, %v2775_v57  ;;  %v1490_v49 = vpop.permute.xlu0 %1489 }
 0x569   :  { %v1568_v33 = vmul.f32 %v4866_v45, %v1490_v49 }
 0x56a   :  { %v2451_v62 = vadd.f32 %v4886_v42, %v2383_v7 }
 0x56c   :  { %v2515_v39 = vmax.f32 %v2451_v62, 0.0  ;;  %v1828_v62 = vadd.f32 %v1827_v21, %v1568_v33 }
 0x56d   :  { %v1986_v8 = vpop.f32.mrf.mxu0  ;;  %v2777_v56 = vpop.f32.mrf.mxu1 }
 0x56e   :  { %v2551_v27 = vpack.c.bf16 %v2515_v39, %v2514_v18  ;;  %v2778_v50 = vadd.f32 %v5036_v48, %v2777_v56  ;;  %v1987_v35 = vadd.f32 %v1986_v8, %v1818_v34  ;;  %v1829_v57 = vpop.f32.mrf.mxu3  ;;  %v2249_v18 = vpop.permute.xlu2 %2248  ;;  %v1569_v39 = vmul.f32 %v4866_v45, %v1495_v47 }
 0x56f   :  { %v2324_v34 = vmul.f32 %v4877_v16, %v2249_v18 }
 0x570   :  { %2881 = vst.msk [vmem:[%s5305_s10 + $0x130] sm:$0xff] %vm2842_vm3, %v2778_v50  ;;  %3114 = vmatmul.msk.bf16.gmra.mxu1 %vm2576_vm2, %v2551_v27  ;;  %v2384_v1 = vadd.f32 %v2320_v58, %v1987_v35  ;;  %v2253_v56 = vpop.permute.xlu0 %2252  ;;  %v1830_v5 = vadd.f32 %v1829_v57, %v1569_v39  ;;  %v1500_v27 = vpop.permute.xlu1 %1499 }
 0x571   :  { %v2325_v54 = vmul.f32 %v4877_v16, %v2253_v56 }
 0x572   :  { %v2452_v4 = vadd.f32 %v4886_v42, %v2384_v1 }
 0x574   :  { %v2516_v37 = vmax.f32 %v2452_v4, 0.0 }
 0x575   :  { %v1988_v22 = vpop.f32.mrf.mxu0  ;;  %v2779_v60 = vpop.f32.mrf.mxu1 }
 0x576   :  { %v1989_v43 = vadd.f32 %v1988_v22, %v1820_v14  ;;  %v2780_v11 = vadd.f32 %v5036_v48, %v2779_v60  ;;  %v1505_v60 = vpop.permute.xlu2 %1504 }
 0x578   :  { %v2385_v36 = vadd.f32 %v2321_v25, %v1989_v43  ;;  %2882 = vst.msk [vmem:[%s5305_s10 + $0x138] sm:$0xff] %vm2842_vm3, %v2780_v11  ;;  %v1832_v25 = vpop.f32.mrf.mxu3  ;;  %v1570_v43 = vmul.f32 %v4866_v45, %v1500_v27  ;;  %v2257_v4 = vpop.permute.xlu1 %2256 }
 0x57a   :  { %v2453_v52 = vadd.f32 %v4886_v42, %v2385_v36 }
 0x57c   :  { %v2517_v41 = vmax.f32 %v2453_v52, 0.0  ;;  %v1833_v52 = vadd.f32 %v1832_v25, %v1570_v43 }
 0x57d   :  { %v1991_v6 = vpop.f32.mrf.mxu0  ;;  %v2782_v46 = vpop.f32.mrf.mxu1 }
 0x57e   :  { %v2552_v3 = vpack.c.bf16 %v2517_v41, %v2516_v37  ;;  %v2783_v61 = vadd.f32 %v5036_v48, %v2782_v46  ;;  %v1992_v59 = vadd.f32 %v1991_v6, %v1823_v23  ;;  %v1571_v41 = vmul.f32 %v4866_v45, %v1505_v60 }
 0x57f   :  { %v2326_v6 = vmul.f32 %v4877_v16, %v2257_v4 }
 0x580   :  { %2883 = vst.msk [vmem:[%s5305_s10 + $0x140] sm:$0xff] %vm2842_vm3, %v2783_v61  ;;  %3115 = vmatmul.msk.bf16.gmra.mxu1 %vm2576_vm2, %v2552_v3  ;;  %v2386_v15 = vadd.f32 %v2322_v17, %v1992_v59  ;;  %v1834_v23 = vpop.f32.mrf.mxu3  ;;  %v2261_v3 = vpop.permute.xlu2 %2260 }
 0x581   :  { %v1835_v61 = vadd.f32 %v1834_v23, %v1571_v41  ;;  %v2327_v19 = vmul.f32 %v4877_v16, %v2261_v3 }
 0x582   :  { %v2454_v38 = vadd.f32 %v4886_v42, %v2386_v15 }
 0x584   :  { %v2518_v26 = vmax.f32 %v2454_v38, 0.0 }
 0x585   :  { %v1993_v40 = vpop.f32.mrf.mxu0  ;;  %v2784_v53 = vpop.f32.mrf.mxu1 }
 0x586   :  { %v1994_v55 = vadd.f32 %v1993_v40, %v1825_v63  ;;  %v2785_v29 = vadd.f32 %v5036_v48, %v2784_v53 }
 0x588   :  { %v2387_v51 = vadd.f32 %v2323_v0, %v1994_v55  ;;  %2884 = vst.msk [vmem:[%s5305_s10 + $0x148] sm:$0xff] %vm2842_vm3, %v2785_v29 }
 0x58a   :  { %v2455_v10 = vadd.f32 %v4886_v42, %v2387_v51 }
 0x58c   :  { %v2519_v13 = vmax.f32 %v2455_v10, 0.0 }
 0x58d   :  { %v1996_v7 = vpop.f32.mrf.mxu0  ;;  %v2787_v20 = vpop.f32.mrf.mxu1 }
 0x58e   :  { %v2553_v9 = vpack.c.bf16 %v2519_v13, %v2518_v26  ;;  %v2788_v44 = vadd.f32 %v5036_v48, %v2787_v20  ;;  %v1997_v8 = vadd.f32 %v1996_v7, %v1828_v62 }
 0x590   :  { %2885 = vst.msk [vmem:[%s5305_s10 + $0x150] sm:$0xff] %vm2842_vm3, %v2788_v44  ;;  %3116 = vmatmul.msk.bf16.gmra.mxu1 %vm2576_vm2, %v2553_v9  ;;  %v2388_v50 = vadd.f32 %v2324_v34, %v1997_v8 }
 0x592   :  { %v2456_v1 = vadd.f32 %v4886_v42, %v2388_v50 }
 0x594   :  { %v2520_v24 = vmax.f32 %v2456_v1, 0.0 }
 0x595   :  { %v1998_v35 = vpop.f32.mrf.mxu0  ;;  %v2789_v58 = vpop.f32.mrf.mxu1 }
 0x596   :  { %v1999_v12 = vadd.f32 %v1998_v35, %v1830_v5  ;;  %v2790_v14 = vadd.f32 %v5036_v48, %v2789_v58 }
 0x598   :  { %v2389_v22 = vadd.f32 %v2325_v54, %v1999_v12  ;;  %2886 = vst.msk [vmem:[%s5305_s10 + $0x158] sm:$0xff] %vm2842_vm3, %v2790_v14 }
 0x59a   :  { %v2457_v11 = vadd.f32 %v4886_v42, %v2389_v22 }
 0x59c   :  { %v2521_v32 = vmax.f32 %v2457_v11, 0.0 }
 0x59d   :  { %v2001_v36 = vpop.f32.mrf.mxu0  ;;  %v2792_v30 = vpop.f32.mrf.mxu1 }
 0x59e   :  { %v2554_v2 = vpack.c.bf16 %v2521_v32, %v2520_v24  ;;  %v2793_v37 = vadd.f32 %v5036_v48, %v2792_v30  ;;  %v2002_v46 = vadd.f32 %v2001_v36, %v1833_v52 }
 0x5a0   :  { %2887 = vst.msk [vmem:[%s5305_s10 + $0x160] sm:$0xff] %vm2842_vm3, %v2793_v37  ;;  %3117 = vmatmul.msk.bf16.gmra.mxu1 %vm2576_vm2, %v2554_v2  ;;  %v2390_v28 = vadd.f32 %v2326_v6, %v2002_v46 }
 0x5a2   :  { %v2458_v31 = vadd.f32 %v4886_v42, %v2390_v28 }
 0x5a4   :  { %v2522_v15 = vmax.f32 %v2458_v31, 0.0 }
 0x5a5   :  { %v2003_v59 = vpop.f32.mrf.mxu0  ;;  %v2794_v17 = vpop.f32.mrf.mxu1 }
 0x5a6   :  { %v2004_v21 = vadd.f32 %v2003_v59, %v1835_v61  ;;  %v2795_v45 = vadd.f32 %v5036_v48, %v2794_v17 }
 0x5a8   :  { %v2391_v63 = vadd.f32 %v2327_v19, %v2004_v21  ;;  %2888 = vst.msk [vmem:[%s5305_s10 + $0x168] sm:$0xff] %vm2842_vm3, %v2795_v45 }
 0x5aa   :  { %v2459_v0 = vadd.f32 %v4886_v42, %v2391_v63 }
 0x5ac   :  { %v2523_v40 = vmax.f32 %v2459_v0, 0.0 }
 0x5ad   :  { %v2797_v53 = vpop.f32.mrf.mxu1 }
 0x5ae   :  { %v2555_v55 = vpack.c.bf16 %v2523_v40, %v2522_v15  ;;  %v2798_v16 = vadd.f32 %v5036_v48, %v2797_v53 }
 0x5b0   :  { %2889 = vst.msk [vmem:[%s5305_s10 + $0x170] sm:$0xff] %vm2842_vm3, %v2798_v16  ;;  %3118 = vmatmul.msk.bf16.gmra.mxu1 %vm2576_vm2, %v2555_v55 }
 0x5b5   :  { %v2799_v29 = vpop.f32.mrf.mxu1 }
 0x5b6   :  { %v2800_v49 = vadd.f32 %v5036_v48, %v2799_v29 }
 0x5b8   :  { %2890 = vst.msk [vmem:[%s5305_s10 + $0x178] sm:$0xff] %vm2842_vm3, %v2800_v49 }
 0x5bd   :  { %v2802_v42 = vpop.f32.mrf.mxu1 }
 0x5be   :  { %v2803_v38 = vadd.f32 %v5036_v48, %v2802_v42 }
 0x5c0   :  { %2891 = vst.msk [vmem:[%s5305_s10 + $0x180] sm:$0xff] %vm2842_vm3, %v2803_v38 }
 0x5c5   :  { %v2804_v51 = vpop.f32.mrf.mxu1 }
 0x5c6   :  { %v2805_v33 = vadd.f32 %v5036_v48, %v2804_v51 }
 0x5c8   :  { %2892 = vst.msk [vmem:[%s5305_s10 + $0x188] sm:$0xff] %vm2842_vm3, %v2805_v33 }
 0x5cd   :  { %v2807_v47 = vpop.f32.mrf.mxu1 }
 0x5ce   :  { %v2808_v10 = vadd.f32 %v5036_v48, %v2807_v47 }
 0x5d0   :  { %2893 = vst.msk [vmem:[%s5305_s10 + $0x190] sm:$0xff] %vm2842_vm3, %v2808_v10 }
 0x5d5   :  { %v2809_v57 = vpop.f32.mrf.mxu1 }
 0x5d6   :  { %v2810_v26 = vadd.f32 %v5036_v48, %v2809_v57 }
 0x5d8   :  { %2894 = vst.msk [vmem:[%s5305_s10 + $0x198] sm:$0xff] %vm2842_vm3, %v2810_v26 }
 0x5dd   :  { %v2812_v13 = vpop.f32.mrf.mxu1 }
 0x5de   :  { %v2813_v7 = vadd.f32 %v5036_v48, %v2812_v13 }
 0x5e0   :  { %2895 = vst.msk [vmem:[%s5305_s10 + $0x1a0] sm:$0xff] %vm2842_vm3, %v2813_v7 }
 0x5e5   :  { %v2814_v20 = vpop.f32.mrf.mxu1 }
 0x5e6   :  { %v2815_v62 = vadd.f32 %v5036_v48, %v2814_v20 }
 0x5e8   :  { %2896 = vst.msk [vmem:[%s5305_s10 + $0x1a8] sm:$0xff] %vm2842_vm3, %v2815_v62 }
 0x5ed   :  { %v2817_v9 = vpop.f32.mrf.mxu1 }
 0x5ee   :  { %v2818_v44 = vadd.f32 %v5036_v48, %v2817_v9 }
 0x5f0   :  { %2897 = vst.msk [vmem:[%s5305_s10 + $0x1b0] sm:$0xff] %vm2842_vm3, %v2818_v44 }
 0x5f5   :  { %v2819_v18 = vpop.f32.mrf.mxu1 }
 0x5f6   :  { %v2820_v39 = vadd.f32 %v5036_v48, %v2819_v18 }
 0x5f8   :  { %2898 = vst.msk [vmem:[%s5305_s10 + $0x1b8] sm:$0xff] %vm2842_vm3, %v2820_v39 }
 0x5fd   :  { %v2822_v8 = vpop.f32.mrf.mxu1 }
 0x5fe   :  { %v2823_v56 = vadd.f32 %v5036_v48, %v2822_v8 }
 0x600   :  { %2899 = vst.msk [vmem:[%s5305_s10 + $0x1c0] sm:$0xff] %vm2842_vm3, %v2823_v56 }
 0x605   :  { %v2824_v34 = vpop.f32.mrf.mxu1 }
 0x606   :  { %v2825_v5 = vadd.f32 %v5036_v48, %v2824_v34 }
 0x608   :  { %2900 = vst.msk [vmem:[%s5305_s10 + $0x1c8] sm:$0xff] %vm2842_vm3, %v2825_v5 }
 0x60d   :  { %v2827_v27 = vpop.f32.mrf.mxu1 }
 0x60e   :  { %v2828_v50 = vadd.f32 %v5036_v48, %v2827_v27 }
 0x610   :  { %2901 = vst.msk [vmem:[%s5305_s10 + $0x1d0] sm:$0xff] %vm2842_vm3, %v2828_v50 }
 0x615   :  { %v2829_v54 = vpop.f32.mrf.mxu1 }
 0x616   :  { %v2830_v35 = vadd.f32 %v5036_v48, %v2829_v54 }
 0x618   :  { %2902 = vst.msk [vmem:[%s5305_s10 + $0x1d8] sm:$0xff] %vm2842_vm3, %v2830_v35 }
 0x61d   :  { %v2832_v58 = vpop.f32.mrf.mxu1 }
 0x61e   :  { %v2833_v12 = vadd.f32 %v5036_v48, %v2832_v58 }
 0x620   :  { %2903 = vst.msk [vmem:[%s5305_s10 + $0x1e0] sm:$0xff] %vm2842_vm3, %v2833_v12 }
 0x625   :  { %v2834_v14 = vpop.f32.mrf.mxu1 }
 0x626   :  { %v2835_v25 = vadd.f32 %v5036_v48, %v2834_v14 }
 0x628   :  { %2904 = vst.msk [vmem:[%s5305_s10 + $0x1e8] sm:$0xff] %vm2842_vm3, %v2835_v25 }
 0x62d   :  { %v2837_v1 = vpop.f32.mrf.mxu1 }
 0x62e   :  { %v2838_v22 = vadd.f32 %v5036_v48, %v2837_v1 }
 0x630   :  { %2905 = vst.msk [vmem:[%s5305_s10 + $0x1f0] sm:$0xff] %vm2842_vm3, %v2838_v22 }
 0x635   :  { %v2839_v60 = vpop.f32.mrf.mxu1 }
 0x636   :  { %v2840_v43 = vadd.f32 %v5036_v48, %v2839_v60 }
 0x638   :  { %2906 = vst.msk [vmem:[%s5305_s10 + $0x1f8] sm:$0xff] %vm2842_vm3, %v2840_v43 }

</bundles_post_ra>
